<compile_context>
chip_gen: v6e
topology: v6e:2x2x1
jax: 0.10.0
libtpu: 0.0.40
codegen_flags: <defaults>
</compile_context>

<pallas_src>
import functools

import jax
import jax.numpy as jnp
from jax import lax
from jax.experimental import pallas as pl
from jax.experimental.pallas import tpu as pltpu

# ---- module hyper-parameters (small, TPU-friendly) -------------------------
L_MATRIX = (64, 64)          # node counts per sub-graph
DIM = 16                     # embedding dim
K = 8                        # top-k per row
N_MOD = len(L_MATRIX)
N_SUB = L_MATRIX[0]
N_NODES = sum(L_MATRIX)
N_MATRIX = N_MOD * N_MOD
FEAT = N_MATRIX * DIM        # packed feature width: one DIM-wide slot per block

_NEG = float(jnp.finfo(jnp.float32).min)   # finite sentinel (robust vs. -inf)
_CONTRACT_LAST = (((1,), (1,)), ((), ()))  # x @ y.T without materializing y.T


# ---------------------------------------------------------------------------
# Fused kernel: 3 lane-dense MXU matmuls -> adjacency in registers -> top-k
# ---------------------------------------------------------------------------
def _fused_kernel(el_ref, bl_ref, wl_ref, er_ref, wr_ref, br_ref, out_ref):
    f32 = jnp.float32

    # --- 1. adjacency row-slab from three lane-dense MXU matmuls ------------
    l = jnp.dot(el_ref[...], wl_ref[...], preferred_element_type=f32) + bl_ref[...]
    r = jnp.dot(er_ref[...], wr_ref[...], preferred_element_type=f32) + br_ref[...]
    adj = lax.dot_general(l, r, _CONTRACT_LAST, preferred_element_type=f32)
    # adj: (rows_per_step, N_NODES) -- no VMEM scratch, no 64-lane stores.

    # --- 2. per-row top-k: one XLU reduce per iteration ----------------------
    # The first (smallest-index) maximum of each row is isolated with an MXU
    # inclusive prefix-count:  counts = is_max @ tri,  tri[a,b] = 1 iff a <= b,
    # so counts == 1 exactly at the first max position of every row.
    n = N_NODES
    tri = jnp.where(
        lax.broadcasted_iota(jnp.int32, (n, n), 0)
        <= lax.broadcasted_iota(jnp.int32, (n, n), 1),
        1.0, 0.0).astype(jnp.bfloat16)        # 0/1 exact in bf16, counts <= 128

    def body(_, carry):
        work, acc = carry
        row_max = jnp.max(work, axis=1, keepdims=True)              # XLU reduce
        is_max = work == row_max
        ones = jnp.where(is_max, 1.0, 0.0).astype(jnp.bfloat16)
        counts = jnp.dot(ones, tri, preferred_element_type=f32)     # MXU
        sel = jnp.logical_and(is_max, counts == 1.0)                # first max
        acc = acc + jnp.where(sel, work, 0.0)                       # keep value
        work = jnp.where(sel, _NEG, work)                           # mask it out
        return work, acc

    _, acc = lax.fori_loop(0, K, body, (adj, jnp.zeros_like(adj)), unroll=True)
    out_ref[...] = acc                     # single lane-dense 128-wide store


def graph_directed_sep_init_fused(EL, BL, WL, ER, WR, BR, *, row_shards=1):
    assert N_NODES % row_shards == 0
    rps = N_NODES // row_shards
    return pl.pallas_call(
        _fused_kernel,
        out_shape=jax.ShapeDtypeStruct((N_NODES, N_NODES), jnp.float32),
        grid=(row_shards,),
        in_specs=[
            pl.BlockSpec((rps, FEAT), lambda i: (i, 0)),        # EL (row shard)
            pl.BlockSpec((rps, FEAT), lambda i: (i, 0)),        # BL (row shard)
            pl.BlockSpec((FEAT, FEAT), lambda i: (0, 0)),       # WL (full)
            pl.BlockSpec((N_NODES, FEAT), lambda i: (0, 0)),    # ER (full)
            pl.BlockSpec((FEAT, FEAT), lambda i: (0, 0)),       # WR (full)
            pl.BlockSpec((N_NODES, FEAT), lambda i: (0, 0)),    # BR (full)
        ],
        out_specs=pl.BlockSpec((rps, N_NODES), lambda i: (i, 0)),
        compiler_params=pltpu.CompilerParams(
            dimension_semantics=("parallel",)),
    )(EL, BL, WL, ER, WR, BR)


def _default_row_shards():
    # v7x has 2 TensorCores per chip; a 2-step "parallel" row grid engages
    # both.  v5e/v6e have a single TensorCore -> keep the single-step shape.
    try:
        kind = jax.devices()[0].device_kind.lower()
    except Exception:
        return 1
    return 2 if "v7" in kind else 1


# ---------------------------------------------------------------------------
# Parameter init — mirrors graph_directed_sep_init.__init__ (static_feat=None)
# ---------------------------------------------------------------------------
def init_params(key):
    init_adj = jax.random.normal(key, (N_SUB, N_SUB), dtype=jnp.float32)
    # torch.svd(A) -> U, S, V ;  jnp.linalg.svd -> U, S, V^T
    u, s, vt = jnp.linalg.svd(init_adj, full_matrices=False)
    sqrt_s = jnp.sqrt(s[:DIM])
    initemb1 = u[:, :DIM] * sqrt_s[None, :]          # m[:, :dim] @ diag(p^0.5)
    initemb2 = vt[:DIM, :].T * sqrt_s[None, :]       # (diag(p^0.5) @ n[:, :dim].T).T
    initemb1_list = [initemb1] * N_MOD
    initemb2_list = [initemb2] * N_MOD
    E1 = jnp.stack([initemb1_list[i] for i in range(N_MOD) for _ in range(N_MOD)])
    E2 = jnp.stack([initemb2_list[j] for _ in range(N_MOD) for j in range(N_MOD)])
    W1 = jnp.tile(jnp.eye(DIM, dtype=jnp.float32)[None], (N_MATRIX, 1, 1))
    B1 = jnp.zeros((N_MATRIX, DIM), dtype=jnp.float32)
    return E1, E2, W1, B1, W1, B1


def pack_params(E1, E2, W1, B1, W2, B2):
    """Lossless zero-padded re-layout of the per-block parameters (done once).

    Block b = i*N_MOD + j owns feature slot [b*DIM, (b+1)*DIM).  Row block i of
    L (column block j of R) is nonzero only in the slots of its own blocks, so
    ADJ = (EL@WL+BL) @ (ER@WR+BR).T reproduces the block-structured adjacency
    exactly, for arbitrary per-block weights.
    """
    EL = jnp.zeros((N_NODES, FEAT), jnp.float32)
    BL = jnp.zeros((N_NODES, FEAT), jnp.float32)
    WL = jnp.zeros((FEAT, FEAT), jnp.float32)
    ER = jnp.zeros((N_NODES, FEAT), jnp.float32)
    BR = jnp.zeros((N_NODES, FEAT), jnp.float32)
    WR = jnp.zeros((FEAT, FEAT), jnp.float32)
    for b in range(N_MATRIX):
        i, j = b // N_MOD, b % N_MOD
        sl = slice(b * DIM, (b + 1) * DIM)
        ri = slice(i * N_SUB, (i + 1) * N_SUB)
        rj = slice(j * N_SUB, (j + 1) * N_SUB)
        EL = EL.at[ri, sl].set(E1[b])
        BL = BL.at[ri, sl].set(jnp.broadcast_to(B1[b], (N_SUB, DIM)))
        WL = WL.at[sl, sl].set(W1[b].T)
        ER = ER.at[rj, sl].set(E2[b])
        BR = BR.at[rj, sl].set(jnp.broadcast_to(B2[b], (N_SUB, DIM)))
        WR = WR.at[sl, sl].set(W2[b].T)
    return EL, BL, WL, ER, WR, BR


# ---------------------------------------------------------------------------
# Forward
# ---------------------------------------------------------------------------
@functools.partial(jax.jit, static_argnames=("row_shards",))
def graph_directed_sep_init_forward(idx, EL, BL, WL, ER, WR, BR, *, row_shards=1):
    # `idx` only determines the mask shape (idx.size(0) == nnodes) in the
    # reference module; the embeddings always use arange(num) per sub-graph.
    del idx
    return graph_directed_sep_init_fused(EL, BL, WL, ER, WR, BR,
                                         row_shards=row_shards)


if __name__ == "__main__":
    key = jax.random.PRNGKey(0)
    E1, E2, W1, B1, W2, B2 = init_params(key)
    EL, BL, WL, ER, WR, BR = pack_params(E1, E2, W1, B1, W2, B2)
    idx = jnp.arange(N_NODES, dtype=jnp.int32)       # forward's `idx` argument

    shards = _default_row_shards()
    out = graph_directed_sep_init_forward(idx, EL, BL, WL, ER, WR, BR,
                                          row_shards=shards)
    out = jax.block_until_ready(out)

    assert out.shape == (N_NODES, N_NODES) and out.dtype == jnp.float32
    # each row keeps at most K entries
    nonzero_per_row = jnp.sum((out != 0.0).astype(jnp.int32), axis=1)
    assert bool(jnp.all(nonzero_per_row <= K))

    # cross-check against a pure-JAX reference of the original per-block math
    nv1 = jnp.einsum("bnd,bkd->bnk", E1, W1) + B1[:, None, :]
    nv2 = jnp.einsum("bnd,bkd->bnk", E2, W2) + B2[:, None, :]
    blocks = jnp.einsum("bnd,bmd->bnm", nv1, nv2)
    adj_ref = (blocks.reshape(N_MOD, N_MOD, N_SUB, N_SUB)
                     .transpose(0, 2, 1, 3)
                     .reshape(N_NODES, N_NODES))
    topk_idx = jax.lax.top_k(adj_ref, K)[1]           # scatter 1s at top-k cols
    mask_ref = jnp.zeros_like(adj_ref).at[
        jnp.arange(N_NODES)[:, None], topk_idx].set(1.0)
    ref = adj_ref * mask_ref
    assert bool(jnp.allclose(out, ref, atol=2e-3, rtol=2e-3)), float(
        jnp.max(jnp.abs(out - ref)))

    print("KERNEL_OK")
</pallas_src>

<mosaic_0001>
module attributes {stable_mosaic.version = 11 : i64} {
  func.func @_fused_kernel(%arg0: i32, %arg1: memref<128x64xf32, #tpu.memory_space<vmem>>, %arg2: memref<128x64xf32, #tpu.memory_space<vmem>>, %arg3: memref<64x64xf32, #tpu.memory_space<vmem>>, %arg4: memref<128x64xf32, #tpu.memory_space<vmem>>, %arg5: memref<64x64xf32, #tpu.memory_space<vmem>>, %arg6: memref<128x64xf32, #tpu.memory_space<vmem>>, %arg7: memref<128x128xf32, #tpu.memory_space<vmem>>) attributes {dimension_semantics = [#tpu.dimension_semantics<parallel>], iteration_bounds = array<i64: 1>, scalar_prefetch = 0 : i64, scratch_operands = 0 : i64, tpu.core_type = #tpu.core_type<tc>, window_params = [{transform_indices = @transform_0, window_bounds = array<i64: 128, 64>}, {transform_indices = @transform_1, window_bounds = array<i64: 128, 64>}, {pipeline_mode = #tpu.pipeline_mode<synchronous>, transform_indices = @transform_2, window_bounds = array<i64: 64, 64>}, {pipeline_mode = #tpu.pipeline_mode<synchronous>, transform_indices = @transform_3, window_bounds = array<i64: 128, 64>}, {pipeline_mode = #tpu.pipeline_mode<synchronous>, transform_indices = @transform_4, window_bounds = array<i64: 64, 64>}, {pipeline_mode = #tpu.pipeline_mode<synchronous>, transform_indices = @transform_5, window_bounds = array<i64: 128, 64>}, {transform_indices = @transform_6, window_bounds = array<i64: 128, 128>}]} {
    %c0 = arith.constant 0 : index
    %c0_0 = arith.constant 0 : index
    %0 = vector.load %arg1[%c0, %c0_0] : memref<128x64xf32, #tpu.memory_space<vmem>>, vector<128x64xf32>
    %c0_1 = arith.constant 0 : index
    %c0_2 = arith.constant 0 : index
    %1 = vector.load %arg3[%c0_1, %c0_2] : memref<64x64xf32, #tpu.memory_space<vmem>>, vector<64x64xf32>
    %cst = arith.constant dense<0.000000e+00> : vector<128x64xf32>
    %2 = tpu.matmul %0, %1, %cst {dimension_numbers = #tpu.dot_dimension_numbers<[1], [0], [0], [1], [0, 0, 1, 1], [], []>} : vector<128x64xf32>, vector<64x64xf32>, vector<128x64xf32> -> vector<128x64xf32>
    %c0_3 = arith.constant 0 : index
    %c0_4 = arith.constant 0 : index
    %3 = vector.load %arg2[%c0_3, %c0_4] : memref<128x64xf32, #tpu.memory_space<vmem>>, vector<128x64xf32>
    %4 = arith.addf %2, %3 : vector<128x64xf32>
    %c0_5 = arith.constant 0 : index
    %c0_6 = arith.constant 0 : index
    %5 = vector.load %arg4[%c0_5, %c0_6] : memref<128x64xf32, #tpu.memory_space<vmem>>, vector<128x64xf32>
    %c0_7 = arith.constant 0 : index
    %c0_8 = arith.constant 0 : index
    %6 = vector.load %arg5[%c0_7, %c0_8] : memref<64x64xf32, #tpu.memory_space<vmem>>, vector<64x64xf32>
    %cst_9 = arith.constant dense<0.000000e+00> : vector<128x64xf32>
    %7 = tpu.matmul %5, %6, %cst_9 {dimension_numbers = #tpu.dot_dimension_numbers<[1], [0], [0], [1], [0, 0, 1, 1], [], []>} : vector<128x64xf32>, vector<64x64xf32>, vector<128x64xf32> -> vector<128x64xf32>
    %c0_10 = arith.constant 0 : index
    %c0_11 = arith.constant 0 : index
    %8 = vector.load %arg6[%c0_10, %c0_11] : memref<128x64xf32, #tpu.memory_space<vmem>>, vector<128x64xf32>
    %9 = arith.addf %7, %8 : vector<128x64xf32>
    %cst_12 = arith.constant dense<0.000000e+00> : vector<128x128xf32>
    %10 = tpu.matmul %4, %9, %cst_12 {dimension_numbers = #tpu.dot_dimension_numbers<[1], [1], [0], [0], [0, 0, 1, 0], [], []>} : vector<128x64xf32>, vector<128x64xf32>, vector<128x128xf32> -> vector<128x128xf32>
    %11 = tpu.iota {dimensions = array<i32: 0>} : vector<128x128xi32>
    %12 = tpu.iota {dimensions = array<i32: 1>} : vector<128x128xi32>
    %13 = arith.cmpi sle, %11, %12 : vector<128x128xi32>
    %cst_13 = arith.constant 1.000000e+00 : f32
    %cst_14 = arith.constant 0.000000e+00 : f32
    %14 = vector.broadcast %cst_13 : f32 to vector<128x128xf32>
    %15 = vector.broadcast %cst_14 : f32 to vector<128x128xf32>
    %16 = arith.select %13, %14, %15 : vector<128x128xi1>, vector<128x128xf32>
    %17 = arith.truncf %16 : vector<128x128xf32> to vector<128x128xbf16>
    %cst_15 = arith.constant 0.000000e+00 : f32
    %18 = vector.broadcast %cst_15 : f32 to vector<128x128xf32>
    %c0_i32 = arith.constant 0 : i32
    %cst_16 = arith.constant dense<0xFF800000> : vector<128xf32>
    %19 = vector.multi_reduction <maximumf>, %10, %cst_16 [1] : vector<128x128xf32> to vector<128xf32>
    %20 = vector.shape_cast %19 : vector<128xf32> to vector<128x1xf32>
    %21 = vector.broadcast %20 : vector<128x1xf32> to vector<128x128xf32>
    %22 = arith.cmpf oeq, %10, %21 : vector<128x128xf32>
    %cst_17 = arith.constant 1.000000e+00 : f32
    %cst_18 = arith.constant 0.000000e+00 : f32
    %23 = vector.broadcast %cst_17 : f32 to vector<128x128xf32>
    %24 = vector.broadcast %cst_18 : f32 to vector<128x128xf32>
    %25 = arith.select %22, %23, %24 : vector<128x128xi1>, vector<128x128xf32>
    %26 = arith.truncf %25 : vector<128x128xf32> to vector<128x128xbf16>
    %cst_19 = arith.constant dense<0.000000e+00> : vector<128x128xf32>
    %27 = tpu.matmul %26, %17, %cst_19 {dimension_numbers = #tpu.dot_dimension_numbers<[1], [0], [0], [1], [0, 0, 1, 1], [], []>} : vector<128x128xbf16>, vector<128x128xbf16>, vector<128x128xf32> -> vector<128x128xf32>
    %cst_20 = arith.constant 1.000000e+00 : f32
    %28 = vector.broadcast %cst_20 : f32 to vector<128x128xf32>
    %29 = arith.cmpf oeq, %27, %28 : vector<128x128xf32>
    %30 = arith.andi %22, %29 : vector<128x128xi1>
    %cst_21 = arith.constant 0.000000e+00 : f32
    %31 = vector.broadcast %cst_21 : f32 to vector<128x128xf32>
    %32 = arith.select %30, %10, %31 : vector<128x128xi1>, vector<128x128xf32>
    %33 = arith.addf %18, %32 : vector<128x128xf32>
    %cst_22 = arith.constant -3.40282347E+38 : f32
    %34 = vector.broadcast %cst_22 : f32 to vector<128x128xf32>
    %35 = arith.select %30, %34, %10 : vector<128x128xi1>, vector<128x128xf32>
    %c1_i32 = arith.constant 1 : i32
    %cst_23 = arith.constant dense<0xFF800000> : vector<128xf32>
    %36 = vector.multi_reduction <maximumf>, %35, %cst_23 [1] : vector<128x128xf32> to vector<128xf32>
    %37 = vector.shape_cast %36 : vector<128xf32> to vector<128x1xf32>
    %38 = vector.broadcast %37 : vector<128x1xf32> to vector<128x128xf32>
    %39 = arith.cmpf oeq, %35, %38 : vector<128x128xf32>
    %cst_24 = arith.constant 1.000000e+00 : f32
    %cst_25 = arith.constant 0.000000e+00 : f32
    %40 = vector.broadcast %cst_24 : f32 to vector<128x128xf32>
    %41 = vector.broadcast %cst_25 : f32 to vector<128x128xf32>
    %42 = arith.select %39, %40, %41 : vector<128x128xi1>, vector<128x128xf32>
    %43 = arith.truncf %42 : vector<128x128xf32> to vector<128x128xbf16>
    %cst_26 = arith.constant dense<0.000000e+00> : vector<128x128xf32>
    %44 = tpu.matmul %43, %17, %cst_26 {dimension_numbers = #tpu.dot_dimension_numbers<[1], [0], [0], [1], [0, 0, 1, 1], [], []>} : vector<128x128xbf16>, vector<128x128xbf16>, vector<128x128xf32> -> vector<128x128xf32>
    %cst_27 = arith.constant 1.000000e+00 : f32
    %45 = vector.broadcast %cst_27 : f32 to vector<128x128xf32>
    %46 = arith.cmpf oeq, %44, %45 : vector<128x128xf32>
    %47 = arith.andi %39, %46 : vector<128x128xi1>
    %cst_28 = arith.constant 0.000000e+00 : f32
    %48 = vector.broadcast %cst_28 : f32 to vector<128x128xf32>
    %49 = arith.select %47, %35, %48 : vector<128x128xi1>, vector<128x128xf32>
    %50 = arith.addf %33, %49 : vector<128x128xf32>
    %cst_29 = arith.constant -3.40282347E+38 : f32
    %51 = vector.broadcast %cst_29 : f32 to vector<128x128xf32>
    %52 = arith.select %47, %51, %35 : vector<128x128xi1>, vector<128x128xf32>
    %c2_i32 = arith.constant 2 : i32
    %cst_30 = arith.constant dense<0xFF800000> : vector<128xf32>
    %53 = vector.multi_reduction <maximumf>, %52, %cst_30 [1] : vector<128x128xf32> to vector<128xf32>
    %54 = vector.shape_cast %53 : vector<128xf32> to vector<128x1xf32>
    %55 = vector.broadcast %54 : vector<128x1xf32> to vector<128x128xf32>
    %56 = arith.cmpf oeq, %52, %55 : vector<128x128xf32>
    %cst_31 = arith.constant 1.000000e+00 : f32
    %cst_32 = arith.constant 0.000000e+00 : f32
    %57 = vector.broadcast %cst_31 : f32 to vector<128x128xf32>
    %58 = vector.broadcast %cst_32 : f32 to vector<128x128xf32>
    %59 = arith.select %56, %57, %58 : vector<128x128xi1>, vector<128x128xf32>
    %60 = arith.truncf %59 : vector<128x128xf32> to vector<128x128xbf16>
    %cst_33 = arith.constant dense<0.000000e+00> : vector<128x128xf32>
    %61 = tpu.matmul %60, %17, %cst_33 {dimension_numbers = #tpu.dot_dimension_numbers<[1], [0], [0], [1], [0, 0, 1, 1], [], []>} : vector<128x128xbf16>, vector<128x128xbf16>, vector<128x128xf32> -> vector<128x128xf32>
    %cst_34 = arith.constant 1.000000e+00 : f32
    %62 = vector.broadcast %cst_34 : f32 to vector<128x128xf32>
    %63 = arith.cmpf oeq, %61, %62 : vector<128x128xf32>
    %64 = arith.andi %56, %63 : vector<128x128xi1>
    %cst_35 = arith.constant 0.000000e+00 : f32
    %65 = vector.broadcast %cst_35 : f32 to vector<128x128xf32>
    %66 = arith.select %64, %52, %65 : vector<128x128xi1>, vector<128x128xf32>
    %67 = arith.addf %50, %66 : vector<128x128xf32>
    %cst_36 = arith.constant -3.40282347E+38 : f32
    %68 = vector.broadcast %cst_36 : f32 to vector<128x128xf32>
    %69 = arith.select %64, %68, %52 : vector<128x128xi1>, vector<128x128xf32>
    %c3_i32 = arith.constant 3 : i32
    %cst_37 = arith.constant dense<0xFF800000> : vector<128xf32>
    %70 = vector.multi_reduction <maximumf>, %69, %cst_37 [1] : vector<128x128xf32> to vector<128xf32>
    %71 = vector.shape_cast %70 : vector<128xf32> to vector<128x1xf32>
    %72 = vector.broadcast %71 : vector<128x1xf32> to vector<128x128xf32>
    %73 = arith.cmpf oeq, %69, %72 : vector<128x128xf32>
    %cst_38 = arith.constant 1.000000e+00 : f32
    %cst_39 = arith.constant 0.000000e+00 : f32
    %74 = vector.broadcast %cst_38 : f32 to vector<128x128xf32>
    %75 = vector.broadcast %cst_39 : f32 to vector<128x128xf32>
    %76 = arith.select %73, %74, %75 : vector<128x128xi1>, vector<128x128xf32>
    %77 = arith.truncf %76 : vector<128x128xf32> to vector<128x128xbf16>
    %cst_40 = arith.constant dense<0.000000e+00> : vector<128x128xf32>
    %78 = tpu.matmul %77, %17, %cst_40 {dimension_numbers = #tpu.dot_dimension_numbers<[1], [0], [0], [1], [0, 0, 1, 1], [], []>} : vector<128x128xbf16>, vector<128x128xbf16>, vector<128x128xf32> -> vector<128x128xf32>
    %cst_41 = arith.constant 1.000000e+00 : f32
    %79 = vector.broadcast %cst_41 : f32 to vector<128x128xf32>
    %80 = arith.cmpf oeq, %78, %79 : vector<128x128xf32>
    %81 = arith.andi %73, %80 : vector<128x128xi1>
    %cst_42 = arith.constant 0.000000e+00 : f32
    %82 = vector.broadcast %cst_42 : f32 to vector<128x128xf32>
    %83 = arith.select %81, %69, %82 : vector<128x128xi1>, vector<128x128xf32>
    %84 = arith.addf %67, %83 : vector<128x128xf32>
    %cst_43 = arith.constant -3.40282347E+38 : f32
    %85 = vector.broadcast %cst_43 : f32 to vector<128x128xf32>
    %86 = arith.select %81, %85, %69 : vector<128x128xi1>, vector<128x128xf32>
    %c4_i32 = arith.constant 4 : i32
    %cst_44 = arith.constant dense<0xFF800000> : vector<128xf32>
    %87 = vector.multi_reduction <maximumf>, %86, %cst_44 [1] : vector<128x128xf32> to vector<128xf32>
    %88 = vector.shape_cast %87 : vector<128xf32> to vector<128x1xf32>
    %89 = vector.broadcast %88 : vector<128x1xf32> to vector<128x128xf32>
    %90 = arith.cmpf oeq, %86, %89 : vector<128x128xf32>
    %cst_45 = arith.constant 1.000000e+00 : f32
    %cst_46 = arith.constant 0.000000e+00 : f32
    %91 = vector.broadcast %cst_45 : f32 to vector<128x128xf32>
    %92 = vector.broadcast %cst_46 : f32 to vector<128x128xf32>
    %93 = arith.select %90, %91, %92 : vector<128x128xi1>, vector<128x128xf32>
    %94 = arith.truncf %93 : vector<128x128xf32> to vector<128x128xbf16>
    %cst_47 = arith.constant dense<0.000000e+00> : vector<128x128xf32>
    %95 = tpu.matmul %94, %17, %cst_47 {dimension_numbers = #tpu.dot_dimension_numbers<[1], [0], [0], [1], [0, 0, 1, 1], [], []>} : vector<128x128xbf16>, vector<128x128xbf16>, vector<128x128xf32> -> vector<128x128xf32>
    %cst_48 = arith.constant 1.000000e+00 : f32
    %96 = vector.broadcast %cst_48 : f32 to vector<128x128xf32>
    %97 = arith.cmpf oeq, %95, %96 : vector<128x128xf32>
    %98 = arith.andi %90, %97 : vector<128x128xi1>
    %cst_49 = arith.constant 0.000000e+00 : f32
    %99 = vector.broadcast %cst_49 : f32 to vector<128x128xf32>
    %100 = arith.select %98, %86, %99 : vector<128x128xi1>, vector<128x128xf32>
    %101 = arith.addf %84, %100 : vector<128x128xf32>
    %cst_50 = arith.constant -3.40282347E+38 : f32
    %102 = vector.broadcast %cst_50 : f32 to vector<128x128xf32>
    %103 = arith.select %98, %102, %86 : vector<128x128xi1>, vector<128x128xf32>
    %c5_i32 = arith.constant 5 : i32
    %cst_51 = arith.constant dense<0xFF800000> : vector<128xf32>
    %104 = vector.multi_reduction <maximumf>, %103, %cst_51 [1] : vector<128x128xf32> to vector<128xf32>
    %105 = vector.shape_cast %104 : vector<128xf32> to vector<128x1xf32>
    %106 = vector.broadcast %105 : vector<128x1xf32> to vector<128x128xf32>
    %107 = arith.cmpf oeq, %103, %106 : vector<128x128xf32>
    %cst_52 = arith.constant 1.000000e+00 : f32
    %cst_53 = arith.constant 0.000000e+00 : f32
    %108 = vector.broadcast %cst_52 : f32 to vector<128x128xf32>
    %109 = vector.broadcast %cst_53 : f32 to vector<128x128xf32>
    %110 = arith.select %107, %108, %109 : vector<128x128xi1>, vector<128x128xf32>
    %111 = arith.truncf %110 : vector<128x128xf32> to vector<128x128xbf16>
    %cst_54 = arith.constant dense<0.000000e+00> : vector<128x128xf32>
    %112 = tpu.matmul %111, %17, %cst_54 {dimension_numbers = #tpu.dot_dimension_numbers<[1], [0], [0], [1], [0, 0, 1, 1], [], []>} : vector<128x128xbf16>, vector<128x128xbf16>, vector<128x128xf32> -> vector<128x128xf32>
    %cst_55 = arith.constant 1.000000e+00 : f32
    %113 = vector.broadcast %cst_55 : f32 to vector<128x128xf32>
    %114 = arith.cmpf oeq, %112, %113 : vector<128x128xf32>
    %115 = arith.andi %107, %114 : vector<128x128xi1>
    %cst_56 = arith.constant 0.000000e+00 : f32
    %116 = vector.broadcast %cst_56 : f32 to vector<128x128xf32>
    %117 = arith.select %115, %103, %116 : vector<128x128xi1>, vector<128x128xf32>
    %118 = arith.addf %101, %117 : vector<128x128xf32>
    %cst_57 = arith.constant -3.40282347E+38 : f32
    %119 = vector.broadcast %cst_57 : f32 to vector<128x128xf32>
    %120 = arith.select %115, %119, %103 : vector<128x128xi1>, vector<128x128xf32>
    %c6_i32 = arith.constant 6 : i32
    %cst_58 = arith.constant dense<0xFF800000> : vector<128xf32>
    %121 = vector.multi_reduction <maximumf>, %120, %cst_58 [1] : vector<128x128xf32> to vector<128xf32>
    %122 = vector.shape_cast %121 : vector<128xf32> to vector<128x1xf32>
    %123 = vector.broadcast %122 : vector<128x1xf32> to vector<128x128xf32>
    %124 = arith.cmpf oeq, %120, %123 : vector<128x128xf32>
    %cst_59 = arith.constant 1.000000e+00 : f32
    %cst_60 = arith.constant 0.000000e+00 : f32
    %125 = vector.broadcast %cst_59 : f32 to vector<128x128xf32>
    %126 = vector.broadcast %cst_60 : f32 to vector<128x128xf32>
    %127 = arith.select %124, %125, %126 : vector<128x128xi1>, vector<128x128xf32>
    %128 = arith.truncf %127 : vector<128x128xf32> to vector<128x128xbf16>
    %cst_61 = arith.constant dense<0.000000e+00> : vector<128x128xf32>
    %129 = tpu.matmul %128, %17, %cst_61 {dimension_numbers = #tpu.dot_dimension_numbers<[1], [0], [0], [1], [0, 0, 1, 1], [], []>} : vector<128x128xbf16>, vector<128x128xbf16>, vector<128x128xf32> -> vector<128x128xf32>
    %cst_62 = arith.constant 1.000000e+00 : f32
    %130 = vector.broadcast %cst_62 : f32 to vector<128x128xf32>
    %131 = arith.cmpf oeq, %129, %130 : vector<128x128xf32>
    %132 = arith.andi %124, %131 : vector<128x128xi1>
    %cst_63 = arith.constant 0.000000e+00 : f32
    %133 = vector.broadcast %cst_63 : f32 to vector<128x128xf32>
    %134 = arith.select %132, %120, %133 : vector<128x128xi1>, vector<128x128xf32>
    %135 = arith.addf %118, %134 : vector<128x128xf32>
    %cst_64 = arith.constant -3.40282347E+38 : f32
    %136 = vector.broadcast %cst_64 : f32 to vector<128x128xf32>
    %137 = arith.select %132, %136, %120 : vector<128x128xi1>, vector<128x128xf32>
    %c7_i32 = arith.constant 7 : i32
    %cst_65 = arith.constant dense<0xFF800000> : vector<128xf32>
    %138 = vector.multi_reduction <maximumf>, %137, %cst_65 [1] : vector<128x128xf32> to vector<128xf32>
    %139 = vector.shape_cast %138 : vector<128xf32> to vector<128x1xf32>
    %140 = vector.broadcast %139 : vector<128x1xf32> to vector<128x128xf32>
    %141 = arith.cmpf oeq, %137, %140 : vector<128x128xf32>
    %cst_66 = arith.constant 1.000000e+00 : f32
    %cst_67 = arith.constant 0.000000e+00 : f32
    %142 = vector.broadcast %cst_66 : f32 to vector<128x128xf32>
    %143 = vector.broadcast %cst_67 : f32 to vector<128x128xf32>
    %144 = arith.select %141, %142, %143 : vector<128x128xi1>, vector<128x128xf32>
    %145 = arith.truncf %144 : vector<128x128xf32> to vector<128x128xbf16>
    %cst_68 = arith.constant dense<0.000000e+00> : vector<128x128xf32>
    %146 = tpu.matmul %145, %17, %cst_68 {dimension_numbers = #tpu.dot_dimension_numbers<[1], [0], [0], [1], [0, 0, 1, 1], [], []>} : vector<128x128xbf16>, vector<128x128xbf16>, vector<128x128xf32> -> vector<128x128xf32>
    %cst_69 = arith.constant 1.000000e+00 : f32
    %147 = vector.broadcast %cst_69 : f32 to vector<128x128xf32>
    %148 = arith.cmpf oeq, %146, %147 : vector<128x128xf32>
    %149 = arith.andi %141, %148 : vector<128x128xi1>
    %cst_70 = arith.constant 0.000000e+00 : f32
    %150 = vector.broadcast %cst_70 : f32 to vector<128x128xf32>
    %151 = arith.select %149, %137, %150 : vector<128x128xi1>, vector<128x128xf32>
    %152 = arith.addf %135, %151 : vector<128x128xf32>
    %cst_71 = arith.constant -3.40282347E+38 : f32
    %153 = vector.broadcast %cst_71 : f32 to vector<128x128xf32>
    %154 = arith.select %149, %153, %137 : vector<128x128xi1>, vector<128x128xf32>
    %c0_72 = arith.constant 0 : index
    %c0_73 = arith.constant 0 : index
    %155 = vector.load %arg7[%c0_72, %c0_73] : memref<128x128xf32, #tpu.memory_space<vmem>>, vector<128x128xf32>
    tpu.vector_store %arg7[%c0_72, %c0_73], %152 {strides = array<i32>} : memref<128x128xf32, #tpu.memory_space<vmem>>, vector<128x128xf32>,
    return
  }
  func.func @transform_0(%arg0: i32) -> (i32, i32) {
    %c0_i32 = arith.constant 0 : i32
    %c0_i32_0 = arith.constant 0 : i32
    return %arg0, %c0_i32 : i32, i32
  }
  func.func @transform_1(%arg0: i32) -> (i32, i32) {
    %c0_i32 = arith.constant 0 : i32
    %c0_i32_0 = arith.constant 0 : i32
    return %arg0, %c0_i32 : i32, i32
  }
  func.func @transform_2(%arg0: i32) -> (i32, i32) {
    %c0_i32 = arith.constant 0 : i32
    %c0_i32_0 = arith.constant 0 : i32
    %c0_i32_1 = arith.constant 0 : i32
    return %c0_i32, %c0_i32_0 : i32, i32
  }
  func.func @transform_3(%arg0: i32) -> (i32, i32) {
    %c0_i32 = arith.constant 0 : i32
    %c0_i32_0 = arith.constant 0 : i32
    %c0_i32_1 = arith.constant 0 : i32
    return %c0_i32, %c0_i32_0 : i32, i32
  }
  func.func @transform_4(%arg0: i32) -> (i32, i32) {
    %c0_i32 = arith.constant 0 : i32
    %c0_i32_0 = arith.constant 0 : i32
    %c0_i32_1 = arith.constant 0 : i32
    return %c0_i32, %c0_i32_0 : i32, i32
  }
  func.func @transform_5(%arg0: i32) -> (i32, i32) {
    %c0_i32 = arith.constant 0 : i32
    %c0_i32_0 = arith.constant 0 : i32
    %c0_i32_1 = arith.constant 0 : i32
    return %c0_i32, %c0_i32_0 : i32, i32
  }
  func.func @transform_6(%arg0: i32) -> (i32, i32) {
    %c0_i32 = arith.constant 0 : i32
    %c0_i32_0 = arith.constant 0 : i32
    return %arg0, %c0_i32 : i32, i32
  }
}

</mosaic_0001>

<bundles_post_ra>
// kernel: graph_directed_sep_init_forward.1
= control target key start
LH: loop header
LB: loop body
LE: loop exit
PB: predicated region body
PF: predicated region fallthrough
CT: control target
= control target key end

     0   :  { %vm65_vm0 = vcmask 523264   ;;  %s7263_s0 = inlined_call_operand.vmem [shape: f32[128,64], index: 0, kind: input, shape index: {}]   ;;  %s7264_s1 = inlined_call_operand.vmem [shape: f32[128,64], index: 1, kind: input, shape index: {}]   ;;  %s7265_s2 = inlined_call_operand.vmem [shape: f32[64,64], index: 2, kind: input, shape index: {}]   ;;  %s7266_s3 = inlined_call_operand.vmem [shape: f32[128,64], index: 3, kind: input, shape index: {}]   ;;  %s7267_s4 = inlined_call_operand.vmem [shape: f32[64,64], index: 4, kind: input, shape index: {}]   ;;  %s7268_s5 = inlined_call_operand.vmem [shape: f32[128,64], index: 5, kind: input, shape index: {}]   ;;  %s7269_s6 = inlined_call_operand.hbm [shape: f32[128,128], index: 6, kind: output, shape index: {}]  }
   0x1   :  { %v282_v0 = vld [vmem:[%s7267_s4 + $0x38] sm:$0xff]  ;;  %v281_v1 = vld [vmem:[%s7267_s4 + $0x30] sm:$0xff]  ;;  %v280_v2 = vld [vmem:[%s7267_s4 + $0x28] sm:$0xff] }
   0x2   :  { %3368 = vmatprep.subr.mxu1 %v282_v0  ;;  %v259_v3 = vld [vmem:[%s7266_s3] sm:$0xff]  ;;  %v278_v5 = vld [vmem:[%s7267_s4 + $0x18] sm:$0xff]  ;;  %v277_v6 = vld [vmem:[%s7267_s4 + $0x10] sm:$0xff] }
   0x3   :  { %3369 = vmatpush3.msra.mxu1 %v282_v0  ;;  %3384 = vmatprep.mubr.msk.f32.mxu1 %vm65_vm0, %v259_v3  ;;  %v279_v4 = vld [vmem:[%s7267_s4 + $0x20] sm:$0xff]  ;;  %v48_v7 = vld [vmem:[%s7265_s2 + $0x38] sm:$0xff]  ;;  %v47_v8 = vld [vmem:[%s7265_s2 + $0x30] sm:$0xff] }
   0x4   :  { %3370 = vmatprep.subr.mxu1 %v281_v1  ;;  %3328 = vmatprep.subr.mxu0 %v48_v7  ;;  %v276_v9 = vld [vmem:[%s7267_s4 + $0x8] sm:$0xff]  ;;  %v275_v11 = vld [vmem:[%s7267_s4] sm:$0xff]  ;;  %v44_v14 = vld [vmem:[%s7265_s2 + $0x18] sm:$0xff] }
   0x5   :  { %3371 = vmatpush3.msra.mxu1 %v281_v1  ;;  %3329 = vmatpush3.msra.mxu0 %v48_v7  ;;  %v46_v10 = vld [vmem:[%s7265_s2 + $0x28] sm:$0xff]  ;;  %v45_v12 = vld [vmem:[%s7265_s2 + $0x20] sm:$0xff]  ;;  %v261_v15 = vld [vmem:[%s7266_s3 + $0x10] sm:$0xff] }
   0x6   :  { %3372 = vmatprep.subr.mxu1 %v280_v2  ;;  %3330 = vmatprep.subr.mxu0 %v47_v8  ;;  %v260_v13 = vld [vmem:[%s7266_s3 + $0x8] sm:$0xff]  ;;  %v43_v16 = vld [vmem:[%s7265_s2 + $0x10] sm:$0xff]  ;;  %v25_v17 = vld [vmem:[%s7263_s0] sm:$0xff] }
   0x7   :  { %3373 = vmatpush3.msra.mxu1 %v280_v2  ;;  %3331 = vmatpush3.msra.mxu0 %v47_v8 }
   0x8   :  { %3374 = vmatprep.subr.mxu1 %v279_v4  ;;  %3332 = vmatprep.subr.mxu0 %v46_v10 }
   0x9   :  { %3375 = vmatpush3.msra.mxu1 %v279_v4  ;;  %3333 = vmatpush3.msra.mxu0 %v46_v10 }
   0xa   :  { %3376 = vmatprep.subr.mxu1 %v278_v5  ;;  %3334 = vmatprep.subr.mxu0 %v45_v12 }
   0xb   :  { %3377 = vmatpush3.msra.mxu1 %v278_v5  ;;  %3335 = vmatpush3.msra.mxu0 %v45_v12 }
   0xc   :  { %3378 = vmatprep.subr.mxu1 %v277_v6 }
   0xd   :  { %3379 = vmatpush3.msra.mxu1 %v277_v6 }
   0xe   :  { %3380 = vmatprep.subr.mxu1 %v276_v9 }
   0xf   :  { %3381 = vmatpush3.msra.mxu1 %v276_v9 }
  0x10   :  { %3382 = vmatprep.subr.mxu1 %v275_v11 }
  0x11   :  { %3383 = vmatpush3.msra.mxu1 %v275_v11 }
  0x12   :  { %11 = vsyncpa [#allocation3], 0  ;;  %3385 = vmatmul.mubr.msk.f32.vlgmr.msra.gmra.mxu1 %vm65_vm0, %v260_v13  ;;  %3336 = vmatprep.subr.mxu0 %v44_v14  ;;  %v262_v18 = vld [vmem:[%s7266_s3 + $0x18] sm:$0xff]  ;;  %v42_v19 = vld [vmem:[%s7265_s2 + $0x8] sm:$0xff] }
  0x13   :  { %3387 = vmatprep.mubr.msk.f32.mxu1 %vm65_vm0, %v261_v15  ;;  %3337 = vmatpush3.msra.mxu0 %v44_v14  ;;  %v263_v20 = vld [vmem:[%s7266_s3 + $0x20] sm:$0xff]  ;;  %v264_v22 = vld [vmem:[%s7266_s3 + $0x28] sm:$0xff]  ;;  %v265_v24 = vld [vmem:[%s7266_s3 + $0x30] sm:$0xff] }
  0x14   :  { %3338 = vmatprep.subr.mxu0 %v43_v16  ;;  %3344 = vmatprep.mubr.msk.f32.mxu0 %vm65_vm0, %v25_v17  ;;  %v41_v21 = vld [vmem:[%s7265_s2] sm:$0xff]  ;;  %v26_v23 = vld [vmem:[%s7263_s0 + $0x8] sm:$0xff]  ;;  %v27_v25 = vld [vmem:[%s7263_s0 + $0x10] sm:$0xff] }
  0x15   :  { %3339 = vmatpush3.msra.mxu0 %v43_v16  ;;  %v266_v26 = vld [vmem:[%s7266_s3 + $0x38] sm:$0xff]  ;;  %v267_v28 = vld [vmem:[%s7266_s3 + $0x40] sm:$0xff]  ;;  %v268_v30 = vld [vmem:[%s7266_s3 + $0x48] sm:$0xff] }
  0x16   :  { %3388 = vmatmul.mubr.msk.f32.gmra.mxu1 %vm65_vm0, %v262_v18  ;;  %3340 = vmatprep.subr.mxu0 %v42_v19  ;;  %v28_v27 = vld [vmem:[%s7263_s0 + $0x18] sm:$0xff]  ;;  %v29_v29 = vld [vmem:[%s7263_s0 + $0x20] sm:$0xff]  ;;  %v30_v31 = vld [vmem:[%s7263_s0 + $0x28] sm:$0xff] }
  0x17   :  { %3390 = vmatprep.mubr.msk.f32.mxu1 %vm65_vm0, %v263_v20  ;;  %3341 = vmatpush3.msra.mxu0 %v42_v19  ;;  %v269_v32 = vld [vmem:[%s7266_s3 + $0x50] sm:$0xff]  ;;  %v270_v34 = vld [vmem:[%s7266_s3 + $0x58] sm:$0xff]  ;;  %v271_v36 = vld [vmem:[%s7266_s3 + $0x60] sm:$0xff] }
  0x18   :  { %3342 = vmatprep.subr.mxu0 %v41_v21  ;;  %v31_v33 = vld [vmem:[%s7263_s0 + $0x30] sm:$0xff]  ;;  %v32_v35 = vld [vmem:[%s7263_s0 + $0x38] sm:$0xff]  ;;  %v33_v37 = vld [vmem:[%s7263_s0 + $0x40] sm:$0xff] }
  0x19   :  { %3343 = vmatpush3.msra.mxu0 %v41_v21  ;;  %v272_v38 = vld [vmem:[%s7266_s3 + $0x68] sm:$0xff]  ;;  %v273_v40 = vld [vmem:[%s7266_s3 + $0x70] sm:$0xff]  ;;  %v274_v42 = vld [vmem:[%s7266_s3 + $0x78] sm:$0xff] }
  0x1a   :  { %3391 = vmatmul.mubr.msk.f32.gmra.mxu1 %vm65_vm0, %v264_v22  ;;  %3345 = vmatmul.mubr.msk.f32.vlgmr.msra.gmra.mxu0 %vm65_vm0, %v26_v23  ;;  %v34_v39 = vld [vmem:[%s7263_s0 + $0x48] sm:$0xff]  ;;  %v35_v41 = vld [vmem:[%s7263_s0 + $0x50] sm:$0xff]  ;;  %v36_v43 = vld [vmem:[%s7263_s0 + $0x58] sm:$0xff] }
  0x1b   :  { %3393 = vmatprep.mubr.msk.f32.mxu1 %vm65_vm0, %v265_v24  ;;  %3347 = vmatprep.mubr.msk.f32.mxu0 %vm65_vm0, %v27_v25  ;;  %v37_v44 = vld [vmem:[%s7263_s0 + $0x60] sm:$0xff]  ;;  %v38_v45 = vld [vmem:[%s7263_s0 + $0x68] sm:$0xff]  ;;  %v39_v46 = vld [vmem:[%s7263_s0 + $0x70] sm:$0xff] }
  0x1c   :  { %v40_v47 = vld [vmem:[%s7263_s0 + $0x78] sm:$0xff]  ;;  %v49_v54 = vld [vmem:[%s7264_s1] sm:$0xff]  ;;  %v297_v4 = vld [vmem:[%s7268_s5 + $0x70] sm:$0xff] }
  0x1d   :  { %v298_v2 = vld [vmem:[%s7268_s5 + $0x78] sm:$0xff]  ;;  %v296_v8 = vld [vmem:[%s7268_s5 + $0x68] sm:$0xff]  ;;  %v295_v10 = vld [vmem:[%s7268_s5 + $0x60] sm:$0xff] }
  0x1e   :  { %3394 = vmatmul.mubr.msk.f32.gmra.mxu1 %vm65_vm0, %v266_v26  ;;  %3348 = vmatmul.mubr.msk.f32.gmra.mxu0 %vm65_vm0, %v28_v27  ;;  %v294_v12 = vld [vmem:[%s7268_s5 + $0x58] sm:$0xff]  ;;  %v293_v14 = vld [vmem:[%s7268_s5 + $0x50] sm:$0xff]  ;;  %v292_v16 = vld [vmem:[%s7268_s5 + $0x48] sm:$0xff] }
  0x1f   :  { %3396 = vmatprep.mubr.msk.f32.mxu1 %vm65_vm0, %v267_v28  ;;  %3350 = vmatprep.mubr.msk.f32.mxu0 %vm65_vm0, %v29_v29  ;;  %v291_v18 = vld [vmem:[%s7268_s5 + $0x40] sm:$0xff]  ;;  %v290_v20 = vld [vmem:[%s7268_s5 + $0x38] sm:$0xff]  ;;  %v289_v22 = vld [vmem:[%s7268_s5 + $0x30] sm:$0xff] }
  0x20   :  { %v288_v25 = vld [vmem:[%s7268_s5 + $0x28] sm:$0xff]  ;;  %v287_v28 = vld [vmem:[%s7268_s5 + $0x20] sm:$0xff] }
  0x22   :  { %3397 = vmatmul.mubr.msk.f32.gmra.mxu1 %vm65_vm0, %v268_v30  ;;  %3351 = vmatmul.mubr.msk.f32.gmra.mxu0 %vm65_vm0, %v30_v31  ;;  %v286_v31 = vld [vmem:[%s7268_s5 + $0x18] sm:$0xff] }
  0x23   :  { %3399 = vmatprep.mubr.msk.f32.mxu1 %vm65_vm0, %v269_v32  ;;  %3353 = vmatprep.mubr.msk.f32.mxu0 %vm65_vm0, %v31_v33 }
  0x26   :  { %3400 = vmatmul.mubr.msk.f32.gmra.mxu1 %vm65_vm0, %v270_v34  ;;  %3354 = vmatmul.mubr.msk.f32.gmra.mxu0 %vm65_vm0, %v32_v35  ;;  %v285_v34 = vld [vmem:[%s7268_s5 + $0x10] sm:$0xff] }
  0x27   :  { %3402 = vmatprep.mubr.msk.f32.mxu1 %vm65_vm0, %v271_v36  ;;  %3356 = vmatprep.mubr.msk.f32.mxu0 %vm65_vm0, %v33_v37  ;;  %v284_v37 = vld [vmem:[%s7268_s5 + $0x8] sm:$0xff] }
  0x2a   :  { %3403 = vmatmul.mubr.msk.f32.gmra.mxu1 %vm65_vm0, %v272_v38  ;;  %3357 = vmatmul.mubr.msk.f32.gmra.mxu0 %vm65_vm0, %v34_v39 }
  0x2b   :  { %3405 = vmatprep.mubr.msk.f32.mxu1 %vm65_vm0, %v273_v40  ;;  %3359 = vmatprep.mubr.msk.f32.mxu0 %vm65_vm0, %v35_v41  ;;  %v283_v40 = vld [vmem:[%s7268_s5] sm:$0xff] }
  0x2e   :  { %3406 = vmatmul.mubr.msk.f32.gmra.mxu1 %vm65_vm0, %v274_v42  ;;  %3360 = vmatmul.mubr.msk.f32.gmra.mxu0 %vm65_vm0, %v36_v43  ;;  %v51_v43 = vld [vmem:[%s7264_s1 + $0x10] sm:$0xff] }
  0x2f   :  { %3362 = vmatprep.mubr.msk.f32.mxu0 %vm65_vm0, %v37_v44 }
  0x32   :  { %3363 = vmatmul.mubr.msk.f32.gmra.mxu0 %vm65_vm0, %v38_v45  ;;  %v50_v45 = vld [vmem:[%s7264_s1 + $0x8] sm:$0xff] }
  0x33   :  { %3365 = vmatprep.mubr.msk.f32.mxu0 %vm65_vm0, %v39_v46 }
  0x36   :  { %3366 = vmatmul.mubr.msk.f32.gmra.mxu0 %vm65_vm0, %v40_v47 }
  0xd2   :  { %v3961_v48 = vpop.f32.mrf.mxu1 }
  0xd3   :  { %v419_v39 = vadd.f32 %v3961_v48, %v284_v37  ;;  %v53_v48 = vld [vmem:[%s7264_s1 + $0x20] sm:$0xff] }
  0xd4   :  { %v3963_v49 = vpop.f32.mrf.mxu1 }
  0xd5   :  { %v414_v42 = vadd.f32 %v3963_v49, %v283_v40  ;;  %v7414_v40 = vmov 0 }
  0xd6   :  { %v3965_v50 = vpop.f32.mrf.mxu1 }
  0xd7   :  { %v429_v33 = vadd.f32 %v3965_v50, %v286_v31  ;;  %v52_v50 = vld [vmem:[%s7264_s1 + $0x18] sm:$0xff] }
  0xd8   :  { %v3967_v51 = vpop.f32.mrf.mxu1 }
  0xd9   :  { %v424_v36 = vadd.f32 %v3967_v51, %v285_v34  ;;  %v54_v51 = vld [vmem:[%s7264_s1 + $0x28] sm:$0xff] }
  0xda   :  { %v3392_v52 = vpop.f32.mrf.mxu1  ;;  %v3969_v53 = vpop.f32.mrf.mxu0 }
  0xdb   :  { %v439_v26 = vadd.f32 %v3392_v52, %v288_v25  ;;  %v186_v47 = vadd.f32 %v3969_v53, %v50_v45  ;;  %v55_v53 = vld [vmem:[%s7264_s1 + $0x30] sm:$0xff]  ;;  %v7396_v25 = vmov 0 }
  0xdc   :  { %v433_v55 = vpop.f32.mrf.mxu1  ;;  %v180_v56 = vpop.f32.mrf.mxu0 }
  0xdd   :  { %v181_v57 = vadd.f32 %v180_v56, %v49_v54  ;;  %v434_v30 = vadd.f32 %v433_v55, %v287_v28 }
  0xde   :  { %v3395_v58 = vpop.f32.mrf.mxu1  ;;  %v3349_v24 = vpop.f32.mrf.mxu0 }
  0xdf   :  { %3440 = vmatprep.mubr.msk.f32.mxu0 %vm65_vm0, %v181_v57  ;;  %v449_v21 = vadd.f32 %v3395_v58, %v290_v20  ;;  %v196_v54 = vadd.f32 %v3349_v24, %v52_v50  ;;  %v56_v57 = vld [vmem:[%s7264_s1 + $0x38] sm:$0xff] }
  0xe0   :  { %v443_v59 = vpop.f32.mrf.mxu1  ;;  %v190_v27 = vpop.f32.mrf.mxu0 }
  0xe1   :  { %v444_v23 = vadd.f32 %v443_v59, %v289_v22  ;;  %v191_v46 = vadd.f32 %v190_v27, %v51_v43  ;;  %v57_v59 = vld [vmem:[%s7264_s1 + $0x40] sm:$0xff]  ;;  %v7399_v27 = vmov 0 }
  0xe2   :  { %v3398_v60 = vpop.f32.mrf.mxu1  ;;  %v3352_v29 = vpop.f32.mrf.mxu0 }
  0xe3   :  { %v459_v17 = vadd.f32 %v3398_v60, %v292_v16  ;;  %v206_v56 = vadd.f32 %v3352_v29, %v54_v51  ;;  %v733_v16 = vlaneseq  ;;  %v7417_v51 = vmov 0 }
  0xe4   :  { %v453_v61 = vpop.f32.mrf.mxu1  ;;  %v200_v32 = vpop.f32.mrf.mxu0 }
  0xe5   :  { %v454_v19 = vadd.f32 %v453_v61, %v291_v18  ;;  %v201_v52 = vadd.f32 %v200_v32, %v53_v48  ;;  %v4122_v18 = vand.u32 127, %v733_v16 }
  0xe6   :  { %v3401_v62 = vpop.f32.mrf.mxu1  ;;  %v3355_v35 = vpop.f32.mrf.mxu0 }
  0xe7   :  { %v469_v13 = vadd.f32 %v3401_v62, %v294_v12  ;;  %v216_v61 = vadd.f32 %v3355_v35, %v56_v57  ;;  %v58_v62 = vld [vmem:[%s7264_s1 + $0x48] sm:$0xff] }
  0xe8   :  { %v463_v63 = vpop.f32.mrf.mxu1  ;;  %v210_v38 = vpop.f32.mrf.mxu0 }
  0xe9   :  { %v464_v15 = vadd.f32 %v463_v63, %v293_v14  ;;  %v211_v58 = vadd.f32 %v210_v38, %v55_v53 }
  0xea   :  { %v3404_v0 = vpop.f32.mrf.mxu1  ;;  %v3358_v41 = vpop.f32.mrf.mxu0 }
  0xeb   :  { %v479_v9 = vadd.f32 %v3404_v0, %v296_v8  ;;  %v59_v0 = vld [vmem:[%s7264_s1 + $0x50] sm:$0xff]  ;;  %v62_v8 = vld [vmem:[%s7264_s1 + $0x68] sm:$0xff] }
  0xec   :  { %v473_v1 = vpop.f32.mrf.mxu1  ;;  %v220_v44 = vpop.f32.mrf.mxu0 }
  0xed   :  { %v474_v11 = vadd.f32 %v473_v1, %v295_v10  ;;  %v221_v63 = vadd.f32 %v220_v44, %v57_v59 }
  0xee   :  { %v3407_v3 = vpop.f32.mrf.mxu1  ;;  %v3361_v49 = vpop.f32.mrf.mxu0 }
  0xef   :  { %v489_v5 = vadd.f32 %v3407_v3, %v298_v2  ;;  %v226_v2 = vadd.f32 %v3358_v41, %v58_v62  ;;  %v60_v3 = vld [vmem:[%s7264_s1 + $0x58] sm:$0xff] }
  0xf0   :  { %v483_v6 = vpop.f32.mrf.mxu1  ;;  %v230_v55 = vpop.f32.mrf.mxu0 }
  0xf1   :  { %v484_v7 = vadd.f32 %v483_v6, %v297_v4  ;;  %3408 = vmatprep.subr.msk.mxu0 %vm65_vm0, %v489_v5  ;;  %v231_v4 = vadd.f32 %v230_v55, %v59_v0 }
  0xf2   :  { %3409 = vmatpush3.xpose.msk.msra.mxu0 %vm65_vm0, %v489_v5  ;;  %v3364_v60 = vpop.f32.mrf.mxu0  ;;  %v61_v5 = vld [vmem:[%s7264_s1 + $0x60] sm:$0xff] }
  0xf3   :  { %3410 = vmatprep.subr.msk.mxu0 %vm65_vm0, %v484_v7  ;;  %v246_v12 = vadd.f32 %v3364_v60, %v62_v8 }
  0xf4   :  { %v240_v1 = vpop.f32.mrf.mxu0 }
  0xf6   :  { %3411 = vmatpush3.xpose.msk.msra.mxu0 %vm65_vm0, %v484_v7  ;;  %v3367_v6 = vpop.f32.mrf.mxu0  ;;  %v236_v7 = vadd.f32 %v3361_v49, %v60_v3 }
  0xf7   :  { %3412 = vmatprep.subr.msk.mxu0 %vm65_vm0, %v479_v9 }
  0xf8   :  { %v250_v10 = vpop.f32.mrf.mxu0 }
  0xfa   :  { %3413 = vmatpush3.xpose.msk.msra.mxu0 %vm65_vm0, %v479_v9  ;;  %v241_v9 = vadd.f32 %v240_v1, %v61_v5 }
  0xfb   :  { %3414 = vmatprep.subr.msk.mxu0 %vm65_vm0, %v474_v11 }
  0xfe   :  { %3415 = vmatpush3.xpose.msk.msra.mxu0 %vm65_vm0, %v474_v11  ;;  %v63_v11 = vld [vmem:[%s7264_s1 + $0x70] sm:$0xff] }
  0xff   :  { %3416 = vmatprep.subr.msk.mxu0 %vm65_vm0, %v469_v13  ;;  %v251_v14 = vadd.f32 %v250_v10, %v63_v11 }
 0x102   :  { %3417 = vmatpush3.xpose.msk.msra.mxu0 %vm65_vm0, %v469_v13  ;;  %v64_v13 = vld [vmem:[%s7264_s1 + $0x78] sm:$0xff]  ;;  %s3747_s1 = smov [#allocation2]  }
 0x103   :  { %3418 = vmatprep.subr.msk.mxu0 %vm65_vm0, %v464_v15  ;;  %s2789_s21 = sshll.u32 %s3747_s1, 4  ;;  %s2790_s21 = int_to_ptr.vmem [resolvable:$true] %s2789_s21 }
 0x104   :  { %s3724_s2 = scalar_lea.vmem %s2790_s21, 2048  ;;  %p3729_p1 = scmp.lt.s32.totalorder %s2790_s21, %s2790_s21 }
 0x105   :  { %p3725_p0 = scmp.ne.s32.totalorder %s2790_s21, %s3724_s2  ;;  %p3730_p2 = scmp.lt.s32.totalorder %s3724_s2, %s3724_s2 }
 0x106   :  { %3419 = vmatpush3.xpose.msk.msra.mxu0 %vm65_vm0, %v464_v15  ;;  %v256_v15 = vadd.f32 %v3367_v6, %v64_v13  ;;  %v7422_v13 = vmov 0 }
 0x107   :  { %3420 = vmatprep.subr.msk.mxu0 %vm65_vm0, %v459_v17  ;;  %p3731_p3 = por %p3730_p2, %p3729_p1 }
 0x109   :  { %p3732_p4 = pnand %p3731_p3, %p3725_p0 }
 0x10a   :  { %3421 = vmatpush3.xpose.msk.msra.mxu0 %vm65_vm0, %v459_v17  ;;  %v4120_v17 = vshrl.u32 %v733_v16, 7  ;;  %v7424_v16 = vmov 0 }
 0x10b   :  { %3422 = vmatprep.subr.msk.mxu0 %vm65_vm0, %v454_v19 }
 0x10c   :  { %v749_v20 = vadd.s32 120, %v4120_v17  ;;  %v747_v22 = vadd.s32 104, %v4120_v17  ;;  %v745_v24 = vadd.s32 88, %v4120_v17  ;;  %v742_v28 = vadd.s32 64, %v4120_v17 }
 0x10d   :  { %v743_v29 = vadd.s32 72, %v4120_v17  ;;  %v740_v31 = vadd.s32 48, %v4120_v17  ;;  %v741_v32 = vadd.s32 56, %v4120_v17  ;;  %v738_v34 = vadd.s32 32, %v4120_v17 }
 0x10e   :  { %3423 = vmatpush3.xpose.msk.msra.mxu0 %vm65_vm0, %v454_v19  ;;  %v748_v19 = vadd.s32 112, %v4120_v17  ;;  %vm767_vm2 = vcmp.le.s32.totalorder %v749_v20, %v4122_v18  ;;  %vm765_vm4 = vcmp.le.s32.totalorder %v747_v22, %v4122_v18  ;;  %vm763_vm8 = vcmp.le.s32.totalorder %v745_v24, %v4122_v18 }
 0x10f   :  { %3424 = vmatprep.subr.msk.mxu0 %vm65_vm0, %v449_v21  ;;  %vm760_vm10 = vcmp.le.s32.totalorder %v742_v28, %v4122_v18  ;;  %vm761_vm11 = vcmp.le.s32.totalorder %v743_v29, %v4122_v18  ;;  %vm758_vm13 = vcmp.le.s32.totalorder %v740_v31, %v4122_v18  ;;  %vm759_vm14 = vcmp.le.s32.totalorder %v741_v32, %v4122_v18 }
 0x110   :  { %vm766_vm1 = vcmp.le.s32.totalorder %v748_v19, %v4122_v18  ;;  %vm4184_vm12 = vmpackc.low %vm761_vm11, %vm760_vm10  ;;  %v739_v35 = vadd.s32 40, %v4120_v17  ;;  %v736_v37 = vadd.s32 16, %v4120_v17  ;;  %v737_v38 = vadd.s32 24, %v4120_v17 }
 0x111   :  { %vm4134_vm5 = vmpackc.low %vm767_vm2, %vm766_vm1  ;;  %v735_v48 = vadd.s32 8, %v4120_v17  ;;  %v7429_v22 = vmov 0  ;;  %v7432_v24 = vmov 0  ;;  %v7435_v32 = vmov 0 }
 0x112   :  { %3425 = vmatpush3.xpose.msk.msra.mxu0 %vm65_vm0, %v449_v21  ;;  %v746_v21 = vadd.s32 96, %v4120_v17  ;;  %v7397_v25 = vsel %vm4134_vm5, 4294967295, %v7396_v25  ;;  %vm4204_vm15 = vmpackc.low %vm759_vm14, %vm758_vm13  ;;  %vm757_vm1 = vcmp.le.s32.totalorder %v739_v35, %v4122_v18  ;;  %v7438_v35 = vmov 0 }
 0x113   :  { %3426 = vmatprep.subr.msk.mxu0 %vm65_vm0, %v444_v23  ;;  %7398 = vst [vmem:[#allocation5_spill] sm:$0xff] %v7397_v25  ;;  %vm753_vm10 = vcmp.le.s32.totalorder %v735_v48, %v4122_v18 }
 0x114   :  { %vm764_vm3 = vcmp.le.s32.totalorder %v746_v21, %v4122_v18 }
 0x115   :  { %vm4141_vm6 = vmpackc.low %vm765_vm4, %vm764_vm3  ;;  %vm754_vm3 = vcmp.le.s32.totalorder %v736_v37, %v4122_v18  ;;  %vm755_vm4 = vcmp.le.s32.totalorder %v737_v38, %v4122_v18 }
 0x116   :  { %3427 = vmatpush3.xpose.msk.msra.mxu0 %vm65_vm0, %v444_v23  ;;  %v744_v23 = vadd.s32 80, %v4120_v17  ;;  %v7400_v27 = vsel %vm4141_vm6, 4294967295, %v7399_v27 }
 0x117   :  { %3428 = vmatprep.subr.msk.mxu0 %vm65_vm0, %v439_v26  ;;  %7401 = vst [vmem:[#allocation6_spill] sm:$0xff] %v7400_v27 }
 0x118   :  { %vm762_vm7 = vcmp.le.s32.totalorder %v744_v23, %v4122_v18 }
 0x119   :  { %vm4161_vm9 = vmpackc.low %vm763_vm8, %vm762_vm7  ;;  %vm752_vm8 = vcmp.le.s32.totalorder %v4120_v17, %v4122_v18 }
 0x11a   :  { %3429 = vmatpush3.xpose.msk.msra.mxu0 %vm65_vm0, %v439_v26  ;;  %v7333_v26 = vmov 1.0|1.0   ;;  %vm4242_vm7 = vmpackc.low %vm755_vm4, %vm754_vm3 }
 0x11b   :  { %3430 = vmatprep.subr.msk.mxu0 %vm65_vm0, %v434_v30  ;;  %3464 = vmatprep.subr.msk.bf16.mxu1 %vm4134_vm5, %v7333_v26  ;;  %v7415_v40 = vsel %vm4242_vm7, 4294967295, %v7414_v40  ;;  %vm4293_vm11 = vmpackc.low %vm753_vm10, %vm752_vm8 }
 0x11c   :  { %3465 = vmatpush3.bf16.msk.msra.mxu1 %vm4134_vm5, %v7333_v26  ;;  %7416 = vst [vmem:[#allocation11_spill] sm:$0xff] %v7415_v40  ;;  %v7418_v51 = vsel %vm4293_vm11, 4294967295, %v7417_v51 }
 0x11d   :  { %3466 = vmatprep.subr.msk.bf16.mxu1 %vm4141_vm6, %v7333_v26  ;;  %7419 = vst [vmem:[#allocation12_spill] sm:$0xff] %v7418_v51 }
 0x11e   :  { %3431 = vmatpush3.xpose.msk.msra.mxu0 %vm65_vm0, %v434_v30  ;;  %v7402_v30 = vmov 0 }
 0x11f   :  { %3432 = vmatprep.subr.msk.mxu0 %vm65_vm0, %v429_v33  ;;  %v7403_v30 = vsel %vm4161_vm9, 4294967295, %v7402_v30 }
 0x120   :  { %7404 = vst [vmem:[#allocation7_spill] sm:$0xff] %v7403_v30  ;;  %3467 = vmatpush3.bf16.msk.msra.mxu1 %vm4141_vm6, %v7333_v26 }
 0x121   :  { %3468 = vmatprep.subr.msk.bf16.mxu1 %vm4161_vm9, %v7333_v26 }
 0x122   :  { %3433 = vmatpush3.xpose.msk.msra.mxu0 %vm65_vm0, %v429_v33  ;;  %v7405_v33 = vmov 0 }
 0x123   :  { %3434 = vmatprep.subr.msk.mxu0 %vm65_vm0, %v424_v36  ;;  %v7406_v33 = vsel %vm4184_vm12, 4294967295, %v7405_v33 }
 0x124   :  { %7407 = vst [vmem:[#allocation8_spill] sm:$0xff] %v7406_v33  ;;  %3469 = vmatpush3.bf16.msk.msra.mxu1 %vm4161_vm9, %v7333_v26 }
 0x125   :  { %3470 = vmatprep.subr.msk.bf16.mxu1 %vm4184_vm12, %v7333_v26 }
 0x126   :  { %3435 = vmatpush3.xpose.msk.msra.mxu0 %vm65_vm0, %v424_v36  ;;  %v7408_v36 = vmov 0 }
 0x127   :  { %3436 = vmatprep.subr.msk.mxu0 %vm65_vm0, %v419_v39  ;;  %v7409_v36 = vsel %vm4204_vm15, 4294967295, %v7408_v36 }
 0x128   :  { %7410 = vst [vmem:[#allocation9_spill] sm:$0xff] %v7409_v36  ;;  %3471 = vmatpush3.bf16.msk.msra.mxu1 %vm4184_vm12, %v7333_v26 }
 0x129   :  { %3472 = vmatprep.subr.msk.bf16.mxu1 %vm4204_vm15, %v7333_v26 }
 0x12a   :  { %3437 = vmatpush3.xpose.msk.msra.mxu0 %vm65_vm0, %v419_v39  ;;  %v7411_v39 = vmov 0 }
 0x12b   :  { %3438 = vmatprep.subr.msk.mxu0 %vm65_vm0, %v414_v42 }
 0x12c   :  { %3473 = vmatpush3.bf16.msk.msra.mxu1 %vm4204_vm15, %v7333_v26 }
 0x12e   :  { %3439 = vmatpush3.xpose.msk.msra.mxu0 %vm65_vm0, %v414_v42 }
 0x12f   :  { %3528 = vmatprep.subr.msk.bf16.mxu0 %vm4134_vm5, %v7333_v26 }
 0x131   :  { %3441 = vmatmul.mubr.msk.f32.vlgmr.msra.gmra.mxu0 %vm65_vm0, %v186_v47 }
 0x132   :  { %3443 = vmatprep.mubr.msk.f32.mxu0 %vm65_vm0, %v191_v46  ;;  %3529 = vmatpush3.bf16.msk.msra.mxu0 %vm4134_vm5, %v7333_v26 }
 0x133   :  { %3530 = vmatprep.subr.msk.bf16.mxu0 %vm4141_vm6, %v7333_v26 }
 0x135   :  { %3444 = vmatmul.mubr.msk.f32.gmra.mxu0 %vm65_vm0, %v196_v54 }
 0x136   :  { %3446 = vmatprep.mubr.msk.f32.mxu0 %vm65_vm0, %v201_v52  ;;  %3531 = vmatpush3.bf16.msk.msra.mxu0 %vm4141_vm6, %v7333_v26 }
 0x137   :  { %3532 = vmatprep.subr.msk.bf16.mxu0 %vm4161_vm9, %v7333_v26 }
 0x139   :  { %3447 = vmatmul.mubr.msk.f32.gmra.mxu0 %vm65_vm0, %v206_v56 }
 0x13a   :  { %3449 = vmatprep.mubr.msk.f32.mxu0 %vm65_vm0, %v211_v58  ;;  %3533 = vmatpush3.bf16.msk.msra.mxu0 %vm4161_vm9, %v7333_v26 }
 0x13b   :  { %3534 = vmatprep.subr.msk.bf16.mxu0 %vm4184_vm12, %v7333_v26 }
 0x13d   :  { %3450 = vmatmul.mubr.msk.f32.gmra.mxu0 %vm65_vm0, %v216_v61 }
 0x13e   :  { %3452 = vmatprep.mubr.msk.f32.mxu0 %vm65_vm0, %v221_v63  ;;  %3535 = vmatpush3.bf16.msk.msra.mxu0 %vm4184_vm12, %v7333_v26 }
 0x13f   :  { %3536 = vmatprep.subr.msk.bf16.mxu0 %vm4204_vm15, %v7333_v26 }
 0x141   :  { %3453 = vmatmul.mubr.msk.f32.gmra.mxu0 %vm65_vm0, %v226_v2 }
 0x142   :  { %3455 = vmatprep.mubr.msk.f32.mxu0 %vm65_vm0, %v231_v4  ;;  %3537 = vmatpush3.bf16.msk.msra.mxu0 %vm4204_vm15, %v7333_v26 }
 0x145   :  { %3456 = vmatmul.mubr.msk.f32.gmra.mxu0 %vm65_vm0, %v236_v7 }
 0x146   :  { %3458 = vmatprep.mubr.msk.f32.mxu0 %vm65_vm0, %v241_v9 }
 0x149   :  { %3459 = vmatmul.mubr.msk.f32.gmra.mxu0 %vm65_vm0, %v246_v12 }
 0x14a   :  { %3461 = vmatprep.mubr.msk.f32.mxu0 %vm65_vm0, %v251_v14 }
 0x14d   :  { %3462 = vmatmul.mubr.msk.f32.gmra.mxu0 %vm65_vm0, %v256_v15  ;;  %vm756_vm0 = vcmp.le.s32.totalorder %v738_v34, %v4122_v18  ;;  %v7426_v18 = vmov 0 }
 0x14e   :  { %vm4224_vm2 = vmpackc.low %vm757_vm1, %vm756_vm0 }
 0x14f   :  { %v7412_v39 = vsel %vm4224_vm2, 4294967295, %v7411_v39  ;;  %3474 = vmatprep.subr.msk.bf16.mxu1 %vm4224_vm2, %v7333_v26  ;;  %3538 = vmatprep.subr.msk.bf16.mxu0 %vm4224_vm2, %v7333_v26 }
 0x150   :  { %7413 = vst [vmem:[#allocation10_spill] sm:$0xff] %v7412_v39  ;;  %3475 = vmatpush3.bf16.msk.msra.mxu1 %vm4224_vm2, %v7333_v26  ;;  %3539 = vmatpush3.bf16.msk.msra.mxu0 %vm4224_vm2, %v7333_v26 }
 0x151   :  { %3476 = vmatprep.subr.msk.bf16.mxu1 %vm4242_vm7, %v7333_v26  ;;  %3540 = vmatprep.subr.msk.bf16.mxu0 %vm4242_vm7, %v7333_v26 }
 0x154   :  { %3477 = vmatpush3.bf16.msk.msra.mxu1 %vm4242_vm7, %v7333_v26  ;;  %3541 = vmatpush3.bf16.msk.msra.mxu0 %vm4242_vm7, %v7333_v26 }
 0x155   :  { %3478 = vmatprep.subr.msk.bf16.mxu1 %vm4293_vm11, %v7333_v26  ;;  %3542 = vmatprep.subr.msk.bf16.mxu0 %vm4293_vm11, %v7333_v26 }
 0x158   :  { %3479 = vmatpush3.bf16.msk.msra.mxu1 %vm4293_vm11, %v7333_v26  ;;  %3543 = vmatpush3.bf16.msk.msra.mxu0 %vm4293_vm11, %v7333_v26 }
 0x159   :  { %3496 = vmatprep.subr.msk.bf16.mxu1 %vm4134_vm5, %v7333_v26  ;;  %3592 = vmatprep.subr.msk.bf16.mxu0 %vm4134_vm5, %v7333_v26 }
 0x1f1   :  { %v4264_v41 = vpop.f32.mrf.mxu0 }
 0x1f3   :  { %v4266_v42 = vpop.f32.mrf.mxu0 }
 0x1f4   :  { %792 = vmax.xlane.f32.xlu0 %v4266_v42 }
 0x1f5   :  { %v4269_v43 = vpop.f32.mrf.mxu0 }
 0x1f6   :  { %798 = vmax.xlane.f32.xlu1 %v4269_v43 }
 0x1f7   :  { %v4272_v44 = vpop.f32.mrf.mxu0 }
 0x1f8   :  { %794 = vmax.xlane.f32.xlu0 %v4264_v41 }
 0x1f9   :  { %v4275_v45 = vpop.f32.mrf.mxu0 }
 0x1fa   :  { %796 = vmax.xlane.f32.xlu1 %v4272_v44 }
 0x1fb   :  { %v4278_v46 = vpop.f32.mrf.mxu0 }
 0x1fc   :  { %800 = vmax.xlane.f32.xlu0 %v4278_v46 }
 0x1fd   :  { %v4281_v47 = vpop.f32.mrf.mxu0 }
 0x1fe   :  { %802 = vmax.xlane.f32.xlu1 %v4275_v45 }
 0x1ff   :  { %v4285_v49 = vpop.f32.mrf.mxu0 }
 0x200   :  { %804 = vmax.xlane.f32.xlu0 %v4285_v49 }
 0x201   :  { %v4291_v50 = vpop.f32.mrf.mxu0 }
 0x202   :  { %806 = vmax.xlane.f32.xlu1 %v4281_v47 }
 0x203   :  { %v4301_v52 = vpop.f32.mrf.mxu0 }
 0x204   :  { %808 = vmax.xlane.f32.xlu0 %v4301_v52 }
 0x205   :  { %v4313_v54 = vpop.f32.mrf.mxu0 }
 0x206   :  { %810 = vmax.xlane.f32.xlu1 %v4291_v50 }
 0x207   :  { %v4322_v53 = vpop.f32.mrf.mxu0 }
 0x208   :  { %812 = vmax.xlane.f32.xlu0 %v4322_v53 }
 0x209   :  { %v4325_v55 = vpop.f32.mrf.mxu0 }
 0x20a   :  { %7420 = vst [vmem:[#allocation13_spill] sm:$0xff] %v4325_v55  ;;  %814 = vmax.xlane.f32.xlu1 %v4313_v54 }
 0x20b   :  { %v4328_v56 = vpop.f32.mrf.mxu0 }
 0x20c   :  { %816 = vmax.xlane.f32.xlu0 %v4328_v56 }
 0x20d   :  { %v4331_v57 = vpop.f32.mrf.mxu0 }
 0x20e   :  { %7421 = vst [vmem:[#allocation14_spill] sm:$0xff] %v4331_v57  ;;  %818 = vmax.xlane.f32.xlu1 %v4325_v55 }
 0x20f   :  { %v4334_v58 = vpop.f32.mrf.mxu0 }
 0x210   :  { %820 = vmax.xlane.f32.xlu0 %v4334_v58 }
 0x212   :  { %822 = vmax.xlane.f32.xlu1 %v4331_v57 }
 0x27d   :  { %v4338_v59 = vpop.xlane.xlu0 %792 }
 0x27e   :  { %vm824_vm13 = vcmp.eq.f32.partialorder %v4266_v42, %v4338_v59  ;;  %v7441_v59 = vmov 0 }
 0x27f   :  { %v4340_v60 = vpop.xlane.xlu1 %798 }
 0x280   :  { %vm7270_vm1 = vcmp.eq.f32.partialorder %v4269_v43, %v4340_v60 }
 0x281   :  { %v4342_v61 = vpop.xlane.xlu0 %794 }
 0x282   :  { %vm825_vm14 = vcmp.eq.f32.partialorder %v4264_v41, %v4342_v61  ;;  %v7444_v61 = vmov 0 }
 0x283   :  { %vm2880_vm0 = vmpackc.low %vm825_vm14, %vm824_vm13  ;;  %v4354_v62 = vpop.xlane.xlu1 %796 }
 0x284   :  { %vm826_vm3 = vcmp.eq.f32.partialorder %v4272_v44, %v4354_v62  ;;  %3480 = vmatprep.mubr.msk.bf16.mxu1 %vm2880_vm0, %v7333_v26 }
 0x285   :  { %vm2882_vm4 = vmpackc.low %vm7270_vm1, %vm826_vm3  ;;  %v4367_v63 = vpop.xlane.xlu0 %800 }
 0x286   :  { %3481 = vmatmul.mubr.msk.bf16.vlgmr.msra.gmra.mxu1 %vm2882_vm4, %v7333_v26  ;;  %vm7272_vm8 = vcmp.eq.f32.partialorder %v4278_v46, %v4367_v63 }
 0x287   :  { %v4370_v0 = vpop.xlane.xlu1 %802  ;;  %3497 = vmatpush3.bf16.msk.msra.mxu1 %vm4134_vm5, %v7333_v26 }
 0x288   :  { %vm7271_vm10 = vcmp.eq.f32.partialorder %v4275_v45, %v4370_v0  ;;  %3498 = vmatprep.subr.msk.bf16.mxu1 %vm4141_vm6, %v7333_v26 }
 0x289   :  { %vm2884_vm0 = vmpackc.low %vm7271_vm10, %vm7272_vm8  ;;  %v4388_v1 = vpop.xlane.xlu0 %804 }
 0x28a   :  { %3484 = vmatprep.mubr.msk.bf16.mxu1 %vm2884_vm0, %v7333_v26  ;;  %vm7274_vm4 = vcmp.eq.f32.partialorder %v4285_v49, %v4388_v1 }
 0x28b   :  { %v4391_v2 = vpop.xlane.xlu1 %806  ;;  %3499 = vmatpush3.bf16.msk.msra.mxu1 %vm4141_vm6, %v7333_v26 }
 0x28c   :  { %vm7273_vm1 = vcmp.eq.f32.partialorder %v4281_v47, %v4391_v2  ;;  %3500 = vmatprep.subr.msk.bf16.mxu1 %vm4161_vm9, %v7333_v26 }
 0x28d   :  { %vm2886_vm0 = vmpackc.low %vm7273_vm1, %vm7274_vm4  ;;  %v4409_v3 = vpop.xlane.xlu0 %808 }
 0x28e   :  { %3485 = vmatmul.mubr.msk.bf16.gmra.mxu1 %vm2886_vm0, %v7333_v26  ;;  %vm7276_vm10 = vcmp.eq.f32.partialorder %v4301_v52, %v4409_v3 }
 0x28f   :  { %v4412_v4 = vpop.xlane.xlu1 %810  ;;  %3501 = vmatpush3.bf16.msk.msra.mxu1 %vm4161_vm9, %v7333_v26 }
 0x290   :  { %vm7275_vm8 = vcmp.eq.f32.partialorder %v4291_v50, %v4412_v4  ;;  %3502 = vmatprep.subr.msk.bf16.mxu1 %vm4184_vm12, %v7333_v26 }
 0x291   :  { %vm2888_vm0 = vmpackc.low %vm7275_vm8, %vm7276_vm10  ;;  %v4430_v5 = vpop.xlane.xlu0 %812 }
 0x292   :  { %3488 = vmatprep.mubr.msk.bf16.mxu1 %vm2888_vm0, %v7333_v26  ;;  %vm7278_vm1 = vcmp.eq.f32.partialorder %v4322_v53, %v4430_v5 }
 0x293   :  { %v4433_v6 = vpop.xlane.xlu1 %814  ;;  %3503 = vmatpush3.bf16.msk.msra.mxu1 %vm4184_vm12, %v7333_v26 }
 0x294   :  { %vm7277_vm4 = vcmp.eq.f32.partialorder %v4313_v54, %v4433_v6  ;;  %3504 = vmatprep.subr.msk.bf16.mxu1 %vm4204_vm15, %v7333_v26 }
 0x295   :  { %vm2890_vm0 = vmpackc.low %vm7277_vm4, %vm7278_vm1  ;;  %v4451_v7 = vpop.xlane.xlu0 %816 }
 0x296   :  { %3489 = vmatmul.mubr.msk.bf16.gmra.mxu1 %vm2890_vm0, %v7333_v26  ;;  %vm7282_vm8 = vcmp.eq.f32.partialorder %v4328_v56, %v4451_v7 }
 0x297   :  { %v4454_v8 = vpop.xlane.xlu1 %818  ;;  %3505 = vmatpush3.bf16.msk.msra.mxu1 %vm4204_vm15, %v7333_v26 }
 0x298   :  { %vm7280_vm10 = vcmp.eq.f32.partialorder %v4325_v55, %v4454_v8  ;;  %3506 = vmatprep.subr.msk.bf16.mxu1 %vm4224_vm2, %v7333_v26 }
 0x299   :  { %vm2892_vm0 = vmpackc.low %vm7280_vm10, %vm7282_vm8  ;;  %v4472_v9 = vpop.xlane.xlu0 %820 }
 0x29a   :  { %3492 = vmatprep.mubr.msk.bf16.mxu1 %vm2892_vm0, %v7333_v26  ;;  %vm7281_vm4 = vcmp.eq.f32.partialorder %v4334_v58, %v4472_v9 }
 0x29b   :  { %v4475_v10 = vpop.xlane.xlu1 %822  ;;  %3507 = vmatpush3.bf16.msk.msra.mxu1 %vm4224_vm2, %v7333_v26 }
 0x29c   :  { %vm7279_vm1 = vcmp.eq.f32.partialorder %v4331_v57, %v4475_v10  ;;  %3508 = vmatprep.subr.msk.bf16.mxu1 %vm4242_vm7, %v7333_v26 }
 0x29d   :  { %vm2894_vm0 = vmpackc.low %vm7279_vm1, %vm7281_vm4 }
 0x29e   :  { %3493 = vmatmul.mubr.msk.bf16.gmra.mxu1 %vm2894_vm0, %v7333_v26 }
 0x29f   :  { %3509 = vmatpush3.bf16.msk.msra.mxu1 %vm4242_vm7, %v7333_v26 }
 0x2a0   :  { %3510 = vmatprep.subr.msk.bf16.mxu1 %vm4293_vm11, %v7333_v26 }
 0x2a3   :  { %3511 = vmatpush3.bf16.msk.msra.mxu1 %vm4293_vm11, %v7333_v26 }
 0x2a4   :  { %3560 = vmatprep.subr.msk.bf16.mxu1 %vm4134_vm5, %v7333_v26 }
 0x346   :  { %v3482_v11 = vpop.f32.mrf.mxu1 }
 0x347   :  { %vm963_vm1 = vcmp.eq.f32.partialorder %v3482_v11, 1.0 }
 0x348   :  { %v898_v12 = vpop.f32.mrf.mxu1  ;;  %vm4521_vm4 = vmand %vm826_vm3, %vm963_vm1  ;;  %vm7428_vm1 = vcmp.eq.f32.partialorder %v4269_v43, %v4340_v60 }
 0x349   :  { %vm961_vm0 = vcmp.eq.f32.partialorder %v898_v12, 1.0  ;;  %v7425_v16 = vsel %vm4521_vm4, 4294967295, %v7424_v16  ;;  %v4536_v20 = vsel %vm4521_vm4, -3.4028235e+38, %v4272_v44 }
 0x34a   :  { %vm4509_vm10 = vmand %vm824_vm13, %vm961_vm0  ;;  %v3483_v14 = vpop.f32.mrf.mxu1 }
 0x34b   :  { %v7423_v13 = vsel %vm4509_vm10, 4294967295, %v7422_v13  ;;  %v4516_v15 = vsel %vm4509_vm10, -3.4028235e+38, %v4266_v42  ;;  %vm964_vm13 = vcmp.eq.f32.partialorder %v3483_v14, 1.0  ;;  %vm7431_vm10 = vcmp.eq.f32.partialorder %v4278_v46, %v4367_v63 }
 0x34c   :  { %v901_v17 = vpop.f32.mrf.mxu1  ;;  %1041 = vmax.xlane.f32.xlu0 %v4516_v15  ;;  %vm4546_vm3 = vmand %vm7428_vm1, %vm964_vm13  ;;  %vm7434_vm13 = vcmp.eq.f32.partialorder %v4285_v49, %v4388_v1  ;;  %v7447_v1 = vmov 0 }
 0x34d   :  { %vm962_vm0 = vcmp.eq.f32.partialorder %v901_v17, 1.0  ;;  %v7430_v22 = vsel %vm4546_vm3, 4294967295, %v7429_v22  ;;  %v4562_v29 = vsel %vm4546_vm3, -3.4028235e+38, %v4269_v43  ;;  %v7456_v17 = vmov 0 }
 0x34e   :  { %vm4529_vm8 = vmand %vm825_vm14, %vm962_vm0  ;;  %v3486_v19 = vpop.f32.mrf.mxu1 }
 0x34f   :  { %v7427_v18 = vsel %vm4529_vm8, 4294967295, %v7426_v18  ;;  %v4541_v21 = vsel %vm4529_vm8, -3.4028235e+38, %v4264_v41  ;;  %vm967_vm14 = vcmp.eq.f32.partialorder %v3486_v19, 1.0  ;;  %vm7437_vm8 = vcmp.eq.f32.partialorder %v4275_v45, %v4370_v0 }
 0x350   :  { %v914_v23 = vpop.f32.mrf.mxu1  ;;  %1043 = vmax.xlane.f32.xlu1 %v4541_v21  ;;  %1045 = vmax.xlane.f32.xlu0 %v4536_v20  ;;  %vm4572_vm1 = vmand %vm7434_vm13, %vm967_vm14  ;;  %vm7440_vm14 = vcmp.eq.f32.partialorder %v4281_v47, %v4391_v2 }
 0x351   :  { %vm965_vm0 = vcmp.eq.f32.partialorder %v914_v23, 1.0  ;;  %v7436_v32 = vsel %vm4572_vm1, 4294967295, %v7435_v32  ;;  %v4588_v38 = vsel %vm4572_vm1, -3.4028235e+38, %v4285_v49 }
 0x352   :  { %vm4555_vm4 = vmand %vm7431_vm10, %vm965_vm0  ;;  %v3487_v28 = vpop.f32.mrf.mxu1 }
 0x353   :  { %v7433_v24 = vsel %vm4555_vm4, 4294967295, %v7432_v24  ;;  %v4567_v31 = vsel %vm4555_vm4, -3.4028235e+38, %v4278_v46  ;;  %vm968_vm10 = vcmp.eq.f32.partialorder %v3487_v28, 1.0  ;;  %vm7443_vm4 = vcmp.eq.f32.partialorder %v4301_v52, %v4409_v3 }
 0x354   :  { %v917_v34 = vpop.f32.mrf.mxu1  ;;  %1047 = vmax.xlane.f32.xlu1 %v4562_v29  ;;  %1049 = vmax.xlane.f32.xlu0 %v4567_v31  ;;  %vm4598_vm13 = vmand %vm7440_vm14, %vm968_vm10  ;;  %vm7446_vm10 = vcmp.eq.f32.partialorder %v4322_v53, %v4430_v5  ;;  %v7450_v3 = vmov 0 }
 0x355   :  { %vm966_vm0 = vcmp.eq.f32.partialorder %v917_v34, 1.0  ;;  %v7442_v59 = vsel %vm4598_vm13, 4294967295, %v7441_v59  ;;  %v4614_v63 = vsel %vm4598_vm13, -3.4028235e+38, %v4281_v47  ;;  %v7463_v34 = vmov 0 }
 0x356   :  { %vm4581_vm3 = vmand %vm7437_vm8, %vm966_vm0  ;;  %v3490_v37 = vpop.f32.mrf.mxu1 }
 0x357   :  { %v7439_v35 = vsel %vm4581_vm3, 4294967295, %v7438_v35  ;;  %v4593_v48 = vsel %vm4581_vm3, -3.4028235e+38, %v4275_v45  ;;  %vm971_vm8 = vcmp.eq.f32.partialorder %v3490_v37, 1.0  ;;  %vm7449_vm3 = vcmp.eq.f32.partialorder %v4291_v50, %v4412_v4 }
 0x358   :  { %v930_v60 = vpop.f32.mrf.mxu1  ;;  %1051 = vmax.xlane.f32.xlu1 %v4593_v48  ;;  %1053 = vmax.xlane.f32.xlu0 %v4588_v38  ;;  %vm4624_vm14 = vmand %vm7446_vm10, %vm971_vm8  ;;  %vm7452_vm8 = vcmp.eq.f32.partialorder %v4313_v54, %v4433_v6  ;;  %v7453_v4 = vmov 0 }
 0x359   :  { %vm969_vm0 = vcmp.eq.f32.partialorder %v930_v60, 1.0  ;;  %v7448_v1 = vsel %vm4624_vm14, 4294967295, %v7447_v1  ;;  %v4640_v5 = vsel %vm4624_vm14, -3.4028235e+38, %v4322_v53  ;;  %v7468_v60 = vmov 0 }
 0x35a   :  { %vm4607_vm1 = vmand %vm7443_vm4, %vm969_vm0  ;;  %v3491_v62 = vpop.f32.mrf.mxu1 }
 0x35b   :  { %v7445_v61 = vsel %vm4607_vm1, 4294967295, %v7444_v61  ;;  %v4619_v0 = vsel %vm4607_vm1, -3.4028235e+38, %v4301_v52  ;;  %vm972_vm4 = vcmp.eq.f32.partialorder %v3491_v62, 1.0  ;;  %vm7455_vm1 = vcmp.eq.f32.partialorder %v4328_v56, %v4451_v7 }
 0x35c   :  { %v933_v2 = vpop.f32.mrf.mxu1  ;;  %1055 = vmax.xlane.f32.xlu1 %v4614_v63  ;;  %1057 = vmax.xlane.f32.xlu0 %v4619_v0  ;;  %vm4650_vm10 = vmand %vm7452_vm8, %vm972_vm4  ;;  %vm7459_vm4 = vcmp.eq.f32.partialorder %v4334_v58, %v4472_v9 }
 0x35d   :  { %vm970_vm0 = vcmp.eq.f32.partialorder %v933_v2, 1.0  ;;  %v7454_v4 = vsel %vm4650_vm10, 4294967295, %v7453_v4  ;;  %v4666_v6 = vsel %vm4650_vm10, -3.4028235e+38, %v4313_v54 }
 0x35e   :  { %vm4633_vm13 = vmand %vm7449_vm3, %vm970_vm0  ;;  %v3494_v11 = vpop.f32.mrf.mxu1 }
 0x35f   :  { %v7451_v3 = vsel %vm4633_vm13, 4294967295, %v7450_v3  ;;  %v4645_v12 = vsel %vm4633_vm13, -3.4028235e+38, %v4291_v50  ;;  %vm975_vm3 = vcmp.eq.f32.partialorder %v3494_v11, 1.0  ;;  %vm7462_vm13 = vcmp.eq.f32.partialorder %v4325_v55, %v4454_v8 }
 0x360   :  { %1059 = vmax.xlane.f32.xlu1 %v4645_v12  ;;  %1061 = vmax.xlane.f32.xlu0 %v4640_v5  ;;  %v946_v14 = vpop.f32.mrf.mxu1  ;;  %vm4676_vm8 = vmand %vm7459_vm4, %vm975_vm3  ;;  %vm7467_vm3 = vcmp.eq.f32.partialorder %v4331_v57, %v4475_v10 }
 0x361   :  { %vm973_vm0 = vcmp.eq.f32.partialorder %v946_v14, 1.0  ;;  %v4692_v9 = vsel %vm4676_vm8, -3.4028235e+38, %v4334_v58 }
 0x362   :  { %vm4659_vm14 = vmand %vm7455_vm1, %vm973_vm0  ;;  %v3495_v19 = vpop.f32.mrf.mxu1 }
 0x363   :  { %v7457_v17 = vsel %vm4659_vm14, 4294967295, %v7456_v17  ;;  %v4671_v23 = vsel %vm4659_vm14, -3.4028235e+38, %v4328_v56  ;;  %vm976_vm1 = vcmp.eq.f32.partialorder %v3495_v19, 1.0 }
 0x364   :  { %7458 = vst [vmem:[#allocation15_spill] sm:$0xff] %v7457_v17  ;;  %1063 = vmax.xlane.f32.xlu1 %v4666_v6  ;;  %1065 = vmax.xlane.f32.xlu0 %v4671_v23  ;;  %v949_v28 = vpop.f32.mrf.mxu1  ;;  %vm4702_vm4 = vmand %vm7467_vm3, %vm976_vm1 }
 0x365   :  { %vm974_vm0 = vcmp.eq.f32.partialorder %v949_v28, 1.0  ;;  %v7469_v60 = vsel %vm4702_vm4, 4294967295, %v7468_v60  ;;  %v4711_v8 = vsel %vm4702_vm4, -3.4028235e+38, %v4331_v57 }
 0x366   :  { %vm4685_vm10 = vmand %vm7462_vm13, %vm974_vm0  ;;  %7470 = vst [vmem:[#allocation18_spill] sm:$0xff] %v7469_v60 }
 0x367   :  { %v7464_v34 = vsel %vm4685_vm10, 4294967295, %v7463_v34  ;;  %v4697_v37 = vsel %vm4685_vm10, -3.4028235e+38, %v4325_v55 }
 0x368   :  { %7465 = vst [vmem:[#allocation16_spill] sm:$0xff] %v7464_v34  ;;  %7466 = vst [vmem:[#allocation17_spill] sm:$0xff] %v4697_v37  ;;  %1069 = vmax.xlane.f32.xlu0 %v4692_v9  ;;  %1067 = vmax.xlane.f32.xlu1 %v4697_v37 }
 0x36c   :  { %1071 = vmax.xlane.f32.xlu1 %v4711_v8 }
 0x3d5   :  { %v4714_v62 = vpop.xlane.xlu0 %1041 }
 0x3d6   :  { %vm7301_vm13 = vcmp.eq.f32.partialorder %v4516_v15, %v4714_v62 }
 0x3d9   :  { %v4716_v2 = vpop.xlane.xlu1 %1043  ;;  %v4718_v10 = vpop.xlane.xlu0 %1045 }
 0x3da   :  { %vm7297_vm1 = vcmp.eq.f32.partialorder %v4541_v21, %v4716_v2  ;;  %vm1075_vm3 = vcmp.eq.f32.partialorder %v4536_v20, %v4718_v10 }
 0x3db   :  { %vm2912_vm0 = vmpackc.low %vm7297_vm1, %vm7301_vm13 }
 0x3dc   :  { %3512 = vmatprep.mubr.msk.bf16.mxu1 %vm2912_vm0, %v7333_v26 }
 0x3dd   :  { %v4731_v11 = vpop.xlane.xlu1 %1047  ;;  %v4733_v14 = vpop.xlane.xlu0 %1049 }
 0x3de   :  { %vm7300_vm10 = vcmp.eq.f32.partialorder %v4562_v29, %v4731_v11  ;;  %vm7306_vm0 = vcmp.eq.f32.partialorder %v4567_v31, %v4733_v14 }
 0x3df   :  { %vm2914_vm4 = vmpackc.low %vm7300_vm10, %vm1075_vm3 }
 0x3e0   :  { %3513 = vmatmul.mubr.msk.bf16.vlgmr.msra.gmra.mxu1 %vm2914_vm4, %v7333_v26 }
 0x3e1   :  { %v4746_v19 = vpop.xlane.xlu1 %1051  ;;  %v4748_v28 = vpop.xlane.xlu0 %1053  ;;  %3561 = vmatpush3.bf16.msk.msra.mxu1 %vm4134_vm5, %v7333_v26 }
 0x3e2   :  { %vm7305_vm1 = vcmp.eq.f32.partialorder %v4593_v48, %v4746_v19  ;;  %3562 = vmatprep.subr.msk.bf16.mxu1 %vm4141_vm6, %v7333_v26  ;;  %vm7311_vm10 = vcmp.eq.f32.partialorder %v4588_v38, %v4748_v28 }
 0x3e3   :  { %vm2916_vm4 = vmpackc.low %vm7305_vm1, %vm7306_vm0 }
 0x3e4   :  { %3516 = vmatprep.mubr.msk.bf16.mxu1 %vm2916_vm4, %v7333_v26 }
 0x3e5   :  { %v4767_v34 = vpop.xlane.xlu1 %1055  ;;  %v4769_v55 = vpop.xlane.xlu0 %1057  ;;  %3563 = vmatpush3.bf16.msk.msra.mxu1 %vm4141_vm6, %v7333_v26 }
 0x3e6   :  { %vm7310_vm13 = vcmp.eq.f32.partialorder %v4614_v63, %v4767_v34  ;;  %3564 = vmatprep.subr.msk.bf16.mxu1 %vm4161_vm9, %v7333_v26  ;;  %vm7315_vm1 = vcmp.eq.f32.partialorder %v4619_v0, %v4769_v55 }
 0x3e7   :  { %vm2918_vm4 = vmpackc.low %vm7310_vm13, %vm7311_vm10 }
 0x3e8   :  { %3517 = vmatmul.mubr.msk.bf16.gmra.mxu1 %vm2918_vm4, %v7333_v26 }
 0x3e9   :  { %v4788_v27 = vpop.xlane.xlu1 %1059  ;;  %v4790_v60 = vpop.xlane.xlu0 %1061  ;;  %3565 = vmatpush3.bf16.msk.msra.mxu1 %vm4161_vm9, %v7333_v26 }
 0x3ea   :  { %vm7314_vm0 = vcmp.eq.f32.partialorder %v4645_v12, %v4788_v27  ;;  %3566 = vmatprep.subr.msk.bf16.mxu1 %vm4184_vm12, %v7333_v26  ;;  %vm7320_vm13 = vcmp.eq.f32.partialorder %v4640_v5, %v4790_v60 }
 0x3eb   :  { %vm2920_vm4 = vmpackc.low %vm7314_vm0, %vm7315_vm1 }
 0x3ec   :  { %3520 = vmatprep.mubr.msk.bf16.mxu1 %vm2920_vm4, %v7333_v26 }
 0x3ed   :  { %v4809_v30 = vpop.xlane.xlu1 %1063  ;;  %v4811_v57 = vpop.xlane.xlu0 %1065  ;;  %3567 = vmatpush3.bf16.msk.msra.mxu1 %vm4184_vm12, %v7333_v26 }
 0x3ee   :  { %vm7319_vm10 = vcmp.eq.f32.partialorder %v4666_v6, %v4809_v30  ;;  %3568 = vmatprep.subr.msk.bf16.mxu1 %vm4204_vm15, %v7333_v26  ;;  %vm7332_vm0 = vcmp.eq.f32.partialorder %v4671_v23, %v4811_v57 }
 0x3ef   :  { %vm2922_vm4 = vmpackc.low %vm7319_vm10, %vm7320_vm13 }
 0x3f0   :  { %3521 = vmatmul.mubr.msk.bf16.gmra.mxu1 %vm2922_vm4, %v7333_v26 }
 0x3f1   :  { %v4830_v33 = vpop.xlane.xlu1 %1067  ;;  %3569 = vmatpush3.bf16.msk.msra.mxu1 %vm4204_vm15, %v7333_v26  ;;  %v4848_v17 = vpop.xlane.xlu0 %1069 }
 0x3f2   :  { %7471 = vst [vmem:[#allocation19_spill] sm:$0xff] %v4830_v33  ;;  %vm7323_vm1 = vcmp.eq.f32.partialorder %v4697_v37, %v4830_v33  ;;  %3570 = vmatprep.subr.msk.bf16.mxu1 %vm4224_vm2, %v7333_v26  ;;  %vm7335_vm10 = vcmp.eq.f32.partialorder %v4692_v9, %v4848_v17 }
 0x3f3   :  { %vm2924_vm4 = vmpackc.low %vm7323_vm1, %vm7332_vm0 }
 0x3f4   :  { %3524 = vmatprep.mubr.msk.bf16.mxu1 %vm2924_vm4, %v7333_v26 }
 0x3f5   :  { %v4851_v36 = vpop.xlane.xlu1 %1071  ;;  %3571 = vmatpush3.bf16.msk.msra.mxu1 %vm4224_vm2, %v7333_v26 }
 0x3f6   :  { %vm7327_vm13 = vcmp.eq.f32.partialorder %v4711_v8, %v4851_v36  ;;  %3572 = vmatprep.subr.msk.bf16.mxu1 %vm4242_vm7, %v7333_v26 }
 0x3f7   :  { %vm2926_vm4 = vmpackc.low %vm7327_vm13, %vm7335_vm10  ;;  %vm7474_vm13 = vnez %v7425_v16  ;;  %vm7475_vm10 = vcmp.eq.f32.partialorder %v4516_v15, %v4714_v62 }
 0x3f8   :  { %3525 = vmatmul.mubr.msk.bf16.gmra.mxu1 %vm2926_vm4, %v7333_v26  ;;  %v995_v37 = vsel %vm7474_vm13, %v4272_v44, 0.0 }
 0x3f9   :  { %3573 = vmatpush3.bf16.msk.msra.mxu1 %vm4242_vm7, %v7333_v26 }
 0x3fa   :  { %3574 = vmatprep.subr.msk.bf16.mxu1 %vm4293_vm11, %v7333_v26 }
 0x3fd   :  { %3575 = vmatpush3.bf16.msk.msra.mxu1 %vm4293_vm11, %v7333_v26 }
 0x3fe   :  { %3624 = vmatprep.subr.msk.bf16.mxu1 %vm4134_vm5, %v7333_v26 }
 0x4a0   :  { %v3514_v39 = vpop.f32.mrf.mxu1 }
 0x4a1   :  { %vm1212_vm1 = vcmp.eq.f32.partialorder %v3514_v39, 1.0 }
 0x4a2   :  { %vm4885_vm4 = vmand %vm1075_vm3, %vm1212_vm1  ;;  %v1147_v33 = vpop.f32.mrf.mxu1  ;;  %vm7476_vm1 = vnez %v7423_v13  ;;  %vm7477_vm3 = vcmp.eq.f32.partialorder %v4562_v29, %v4731_v11 }
 0x4a3   :  { %v1244_v51 = vsel %vm4885_vm4, %v4536_v20, 0.0  ;;  %vm1210_vm0 = vcmp.eq.f32.partialorder %v1147_v33, 1.0  ;;  %v993_v10 = vsel %vm7476_vm1, %v4266_v42, 0.0  ;;  %vm7482_vm1 = vcmp.eq.f32.partialorder %v4541_v21, %v4716_v2 }
 0x4a4   :  { %v4895_v26 = vadd.f32 %v1244_v51, %v995_v37  ;;  %vm1226_vm11 = vmand %vm7475_vm10, %vm1210_vm0  ;;  %v3515_v39 = vpop.f32.mrf.mxu1  ;;  %vm7480_vm10 = vnez %v7430_v22  ;;  %vm7481_vm0 = vnez %v7427_v18 }
 0x4a5   :  { %v1242_v25 = vsel %vm1226_vm11, %v4516_v15, 0.0  ;;  %v4905_v44 = vsel %vm1226_vm11, -3.4028235e+38, %v4516_v15  ;;  %vm1213_vm13 = vcmp.eq.f32.partialorder %v3515_v39, 1.0  ;;  %v996_v42 = vsel %vm7480_vm10, %v4269_v43, 0.0 }
 0x4a6   :  { %v4907_v16 = vadd.f32 %v1242_v25, %v993_v10  ;;  %vm4912_vm7 = vmand %vm7477_vm3, %vm1213_vm13  ;;  %1290 = vmax.xlane.f32.xlu0 %v4905_v44  ;;  %v1150_v51 = vpop.f32.mrf.mxu1  ;;  %v994_v25 = vsel %vm7481_vm0, %v4264_v41, 0.0  ;;  %v4934_v43 = vsel %vm4885_vm4, -3.4028235e+38, %v4536_v20  ;;  %vm7483_vm10 = vcmp.eq.f32.partialorder %v4588_v38, %v4748_v28 }
 0x4a7   :  { %v1245_v13 = vsel %vm4912_vm7, %v4562_v29, 0.0  ;;  %vm1211_vm11 = vcmp.eq.f32.partialorder %v1150_v51, 1.0  ;;  %vm7486_vm4 = vnez %v7436_v32 }
 0x4a8   :  { %v4926_v15 = vadd.f32 %v1245_v13, %v996_v42  ;;  %vm1227_vm13 = vmand %vm7482_vm1, %vm1211_vm11  ;;  %v3518_v37 = vpop.f32.mrf.mxu1  ;;  %v999_v20 = vsel %vm7486_vm4, %v4285_v49, 0.0  ;;  %vm7487_vm1 = vnez %v7433_v24  ;;  %v4968_v49 = vsel %vm4912_vm7, -3.4028235e+38, %v4562_v29 }
 0x4a9   :  { %v1243_v22 = vsel %vm1227_vm13, %v4541_v21, 0.0  ;;  %v4938_v62 = vsel %vm1227_vm13, -3.4028235e+38, %v4541_v21  ;;  %vm1216_vm3 = vcmp.eq.f32.partialorder %v3518_v37, 1.0  ;;  %v997_v2 = vsel %vm7487_vm1, %v4278_v46, 0.0 }
 0x4aa   :  { %v4940_v18 = vadd.f32 %v1243_v22, %v994_v25  ;;  %vm4945_vm0 = vmand %vm7483_vm10, %vm1216_vm3  ;;  %1294 = vmax.xlane.f32.xlu0 %v4934_v43  ;;  %1292 = vmax.xlane.f32.xlu1 %v4938_v62  ;;  %v1163_v40 = vpop.f32.mrf.mxu1  ;;  %vm7488_vm13 = vcmp.eq.f32.partialorder %v4567_v31, %v4733_v14  ;;  %vm7489_vm4 = vcmp.eq.f32.partialorder %v4614_v63, %v4767_v34 }
 0x4ab   :  { %v1248_v21 = vsel %vm4945_vm0, %v4588_v38, 0.0  ;;  %vm1214_vm11 = vcmp.eq.f32.partialorder %v1163_v40, 1.0  ;;  %vm7492_vm7 = vnez %v7442_v59  ;;  %v1005_v40 = vsel %vm4659_vm14, %v4328_v56, 0.0 }
 0x4ac   :  { %v4960_v11 = vadd.f32 %v1248_v21, %v999_v20  ;;  %vm1230_vm3 = vmand %vm7488_vm13, %vm1214_vm11  ;;  %v3519_v28 = vpop.f32.mrf.mxu1  ;;  %vm7493_vm13 = vnez %v7439_v35  ;;  %vm7512_vm14 = vcmp.eq.f32.partialorder %v4711_v8, %v4851_v36  ;;  %v7518_v36 = vld [vmem:[#allocation17_spill] sm:$0xff] }
 0x4ad   :  { %v1246_v32 = vsel %vm1230_vm3, %v4567_v31, 0.0  ;;  %v4972_v39 = vsel %vm1230_vm3, -3.4028235e+38, %v4567_v31  ;;  %vm1217_vm10 = vcmp.eq.f32.partialorder %v3519_v28, 1.0  ;;  %v1000_v31 = vsel %vm7492_vm7, %v4281_v47, 0.0 }
 0x4ae   :  { %v4974_v24 = vadd.f32 %v1246_v32, %v997_v2  ;;  %vm4979_vm1 = vmand %vm7489_vm4, %vm1217_vm10  ;;  %1296 = vmax.xlane.f32.xlu1 %v4968_v49  ;;  %1298 = vmax.xlane.f32.xlu0 %v4972_v39  ;;  %v1166_v29 = vpop.f32.mrf.mxu1  ;;  %v998_v34 = vsel %vm7493_vm13, %v4275_v45, 0.0  ;;  %vm7494_vm3 = vcmp.eq.f32.partialorder %v4593_v48, %v4746_v19  ;;  %v5002_v47 = vsel %vm4945_vm0, -3.4028235e+38, %v4588_v38  ;;  %v7516_v32 = vld [vmem:[#allocation18_spill] sm:$0xff] }
 0x4af   :  { %v1249_v14 = vsel %vm4979_vm1, %v4614_v63, 0.0  ;;  %vm1215_vm11 = vcmp.eq.f32.partialorder %v1166_v29, 1.0  ;;  %vm7495_vm7 = vcmp.eq.f32.partialorder %v4640_v5, %v4790_v60  ;;  %vm7498_vm0 = vnez %v7448_v1 }
 0x4b0   :  { %v4994_v10 = vadd.f32 %v1249_v14, %v1000_v31  ;;  %vm1231_vm10 = vmand %vm7494_vm3, %vm1215_vm11  ;;  %v3522_v33 = vpop.f32.mrf.mxu1  ;;  %vm7499_vm3 = vnez %v7445_v61  ;;  %v7519_v31 = vld [vmem:[#allocation19_spill] sm:$0xff]  ;;  %v7521_v14 = vld [vmem:[#allocation13_spill] sm:$0xff] }
 0x4b1   :  { %v1247_v59 = vsel %vm1231_vm10, %v4593_v48, 0.0  ;;  %v5006_v51 = vsel %vm1231_vm10, -3.4028235e+38, %v4593_v48  ;;  %vm1220_vm4 = vcmp.eq.f32.partialorder %v3522_v33, 1.0  ;;  %v1003_v48 = vsel %vm7498_vm0, %v4322_v53, 0.0 }
 0x4b2   :  { %v5008_v35 = vadd.f32 %v1247_v59, %v998_v34  ;;  %vm5013_vm13 = vmand %vm7495_vm7, %vm1220_vm4  ;;  %1302 = vmax.xlane.f32.xlu0 %v5002_v47  ;;  %1300 = vmax.xlane.f32.xlu1 %v5006_v51  ;;  %v1179_v38 = vpop.f32.mrf.mxu1  ;;  %v1001_v60 = vsel %vm7499_vm3, %v4301_v52, 0.0  ;;  %vm7500_vm10 = vcmp.eq.f32.partialorder %v4619_v0, %v4769_v55  ;;  %v5036_v53 = vsel %vm4979_vm1, -3.4028235e+38, %v4614_v63  ;;  %v7522_v34 = vld [vmem:[#allocation16_spill] sm:$0xff] }
 0x4b3   :  { %v1252_v19 = vsel %vm5013_vm13, %v4640_v5, 0.0  ;;  %vm1218_vm11 = vcmp.eq.f32.partialorder %v1179_v38, 1.0  ;;  %vm7501_vm0 = vcmp.eq.f32.partialorder %v4666_v6, %v4809_v30  ;;  %vm7504_vm1 = vnez %v7454_v4 }
 0x4b4   :  { %v5028_v42 = vadd.f32 %v1252_v19, %v1003_v48  ;;  %vm1234_vm4 = vmand %vm7500_vm10, %vm1218_vm11  ;;  %v3523_v13 = vpop.f32.mrf.mxu1  ;;  %v1004_v63 = vsel %vm7504_vm1, %v4313_v54, 0.0  ;;  %vm7505_vm10 = vnez %v7451_v3  ;;  %v5070_v54 = vsel %vm5013_vm13, -3.4028235e+38, %v4640_v5 }
 0x4b5   :  { %v1250_v1 = vsel %vm1234_vm4, %v4619_v0, 0.0  ;;  %v5040_v25 = vsel %vm1234_vm4, -3.4028235e+38, %v4619_v0  ;;  %vm1221_vm7 = vcmp.eq.f32.partialorder %v3523_v13, 1.0  ;;  %v1002_v30 = vsel %vm7505_vm10, %v4291_v50, 0.0 }
 0x4b6   :  { %v5042_v61 = vadd.f32 %v1250_v1, %v1001_v60  ;;  %vm5047_vm3 = vmand %vm7501_vm0, %vm1221_vm7  ;;  %1304 = vmax.xlane.f32.xlu1 %v5036_v53  ;;  %1306 = vmax.xlane.f32.xlu0 %v5040_v25  ;;  %v1182_v55 = vpop.f32.mrf.mxu1  ;;  %vm7506_vm4 = vcmp.eq.f32.partialorder %v4645_v12, %v4788_v27  ;;  %vm7507_vm1 = vcmp.eq.f32.partialorder %v4692_v9, %v4848_v17  ;;  %v1007_v5 = vsel %vm4676_vm8, %v4334_v58, 0.0 }
 0x4b7   :  { %v1253_v0 = vsel %vm5047_vm3, %v4666_v6, 0.0  ;;  %vm1219_vm11 = vcmp.eq.f32.partialorder %v1182_v55, 1.0  ;;  %v5104_v58 = vsel %vm5047_vm3, -3.4028235e+38, %v4666_v6  ;;  %v7515_v6 = vld [vmem:[#allocation14_spill] sm:$0xff]  ;;  %vm7517_vm3 = vnez %v7516_v32  ;;  %v7531_v32 = vld [vmem:[#allocation11_spill] sm:$0xff] }
 0x4b8   :  { %v5062_v37 = vadd.f32 %v1253_v0, %v1004_v63  ;;  %vm1235_vm7 = vmand %vm7506_vm4, %vm1219_vm11  ;;  %v3526_v22 = vpop.f32.mrf.mxu1  ;;  %vm7511_vm11 = vcmp.eq.f32.partialorder %v4671_v23, %v4811_v57 }
 0x4b9   :  { %v1251_v4 = vsel %vm1235_vm7, %v4645_v12, 0.0  ;;  %v5074_v41 = vsel %vm1235_vm7, -3.4028235e+38, %v4645_v12  ;;  %vm1224_vm0 = vcmp.eq.f32.partialorder %v3526_v22, 1.0 }
 0x4ba   :  { %v5076_v3 = vadd.f32 %v1251_v4, %v1002_v30  ;;  %vm5081_vm10 = vmand %vm7507_vm1, %vm1224_vm0  ;;  %1310 = vmax.xlane.f32.xlu0 %v5070_v54  ;;  %1308 = vmax.xlane.f32.xlu1 %v5074_v41  ;;  %v1195_v50 = vpop.f32.mrf.mxu1  ;;  %vm7520_vm1 = vcmp.eq.f32.partialorder %v7518_v36, %v7519_v31 }
 0x4bb   :  { %v1256_v12 = vsel %vm5081_vm10, %v4692_v9, 0.0  ;;  %vm1222_vm13 = vcmp.eq.f32.partialorder %v1195_v50, 1.0  ;;  %v5138_v59 = vsel %vm5081_vm10, -3.4028235e+38, %v4692_v9 }
 0x4bc   :  { %v5096_v20 = vadd.f32 %v1256_v12, %v1007_v5  ;;  %vm1238_vm4 = vmand %vm7511_vm11, %vm1222_vm13  ;;  %v3527_v21 = vpop.f32.mrf.mxu1  ;;  %vm7523_vm11 = vnez %v7522_v34 }
 0x4bd   :  { %v1254_v7 = vsel %vm1238_vm4, %v4671_v23, 0.0  ;;  %v5108_v2 = vsel %vm1238_vm4, -3.4028235e+38, %v4671_v23  ;;  %vm1225_vm8 = vcmp.eq.f32.partialorder %v3527_v21, 1.0  ;;  %v1008_v23 = vsel %vm7517_vm3, %v7515_v6, 0.0 }
 0x4be   :  { %v5110_v28 = vadd.f32 %v1254_v7, %v1005_v40  ;;  %vm5115_vm7 = vmand %vm7512_vm14, %vm1225_vm8  ;;  %1312 = vmax.xlane.f32.xlu1 %v5104_v58  ;;  %1314 = vmax.xlane.f32.xlu0 %v5108_v2  ;;  %v1198_v57 = vpop.f32.mrf.mxu1  ;;  %v1006_v33 = vsel %vm7523_vm11, %v7521_v14, 0.0 }
 0x4bf   :  { %v1257_v46 = vsel %vm5115_vm7, %v4711_v8, 0.0  ;;  %vm1223_vm0 = vcmp.eq.f32.partialorder %v1198_v57, 1.0  ;;  %v5151_v19 = vsel %vm5115_vm7, -3.4028235e+38, %v4711_v8  ;;  %v7524_v8 = vmov 1.0|1.0  }
 0x4c0   :  { %v5127_v29 = vadd.f32 %v1257_v46, %v1008_v23  ;;  %vm1239_vm13 = vmand %vm7520_vm1, %vm1223_vm0  ;;  %v7533_v23 = vld [vmem:[#allocation12_spill] sm:$0xff] }
 0x4c1   :  { %v1255_v45 = vsel %vm1239_vm13, %v7518_v36, 0.0  ;;  %v5142_v38 = vsel %vm1239_vm13, -3.4028235e+38, %v7518_v36 }
 0x4c2   :  { %v5144_v48 = vadd.f32 %v1255_v45, %v1006_v33  ;;  %1318 = vmax.xlane.f32.xlu0 %v5138_v59  ;;  %1316 = vmax.xlane.f32.xlu1 %v5142_v38 }
 0x4c6   :  { %1320 = vmax.xlane.f32.xlu1 %v5151_v19 }
 0x52f   :  { %v5154_v9 = vpop.xlane.xlu0 %1290 }
 0x530   :  { %vm1322_vm10 = vcmp.eq.f32.partialorder %v4905_v44, %v5154_v9 }
 0x533   :  { %v5156_v60 = vpop.xlane.xlu1 %1292  ;;  %v5158_v13 = vpop.xlane.xlu0 %1294 }
 0x534   :  { %vm1323_vm4 = vcmp.eq.f32.partialorder %v4938_v62, %v5156_v60  ;;  %vm1324_vm14 = vcmp.eq.f32.partialorder %v4934_v43, %v5158_v13 }
 0x535   :  { %vm2944_vm8 = vmpackc.low %vm1323_vm4, %vm1322_vm10 }
 0x536   :  { %3544 = vmatprep.mubr.msk.bf16.mxu0 %vm2944_vm8, %v7524_v8 }
 0x537   :  { %v5171_v1 = vpop.xlane.xlu1 %1296  ;;  %v5173_v52 = vpop.xlane.xlu0 %1298 }
 0x538   :  { %vm1325_vm7 = vcmp.eq.f32.partialorder %v4968_v49, %v5171_v1  ;;  %vm7344_vm0 = vcmp.eq.f32.partialorder %v4972_v39, %v5173_v52 }
 0x539   :  { %vm2946_vm3 = vmpackc.low %vm1325_vm7, %vm1324_vm14 }
 0x53a   :  { %3545 = vmatmul.mubr.msk.bf16.vlgmr.msra.gmra.mxu0 %vm2946_vm3, %v7524_v8 }
 0x53b   :  { %v5186_v55 = vpop.xlane.xlu1 %1300  ;;  %v5188_v63 = vpop.xlane.xlu0 %1302  ;;  %3593 = vmatpush3.bf16.msk.msra.mxu0 %vm4134_vm5, %v7524_v8 }
 0x53c   :  { %vm7342_vm1 = vcmp.eq.f32.partialorder %v5006_v51, %v5186_v55  ;;  %3594 = vmatprep.subr.msk.bf16.mxu0 %vm4141_vm6, %v7524_v8  ;;  %vm7349_vm11 = vcmp.eq.f32.partialorder %v5002_v47, %v5188_v63 }
 0x53d   :  { %vm2948_vm13 = vmpackc.low %vm7342_vm1, %vm7344_vm0 }
 0x53e   :  { %3548 = vmatprep.mubr.msk.bf16.mxu0 %vm2948_vm13, %v7524_v8 }
 0x53f   :  { %v5207_v22 = vpop.xlane.xlu1 %1304  ;;  %v5209_v4 = vpop.xlane.xlu0 %1306  ;;  %3595 = vmatpush3.bf16.msk.msra.mxu0 %vm4141_vm6, %v7524_v8 }
 0x540   :  { %vm7343_vm8 = vcmp.eq.f32.partialorder %v5036_v53, %v5207_v22  ;;  %3596 = vmatprep.subr.msk.bf16.mxu0 %vm4161_vm9, %v7524_v8  ;;  %vm7346_vm13 = vcmp.eq.f32.partialorder %v5040_v25, %v5209_v4 }
 0x541   :  { %vm2950_vm3 = vmpackc.low %vm7343_vm8, %vm7349_vm11  ;;  %vm7532_vm11 = vnez %v7531_v32 }
 0x542   :  { %3549 = vmatmul.mubr.msk.bf16.gmra.mxu0 %vm2950_vm3, %v7524_v8 }
 0x543   :  { %v5228_v50 = vpop.xlane.xlu1 %1308  ;;  %v5230_v5 = vpop.xlane.xlu0 %1310  ;;  %3597 = vmatpush3.bf16.msk.msra.mxu0 %vm4161_vm9, %v7524_v8 }
 0x544   :  { %vm7345_vm1 = vcmp.eq.f32.partialorder %v5074_v41, %v5228_v50  ;;  %3598 = vmatprep.subr.msk.bf16.mxu0 %vm4184_vm12, %v7524_v8  ;;  %vm7348_vm8 = vcmp.eq.f32.partialorder %v5070_v54, %v5230_v5 }
 0x545   :  { %vm2952_vm3 = vmpackc.low %vm7345_vm1, %vm7346_vm13 }
 0x546   :  { %3552 = vmatprep.mubr.msk.bf16.mxu0 %vm2952_vm3, %v7524_v8 }
 0x547   :  { %v5249_v17 = vpop.xlane.xlu1 %1312  ;;  %v5251_v40 = vpop.xlane.xlu0 %1314  ;;  %3599 = vmatpush3.bf16.msk.msra.mxu0 %vm4184_vm12, %v7524_v8 }
 0x548   :  { %vm7347_vm0 = vcmp.eq.f32.partialorder %v5104_v58, %v5249_v17  ;;  %3600 = vmatprep.subr.msk.bf16.mxu0 %vm4204_vm15, %v7524_v8  ;;  %vm7352_vm1 = vcmp.eq.f32.partialorder %v5108_v2, %v5251_v40 }
 0x549   :  { %vm2954_vm3 = vmpackc.low %vm7347_vm0, %vm7348_vm8 }
 0x54a   :  { %3553 = vmatmul.mubr.msk.bf16.gmra.mxu0 %vm2954_vm3, %v7524_v8 }
 0x54b   :  { %v5270_v7 = vpop.xlane.xlu1 %1316  ;;  %3601 = vmatpush3.bf16.msk.msra.mxu0 %vm4204_vm15, %v7524_v8  ;;  %v5288_v57 = vpop.xlane.xlu0 %1318 }
 0x54c   :  { %vm7350_vm13 = vcmp.eq.f32.partialorder %v5142_v38, %v5270_v7  ;;  %3602 = vmatprep.subr.msk.bf16.mxu0 %vm4224_vm2, %v7524_v8  ;;  %vm7353_vm0 = vcmp.eq.f32.partialorder %v5138_v59, %v5288_v57 }
 0x54d   :  { %vm2956_vm3 = vmpackc.low %vm7350_vm13, %vm7352_vm1  ;;  %vm7534_vm13 = vnez %v7533_v23 }
 0x54e   :  { %3556 = vmatprep.mubr.msk.bf16.mxu0 %vm2956_vm3, %v7524_v8 }
 0x54f   :  { %v5291_v6 = vpop.xlane.xlu1 %1320  ;;  %3603 = vmatpush3.bf16.msk.msra.mxu0 %vm4224_vm2, %v7524_v8 }
 0x550   :  { %vm7351_vm8 = vcmp.eq.f32.partialorder %v5151_v19, %v5291_v6  ;;  %3604 = vmatprep.subr.msk.bf16.mxu0 %vm7532_vm11, %v7524_v8 }
 0x551   :  { %vm2958_vm3 = vmpackc.low %vm7351_vm8, %vm7353_vm0 }
 0x552   :  { %3557 = vmatmul.mubr.msk.bf16.gmra.mxu0 %vm2958_vm3, %v7524_v8 }
 0x553   :  { %3605 = vmatpush3.bf16.msk.msra.mxu0 %vm7532_vm11, %v7524_v8 }
 0x554   :  { %3606 = vmatprep.subr.msk.bf16.mxu0 %vm7534_vm13, %v7524_v8 }
 0x557   :  { %3607 = vmatpush3.bf16.msk.msra.mxu0 %vm7534_vm13, %v7524_v8 }
 0x558   :  { %3656 = vmatprep.subr.msk.bf16.mxu0 %vm4134_vm5, %v7524_v8 }
 0x5fa   :  { %v3546_v46 = vpop.f32.mrf.mxu0 }
 0x5fb   :  { %vm1461_vm8 = vcmp.eq.f32.partialorder %v3546_v46, 1.0 }
 0x5fc   :  { %vm5325_vm3 = vmand %vm1324_vm14, %vm1461_vm8  ;;  %v1396_v31 = vpop.f32.mrf.mxu0 }
 0x5fd   :  { %v1493_v14 = vsel %vm5325_vm3, %v4934_v43, 0.0  ;;  %vm1459_vm1 = vcmp.eq.f32.partialorder %v1396_v31, 1.0  ;;  %v5365_v1 = vsel %vm5325_vm3, -3.4028235e+38, %v4934_v43  ;;  %vm7542_vm3 = vcmp.eq.f32.partialorder %v4972_v39, %v5173_v52 }
 0x5fe   :  { %v5333_v34 = vadd.f32 %v1493_v14, %v4895_v26  ;;  %vm1475_vm0 = vmand %vm1322_vm10, %vm1459_vm1  ;;  %v3547_v33 = vpop.f32.mrf.mxu0  ;;  %vm7539_vm1 = vcmp.eq.f32.partialorder %v5002_v47, %v5188_v63 }
 0x5ff   :  { %v1491_v45 = vsel %vm1475_vm0, %v4905_v44, 0.0  ;;  %v5340_v13 = vsel %vm1475_vm0, -3.4028235e+38, %v4905_v44  ;;  %vm1462_vm14 = vcmp.eq.f32.partialorder %v3547_v33, 1.0 }
 0x600   :  { %v5343_v46 = vadd.f32 %v1491_v45, %v4907_v16  ;;  %vm5348_vm8 = vmand %vm1325_vm7, %vm1462_vm14  ;;  %1539 = vmax.xlane.f32.xlu0 %v5340_v13  ;;  %v1399_v9 = vpop.f32.mrf.mxu0 }
 0x601   :  { %v1494_v31 = vsel %vm5348_vm8, %v4968_v49, 0.0  ;;  %vm1460_vm10 = vcmp.eq.f32.partialorder %v1399_v9, 1.0  ;;  %v5395_v63 = vsel %vm5348_vm8, -3.4028235e+38, %v4968_v49 }
 0x602   :  { %v5357_v44 = vadd.f32 %v1494_v31, %v4926_v15  ;;  %vm1476_vm0 = vmand %vm1323_vm4, %vm1460_vm10  ;;  %v3550_v16 = vpop.f32.mrf.mxu0 }
 0x603   :  { %v1492_v14 = vsel %vm1476_vm0, %v4938_v62, 0.0  ;;  %v5369_v33 = vsel %vm1476_vm0, -3.4028235e+38, %v4938_v62  ;;  %vm1465_vm7 = vcmp.eq.f32.partialorder %v3550_v16, 1.0 }
 0x604   :  { %v5372_v45 = vadd.f32 %v1492_v14, %v4940_v18  ;;  %vm5377_vm14 = vmand %vm7539_vm1, %vm1465_vm7  ;;  %1543 = vmax.xlane.f32.xlu0 %v5365_v1  ;;  %1541 = vmax.xlane.f32.xlu1 %v5369_v33  ;;  %v1412_v43 = vpop.f32.mrf.mxu0  ;;  %vm7543_vm7 = vcmp.eq.f32.partialorder %v5036_v53, %v5207_v22 }
 0x605   :  { %v1497_v62 = vsel %vm5377_vm14, %v5002_v47, 0.0  ;;  %vm1463_vm4 = vcmp.eq.f32.partialorder %v1412_v43, 1.0  ;;  %v5425_v22 = vsel %vm5377_vm14, -3.4028235e+38, %v5002_v47 }
 0x606   :  { %v5387_v18 = vadd.f32 %v1497_v62, %v4960_v11  ;;  %vm1479_vm10 = vmand %vm7542_vm3, %vm1463_vm4  ;;  %v3551_v60 = vpop.f32.mrf.mxu0  ;;  %vm7546_vm4 = vcmp.eq.f32.partialorder %v5006_v51, %v5186_v55 }
 0x607   :  { %v1495_v36 = vsel %vm1479_vm10, %v4972_v39, 0.0  ;;  %v5399_v9 = vsel %vm1479_vm10, -3.4028235e+38, %v4972_v39  ;;  %vm1466_vm0 = vcmp.eq.f32.partialorder %v3551_v60, 1.0 }
 0x608   :  { %v5402_v31 = vadd.f32 %v1495_v36, %v4974_v24  ;;  %vm5407_vm1 = vmand %vm7543_vm7, %vm1466_vm0  ;;  %1545 = vmax.xlane.f32.xlu1 %v5395_v63  ;;  %1547 = vmax.xlane.f32.xlu0 %v5399_v9  ;;  %v1415_v49 = vpop.f32.mrf.mxu0  ;;  %vm7547_vm0 = vcmp.eq.f32.partialorder %v5070_v54, %v5230_v5 }
 0x609   :  { %v1498_v39 = vsel %vm5407_vm1, %v5036_v53, 0.0  ;;  %vm1464_vm8 = vcmp.eq.f32.partialorder %v1415_v49, 1.0  ;;  %v5455_v5 = vsel %vm5407_vm1, -3.4028235e+38, %v5036_v53 }
 0x60a   :  { %v5417_v24 = vadd.f32 %v1498_v39, %v4994_v10  ;;  %vm1480_vm3 = vmand %vm7546_vm4, %vm1464_vm8  ;;  %v3554_v52 = vpop.f32.mrf.mxu0  ;;  %vm7550_vm8 = vcmp.eq.f32.partialorder %v5040_v25, %v5209_v4 }
 0x60b   :  { %v1496_v26 = vsel %vm1480_vm3, %v5006_v51, 0.0  ;;  %v5429_v16 = vsel %vm1480_vm3, -3.4028235e+38, %v5006_v51  ;;  %vm1469_vm10 = vcmp.eq.f32.partialorder %v3554_v52, 1.0 }
 0x60c   :  { %v5432_v14 = vadd.f32 %v1496_v26, %v5008_v35  ;;  %vm5437_vm7 = vmand %vm7547_vm0, %vm1469_vm10  ;;  %1551 = vmax.xlane.f32.xlu0 %v5425_v22  ;;  %1549 = vmax.xlane.f32.xlu1 %v5429_v16  ;;  %v1428_v47 = vpop.f32.mrf.mxu0  ;;  %vm7551_vm10 = vcmp.eq.f32.partialorder %v5104_v58, %v5249_v17 }
 0x60d   :  { %v1501_v51 = vsel %vm5437_vm7, %v5070_v54, 0.0  ;;  %vm1467_vm14 = vcmp.eq.f32.partialorder %v1428_v47, 1.0  ;;  %v5485_v17 = vsel %vm5437_vm7, -3.4028235e+38, %v5070_v54 }
 0x60e   :  { %v5447_v35 = vadd.f32 %v1501_v51, %v5028_v42  ;;  %vm1483_vm4 = vmand %vm7550_vm8, %vm1467_vm14  ;;  %v3555_v55 = vpop.f32.mrf.mxu0  ;;  %vm7554_vm14 = vcmp.eq.f32.partialorder %v5074_v41, %v5228_v50 }
 0x60f   :  { %v1499_v15 = vsel %vm1483_vm4, %v5040_v25, 0.0  ;;  %v5459_v43 = vsel %vm1483_vm4, -3.4028235e+38, %v5040_v25  ;;  %vm1470_vm3 = vcmp.eq.f32.partialorder %v3555_v55, 1.0 }
 0x610   :  { %v5462_v62 = vadd.f32 %v1499_v15, %v5042_v61  ;;  %vm5467_vm0 = vmand %vm7551_vm10, %vm1470_vm3  ;;  %1553 = vmax.xlane.f32.xlu1 %v5455_v5  ;;  %1555 = vmax.xlane.f32.xlu0 %v5459_v43  ;;  %v1431_v53 = vpop.f32.mrf.mxu0  ;;  %vm7555_vm3 = vcmp.eq.f32.partialorder %v5138_v59, %v5288_v57 }
 0x611   :  { %v1502_v25 = vsel %vm5467_vm0, %v5104_v58, 0.0  ;;  %vm1468_vm1 = vcmp.eq.f32.partialorder %v1431_v53, 1.0  ;;  %v5515_v57 = vsel %vm5467_vm0, -3.4028235e+38, %v5104_v58 }
 0x612   :  { %v5477_v61 = vadd.f32 %v1502_v25, %v5062_v37  ;;  %vm1484_vm8 = vmand %vm7554_vm14, %vm1468_vm1  ;;  %v3558_v4 = vpop.f32.mrf.mxu0  ;;  %vm7558_vm1 = vcmp.eq.f32.partialorder %v5108_v2, %v5251_v40 }
 0x613   :  { %v1500_v60 = vsel %vm1484_vm8, %v5074_v41, 0.0  ;;  %v5489_v36 = vsel %vm1484_vm8, -3.4028235e+38, %v5074_v41  ;;  %vm1473_vm4 = vcmp.eq.f32.partialorder %v3558_v4, 1.0 }
 0x614   :  { %v5492_v11 = vadd.f32 %v1500_v60, %v5076_v3  ;;  %vm5497_vm10 = vmand %vm7555_vm3, %vm1473_vm4  ;;  %1559 = vmax.xlane.f32.xlu0 %v5485_v17  ;;  %1557 = vmax.xlane.f32.xlu1 %v5489_v36  ;;  %v1444_v54 = vpop.f32.mrf.mxu0  ;;  %vm7559_vm4 = vcmp.eq.f32.partialorder %v5151_v19, %v5291_v6 }
 0x615   :  { %v1505_v41 = vsel %vm5497_vm10, %v5138_v59, 0.0  ;;  %vm1471_vm7 = vcmp.eq.f32.partialorder %v1444_v54, 1.0 }
 0x616   :  { %v5507_v3 = vadd.f32 %v1505_v41, %v5096_v20  ;;  %vm1487_vm14 = vmand %vm7558_vm1, %vm1471_vm7  ;;  %v3559_v50 = vpop.f32.mrf.mxu0  ;;  %vm7560_vm7 = vcmp.eq.f32.partialorder %v5142_v38, %v5270_v7 }
 0x617   :  { %v1503_v49 = vsel %vm1487_vm14, %v5108_v2, 0.0  ;;  %v5519_v39 = vsel %vm1487_vm14, -3.4028235e+38, %v5108_v2  ;;  %vm1474_vm8 = vcmp.eq.f32.partialorder %v3559_v50, 1.0  ;;  %v5539_v2 = vsel %vm5497_vm10, -3.4028235e+38, %v5138_v59 }
 0x618   :  { %v5522_v52 = vadd.f32 %v1503_v49, %v5110_v28  ;;  %vm1490_vm3 = vmand %vm7559_vm4, %vm1474_vm8  ;;  %1561 = vmax.xlane.f32.xlu1 %v5515_v57  ;;  %1563 = vmax.xlane.f32.xlu0 %v5519_v39  ;;  %v1447_v20 = vpop.f32.mrf.mxu0 }
 0x619   :  { %v1506_v58 = vsel %vm1490_vm3, %v5151_v19, 0.0  ;;  %vm1472_vm0 = vcmp.eq.f32.partialorder %v1447_v20, 1.0 }
 0x61a   :  { %v5531_v40 = vadd.f32 %v1506_v58, %v5127_v29  ;;  %vm1488_vm1 = vmand %vm7560_vm7, %vm1472_vm0  ;;  %v5551_v29 = vsel %vm1490_vm3, -3.4028235e+38, %v5151_v19 }
 0x61b   :  { %v1504_v28 = vsel %vm1488_vm1, %v5142_v38, 0.0  ;;  %v5543_v6 = vsel %vm1488_vm1, -3.4028235e+38, %v5142_v38 }
 0x61c   :  { %v5546_v26 = vadd.f32 %v1504_v28, %v5144_v48  ;;  %1567 = vmax.xlane.f32.xlu0 %v5539_v2  ;;  %1565 = vmax.xlane.f32.xlu1 %v5543_v6 }
 0x620   :  { %1569 = vmax.xlane.f32.xlu1 %v5551_v29 }
 0x689   :  { %v5554_v7 = vpop.xlane.xlu0 %1539 }
 0x68a   :  { %vm1571_vm10 = vcmp.eq.f32.partialorder %v5340_v13, %v5554_v7 }
 0x68d   :  { %v5556_v59 = vpop.xlane.xlu1 %1541  ;;  %v5558_v10 = vpop.xlane.xlu0 %1543 }
 0x68e   :  { %vm7354_vm14 = vcmp.eq.f32.partialorder %v5369_v33, %v5556_v59  ;;  %vm1573_vm4 = vcmp.eq.f32.partialorder %v5365_v1, %v5558_v10 }
 0x68f   :  { %vm2976_vm8 = vmpackc.low %vm7354_vm14, %vm1571_vm10 }
 0x690   :  { %3576 = vmatprep.mubr.msk.bf16.mxu1 %vm2976_vm8, %v7524_v8 }
 0x691   :  { %v5571_v38 = vpop.xlane.xlu1 %1545  ;;  %v5573_v48 = vpop.xlane.xlu0 %1547 }
 0x692   :  { %vm1574_vm3 = vcmp.eq.f32.partialorder %v5395_v63, %v5571_v38  ;;  %vm7356_vm7 = vcmp.eq.f32.partialorder %v5399_v9, %v5573_v48 }
 0x693   :  { %vm2978_vm0 = vmpackc.low %vm1574_vm3, %vm1573_vm4 }
 0x694   :  { %3577 = vmatmul.mubr.msk.bf16.vlgmr.msra.gmra.mxu1 %vm2978_vm0, %v7524_v8 }
 0x695   :  { %v5586_v19 = vpop.xlane.xlu1 %1549  ;;  %v5588_v47 = vpop.xlane.xlu0 %1551  ;;  %3625 = vmatpush3.bf16.msk.msra.mxu1 %vm4134_vm5, %v7524_v8 }
 0x696   :  { %vm7355_vm1 = vcmp.eq.f32.partialorder %v5429_v16, %v5586_v19  ;;  %3626 = vmatprep.subr.msk.bf16.mxu1 %vm4141_vm6, %v7524_v8  ;;  %vm7358_vm0 = vcmp.eq.f32.partialorder %v5425_v22, %v5588_v47 }
 0x697   :  { %vm2980_vm8 = vmpackc.low %vm7355_vm1, %vm7356_vm7 }
 0x698   :  { %3580 = vmatprep.mubr.msk.bf16.mxu1 %vm2980_vm8, %v7524_v8 }
 0x699   :  { %v5607_v51 = vpop.xlane.xlu1 %1553  ;;  %v5609_v55 = vpop.xlane.xlu0 %1555  ;;  %3627 = vmatpush3.bf16.msk.msra.mxu1 %vm4141_vm6, %v7524_v8 }
 0x69a   :  { %vm7357_vm14 = vcmp.eq.f32.partialorder %v5455_v5, %v5607_v51  ;;  %3628 = vmatprep.subr.msk.bf16.mxu1 %vm4161_vm9, %v7524_v8  ;;  %vm7360_vm1 = vcmp.eq.f32.partialorder %v5459_v43, %v5609_v55 }
 0x69b   :  { %vm2982_vm8 = vmpackc.low %vm7357_vm14, %vm7358_vm0 }
 0x69c   :  { %3581 = vmatmul.mubr.msk.bf16.gmra.mxu1 %vm2982_vm8, %v7524_v8 }
 0x69d   :  { %v5628_v15 = vpop.xlane.xlu1 %1557  ;;  %v5630_v42 = vpop.xlane.xlu0 %1559  ;;  %3629 = vmatpush3.bf16.msk.msra.mxu1 %vm4161_vm9, %v7524_v8 }
 0x69e   :  { %vm7359_vm7 = vcmp.eq.f32.partialorder %v5489_v36, %v5628_v15  ;;  %3630 = vmatprep.subr.msk.bf16.mxu1 %vm4184_vm12, %v7524_v8  ;;  %vm7362_vm14 = vcmp.eq.f32.partialorder %v5485_v17, %v5630_v42 }
 0x69f   :  { %vm2984_vm8 = vmpackc.low %vm7359_vm7, %vm7360_vm1 }
 0x6a0   :  { %3584 = vmatprep.mubr.msk.bf16.mxu1 %vm2984_vm8, %v7524_v8 }
 0x6a1   :  { %v5649_v53 = vpop.xlane.xlu1 %1561  ;;  %v5651_v25 = vpop.xlane.xlu0 %1563  ;;  %3631 = vmatpush3.bf16.msk.msra.mxu1 %vm4184_vm12, %v7524_v8 }
 0x6a2   :  { %vm7361_vm0 = vcmp.eq.f32.partialorder %v5515_v57, %v5649_v53  ;;  %3632 = vmatprep.subr.msk.bf16.mxu1 %vm4204_vm15, %v7524_v8  ;;  %vm7365_vm7 = vcmp.eq.f32.partialorder %v5519_v39, %v5651_v25 }
 0x6a3   :  { %vm2986_vm8 = vmpackc.low %vm7361_vm0, %vm7362_vm14 }
 0x6a4   :  { %3585 = vmatmul.mubr.msk.bf16.gmra.mxu1 %vm2986_vm8, %v7524_v8 }
 0x6a5   :  { %v5670_v4 = vpop.xlane.xlu1 %1565  ;;  %3633 = vmatpush3.bf16.msk.msra.mxu1 %vm4204_vm15, %v7524_v8  ;;  %v5688_v60 = vpop.xlane.xlu0 %1567 }
 0x6a6   :  { %vm7363_vm1 = vcmp.eq.f32.partialorder %v5543_v6, %v5670_v4  ;;  %3634 = vmatprep.subr.msk.bf16.mxu1 %vm4224_vm2, %v7524_v8  ;;  %vm7366_vm0 = vcmp.eq.f32.partialorder %v5539_v2, %v5688_v60 }
 0x6a7   :  { %vm2988_vm8 = vmpackc.low %vm7363_vm1, %vm7365_vm7 }
 0x6a8   :  { %3588 = vmatprep.mubr.msk.bf16.mxu1 %vm2988_vm8, %v7524_v8 }
 0x6a9   :  { %v5691_v37 = vpop.xlane.xlu1 %1569  ;;  %3635 = vmatpush3.bf16.msk.msra.mxu1 %vm4224_vm2, %v7524_v8 }
 0x6aa   :  { %vm7364_vm14 = vcmp.eq.f32.partialorder %v5551_v29, %v5691_v37  ;;  %3636 = vmatprep.subr.msk.bf16.mxu1 %vm7532_vm11, %v7524_v8 }
 0x6ab   :  { %vm2990_vm8 = vmpackc.low %vm7364_vm14, %vm7366_vm0 }
 0x6ac   :  { %3589 = vmatmul.mubr.msk.bf16.gmra.mxu1 %vm2990_vm8, %v7524_v8 }
 0x6ad   :  { %3637 = vmatpush3.bf16.msk.msra.mxu1 %vm7532_vm11, %v7524_v8 }
 0x6ae   :  { %3638 = vmatprep.subr.msk.bf16.mxu1 %vm7534_vm13, %v7524_v8 }
 0x6b1   :  { %3639 = vmatpush3.bf16.msk.msra.mxu1 %vm7534_vm13, %v7524_v8 }
 0x6b2   :  { %3688 = vmatprep.subr.msk.bf16.mxu1 %vm4134_vm5, %v7524_v8 }
 0x754   :  { %v3578_v54 = vpop.f32.mrf.mxu1 }
 0x755   :  { %vm1710_vm1 = vcmp.eq.f32.partialorder %v3578_v54, 1.0 }
 0x756   :  { %vm5725_vm8 = vmand %vm1573_vm4, %vm1710_vm1  ;;  %v1645_v50 = vpop.f32.mrf.mxu1 }
 0x757   :  { %v1742_v49 = vsel %vm5725_vm8, %v5365_v1, 0.0  ;;  %vm1708_vm14 = vcmp.eq.f32.partialorder %v1645_v50, 1.0  ;;  %v5765_v38 = vsel %vm5725_vm8, -3.4028235e+38, %v5365_v1 }
 0x758   :  { %v5733_v20 = vadd.f32 %v1742_v49, %v5333_v34  ;;  %vm1724_vm7 = vmand %vm1571_vm10, %vm1708_vm14  ;;  %v3579_v58 = vpop.f32.mrf.mxu1  ;;  %vm7565_vm14 = vcmp.eq.f32.partialorder %v5369_v33, %v5556_v59 }
 0x759   :  { %v1740_v28 = vsel %vm1724_vm7, %v5340_v13, 0.0  ;;  %v5740_v10 = vsel %vm1724_vm7, -3.4028235e+38, %v5340_v13  ;;  %vm1711_vm4 = vcmp.eq.f32.partialorder %v3579_v58, 1.0 }
 0x75a   :  { %v5743_v54 = vadd.f32 %v1740_v28, %v5343_v46  ;;  %vm5748_vm1 = vmand %vm1574_vm3, %vm1711_vm4  ;;  %1788 = vmax.xlane.f32.xlu0 %v5740_v10  ;;  %v1648_v7 = vpop.f32.mrf.mxu1  ;;  %vm7566_vm4 = vcmp.eq.f32.partialorder %v5425_v22, %v5588_v47 }
 0x75b   :  { %v1743_v50 = vsel %vm5748_vm1, %v5395_v63, 0.0  ;;  %vm1709_vm10 = vcmp.eq.f32.partialorder %v1648_v7, 1.0  ;;  %v5795_v47 = vsel %vm5748_vm1, -3.4028235e+38, %v5395_v63 }
 0x75c   :  { %v5757_v13 = vadd.f32 %v1743_v50, %v5357_v44  ;;  %vm1725_vm7 = vmand %vm7565_vm14, %vm1709_vm10  ;;  %v3582_v46 = vpop.f32.mrf.mxu1  ;;  %vm7569_vm10 = vcmp.eq.f32.partialorder %v5399_v9, %v5573_v48 }
 0x75d   :  { %v1741_v49 = vsel %vm1725_vm7, %v5369_v33, 0.0  ;;  %v5769_v58 = vsel %vm1725_vm7, -3.4028235e+38, %v5369_v33  ;;  %vm1714_vm3 = vcmp.eq.f32.partialorder %v3582_v46, 1.0 }
 0x75e   :  { %v5772_v28 = vadd.f32 %v1741_v49, %v5372_v45  ;;  %vm5777_vm0 = vmand %vm7566_vm4, %vm1714_vm3  ;;  %1792 = vmax.xlane.f32.xlu0 %v5765_v38  ;;  %1790 = vmax.xlane.f32.xlu1 %v5769_v58  ;;  %v1661_v1 = vpop.f32.mrf.mxu1  ;;  %vm7570_vm3 = vcmp.eq.f32.partialorder %v5455_v5, %v5607_v51 }
 0x75f   :  { %v1746_v33 = vsel %vm5777_vm0, %v5425_v22, 0.0  ;;  %vm1712_vm8 = vcmp.eq.f32.partialorder %v1661_v1, 1.0  ;;  %v5825_v51 = vsel %vm5777_vm0, -3.4028235e+38, %v5425_v22 }
 0x760   :  { %v5787_v45 = vadd.f32 %v1746_v33, %v5387_v18  ;;  %vm1728_vm14 = vmand %vm7569_vm10, %vm1712_vm8  ;;  %v3583_v59 = vpop.f32.mrf.mxu1  ;;  %vm7573_vm8 = vcmp.eq.f32.partialorder %v5429_v16, %v5586_v19 }
 0x761   :  { %v1744_v41 = vsel %vm1728_vm14, %v5399_v9, 0.0  ;;  %v5799_v7 = vsel %vm1728_vm14, -3.4028235e+38, %v5399_v9  ;;  %vm1715_vm7 = vcmp.eq.f32.partialorder %v3583_v59, 1.0 }
 0x762   :  { %v5802_v50 = vadd.f32 %v1744_v41, %v5402_v31  ;;  %vm5807_vm4 = vmand %vm7570_vm3, %vm1715_vm7  ;;  %1794 = vmax.xlane.f32.xlu1 %v5795_v47  ;;  %1796 = vmax.xlane.f32.xlu0 %v5799_v7  ;;  %v1664_v63 = vpop.f32.mrf.mxu1  ;;  %vm7574_vm7 = vcmp.eq.f32.partialorder %v5485_v17, %v5630_v42 }
 0x763   :  { %v1747_v9 = vsel %vm5807_vm4, %v5455_v5, 0.0  ;;  %vm1713_vm1 = vcmp.eq.f32.partialorder %v1664_v63, 1.0  ;;  %v5855_v42 = vsel %vm5807_vm4, -3.4028235e+38, %v5455_v5 }
 0x764   :  { %v5817_v31 = vadd.f32 %v1747_v9, %v5417_v24  ;;  %vm1729_vm10 = vmand %vm7573_vm8, %vm1713_vm1  ;;  %v3586_v48 = vpop.f32.mrf.mxu1  ;;  %vm7577_vm1 = vcmp.eq.f32.partialorder %v5459_v43, %v5609_v55 }
 0x765   :  { %v1745_v34 = vsel %vm1729_vm10, %v5429_v16, 0.0  ;;  %v5829_v46 = vsel %vm1729_vm10, -3.4028235e+38, %v5429_v16  ;;  %vm1718_vm14 = vcmp.eq.f32.partialorder %v3586_v48, 1.0 }
 0x766   :  { %v5832_v49 = vadd.f32 %v1745_v34, %v5432_v14  ;;  %vm5837_vm3 = vmand %vm7574_vm7, %vm1718_vm14  ;;  %1800 = vmax.xlane.f32.xlu0 %v5825_v51  ;;  %1798 = vmax.xlane.f32.xlu1 %v5829_v46  ;;  %v1677_v22 = vpop.f32.mrf.mxu1  ;;  %vm7578_vm14 = vcmp.eq.f32.partialorder %v5515_v57, %v5649_v53 }
 0x767   :  { %v1750_v16 = vsel %vm5837_vm3, %v5485_v17, 0.0  ;;  %vm1716_vm0 = vcmp.eq.f32.partialorder %v1677_v22, 1.0  ;;  %v5885_v53 = vsel %vm5837_vm3, -3.4028235e+38, %v5485_v17 }
 0x768   :  { %v5847_v14 = vadd.f32 %v1750_v16, %v5447_v35  ;;  %vm1732_vm8 = vmand %vm7577_vm1, %vm1716_vm0  ;;  %v3587_v19 = vpop.f32.mrf.mxu1  ;;  %vm7581_vm0 = vcmp.eq.f32.partialorder %v5489_v36, %v5628_v15 }
 0x769   :  { %v1748_v44 = vsel %vm1732_vm8, %v5459_v43, 0.0  ;;  %v5859_v1 = vsel %vm1732_vm8, -3.4028235e+38, %v5459_v43  ;;  %vm1719_vm10 = vcmp.eq.f32.partialorder %v3587_v19, 1.0 }
 0x76a   :  { %v5862_v33 = vadd.f32 %v1748_v44, %v5462_v62  ;;  %vm5867_vm7 = vmand %vm7578_vm14, %vm1719_vm10  ;;  %1802 = vmax.xlane.f32.xlu1 %v5855_v42  ;;  %1804 = vmax.xlane.f32.xlu0 %v5859_v1  ;;  %v1680_v5 = vpop.f32.mrf.mxu1  ;;  %vm7582_vm10 = vcmp.eq.f32.partialorder %v5539_v2, %v5688_v60 }
 0x76b   :  { %v1751_v43 = vsel %vm5867_vm7, %v5515_v57, 0.0  ;;  %vm1717_vm4 = vcmp.eq.f32.partialorder %v1680_v5, 1.0  ;;  %v5915_v60 = vsel %vm5867_vm7, -3.4028235e+38, %v5515_v57 }
 0x76c   :  { %v5877_v62 = vadd.f32 %v1751_v43, %v5477_v61  ;;  %vm1733_vm1 = vmand %vm7581_vm0, %vm1717_vm4  ;;  %v3590_v55 = vpop.f32.mrf.mxu1  ;;  %vm7585_vm4 = vcmp.eq.f32.partialorder %v5519_v39, %v5651_v25 }
 0x76d   :  { %v1749_v59 = vsel %vm1733_vm1, %v5489_v36, 0.0  ;;  %v5889_v41 = vsel %vm1733_vm1, -3.4028235e+38, %v5489_v36  ;;  %vm1722_vm8 = vcmp.eq.f32.partialorder %v3590_v55, 1.0 }
 0x76e   :  { %v5892_v18 = vadd.f32 %v1749_v59, %v5492_v11  ;;  %vm5897_vm14 = vmand %vm7582_vm10, %vm1722_vm8  ;;  %1808 = vmax.xlane.f32.xlu0 %v5885_v53  ;;  %1806 = vmax.xlane.f32.xlu1 %v5889_v41  ;;  %v1693_v17 = vpop.f32.mrf.mxu1  ;;  %vm7586_vm8 = vcmp.eq.f32.partialorder %v5551_v29, %v5691_v37 }
 0x76f   :  { %v1754_v36 = vsel %vm5897_vm14, %v5539_v2, 0.0  ;;  %vm1720_vm3 = vcmp.eq.f32.partialorder %v1693_v17, 1.0 }
 0x770   :  { %v5907_v11 = vadd.f32 %v1754_v36, %v5507_v3  ;;  %vm1736_vm0 = vmand %vm7585_vm4, %vm1720_vm3  ;;  %v3591_v15 = vpop.f32.mrf.mxu1  ;;  %vm7587_vm3 = vcmp.eq.f32.partialorder %v5543_v6, %v5670_v4 }
 0x771   :  { %v1752_v63 = vsel %vm1736_vm0, %v5519_v39, 0.0  ;;  %v5919_v9 = vsel %vm1736_vm0, -3.4028235e+38, %v5519_v39  ;;  %vm1723_vm1 = vcmp.eq.f32.partialorder %v3591_v15, 1.0  ;;  %v5939_v39 = vsel %vm5897_vm14, -3.4028235e+38, %v5539_v2 }
 0x772   :  { %v5922_v48 = vadd.f32 %v1752_v63, %v5522_v52  ;;  %vm1739_vm10 = vmand %vm7586_vm8, %vm1723_vm1  ;;  %1810 = vmax.xlane.f32.xlu1 %v5915_v60  ;;  %1812 = vmax.xlane.f32.xlu0 %v5919_v9  ;;  %v1696_v3 = vpop.f32.mrf.mxu1 }
 0x773   :  { %v1755_v57 = vsel %vm1739_vm10, %v5551_v29, 0.0  ;;  %vm1721_vm7 = vcmp.eq.f32.partialorder %v1696_v3, 1.0 }
 0x774   :  { %v5931_v25 = vadd.f32 %v1755_v57, %v5531_v40  ;;  %vm1737_vm4 = vmand %vm7587_vm3, %vm1721_vm7  ;;  %v5951_v40 = vsel %vm1739_vm10, -3.4028235e+38, %v5551_v29 }
 0x775   :  { %v1753_v52 = vsel %vm1737_vm4, %v5543_v6, 0.0  ;;  %v5943_v37 = vsel %vm1737_vm4, -3.4028235e+38, %v5543_v6 }
 0x776   :  { %v5946_v34 = vadd.f32 %v1753_v52, %v5546_v26  ;;  %1816 = vmax.xlane.f32.xlu0 %v5939_v39  ;;  %1814 = vmax.xlane.f32.xlu1 %v5943_v37 }
 0x77a   :  { %1818 = vmax.xlane.f32.xlu1 %v5951_v40 }
 0x7e3   :  { %v5954_v4 = vpop.xlane.xlu0 %1788 }
 0x7e4   :  { %vm1820_vm14 = vcmp.eq.f32.partialorder %v5740_v10, %v5954_v4 }
 0x7e7   :  { %v5956_v2 = vpop.xlane.xlu1 %1790  ;;  %v5958_v24 = vpop.xlane.xlu0 %1792 }
 0x7e8   :  { %vm7367_vm0 = vcmp.eq.f32.partialorder %v5769_v58, %v5956_v2  ;;  %vm1822_vm8 = vcmp.eq.f32.partialorder %v5765_v38, %v5958_v24 }
 0x7e9   :  { %vm3008_vm1 = vmpackc.low %vm7367_vm0, %vm1820_vm14 }
 0x7ea   :  { %3608 = vmatprep.mubr.msk.bf16.mxu0 %vm3008_vm1, %v7524_v8 }
 0x7eb   :  { %v5971_v6 = vpop.xlane.xlu1 %1794  ;;  %v5973_v26 = vpop.xlane.xlu0 %1796 }
 0x7ec   :  { %vm1823_vm10 = vcmp.eq.f32.partialorder %v5795_v47, %v5971_v6  ;;  %vm7369_vm3 = vcmp.eq.f32.partialorder %v5799_v7, %v5973_v26 }
 0x7ed   :  { %vm3010_vm7 = vmpackc.low %vm1823_vm10, %vm1822_vm8 }
 0x7ee   :  { %3609 = vmatmul.mubr.msk.bf16.vlgmr.msra.gmra.mxu0 %vm3010_vm7, %v7524_v8 }
 0x7ef   :  { %v5986_v29 = vpop.xlane.xlu1 %1798  ;;  %v5988_v22 = vpop.xlane.xlu0 %1800  ;;  %3657 = vmatpush3.bf16.msk.msra.mxu0 %vm4134_vm5, %v7524_v8 }
 0x7f0   :  { %vm7368_vm4 = vcmp.eq.f32.partialorder %v5829_v46, %v5986_v29  ;;  %3658 = vmatprep.subr.msk.bf16.mxu0 %vm4141_vm6, %v7524_v8  ;;  %vm7371_vm7 = vcmp.eq.f32.partialorder %v5825_v51, %v5988_v22 }
 0x7f1   :  { %vm3012_vm1 = vmpackc.low %vm7368_vm4, %vm7369_vm3 }
 0x7f2   :  { %3612 = vmatprep.mubr.msk.bf16.mxu0 %vm3012_vm1, %v7524_v8 }
 0x7f3   :  { %v6007_v16 = vpop.xlane.xlu1 %1802  ;;  %v6009_v19 = vpop.xlane.xlu0 %1804  ;;  %3659 = vmatpush3.bf16.msk.msra.mxu0 %vm4141_vm6, %v7524_v8 }
 0x7f4   :  { %vm7370_vm0 = vcmp.eq.f32.partialorder %v5855_v42, %v6007_v16  ;;  %3660 = vmatprep.subr.msk.bf16.mxu0 %vm4161_vm9, %v7524_v8  ;;  %vm7373_vm4 = vcmp.eq.f32.partialorder %v5859_v1, %v6009_v19 }
 0x7f5   :  { %vm3014_vm1 = vmpackc.low %vm7370_vm0, %vm7371_vm7 }
 0x7f6   :  { %3613 = vmatmul.mubr.msk.bf16.gmra.mxu0 %vm3014_vm1, %v7524_v8 }
 0x7f7   :  { %v6028_v44 = vpop.xlane.xlu1 %1806  ;;  %v6030_v35 = vpop.xlane.xlu0 %1808  ;;  %3661 = vmatpush3.bf16.msk.msra.mxu0 %vm4161_vm9, %v7524_v8 }
 0x7f8   :  { %vm7372_vm3 = vcmp.eq.f32.partialorder %v5889_v41, %v6028_v44  ;;  %3662 = vmatprep.subr.msk.bf16.mxu0 %vm4184_vm12, %v7524_v8  ;;  %vm7375_vm0 = vcmp.eq.f32.partialorder %v5885_v53, %v6030_v35 }
 0x7f9   :  { %vm3016_vm1 = vmpackc.low %vm7372_vm3, %vm7373_vm4 }
 0x7fa   :  { %3616 = vmatprep.mubr.msk.bf16.mxu0 %vm3016_vm1, %v7524_v8 }
 0x7fb   :  { %v6049_v5 = vpop.xlane.xlu1 %1810  ;;  %v6051_v43 = vpop.xlane.xlu0 %1812  ;;  %3663 = vmatpush3.bf16.msk.msra.mxu0 %vm4184_vm12, %v7524_v8 }
 0x7fc   :  { %vm7374_vm7 = vcmp.eq.f32.partialorder %v5915_v60, %v6049_v5  ;;  %3664 = vmatprep.subr.msk.bf16.mxu0 %vm4204_vm15, %v7524_v8  ;;  %vm7378_vm3 = vcmp.eq.f32.partialorder %v5919_v9, %v6051_v43 }
 0x7fd   :  { %vm3018_vm1 = vmpackc.low %vm7374_vm7, %vm7375_vm0 }
 0x7fe   :  { %3617 = vmatmul.mubr.msk.bf16.gmra.mxu0 %vm3018_vm1, %v7524_v8 }
 0x7ff   :  { %v6070_v55 = vpop.xlane.xlu1 %1814  ;;  %3665 = vmatpush3.bf16.msk.msra.mxu0 %vm4204_vm15, %v7524_v8  ;;  %v6088_v59 = vpop.xlane.xlu0 %1816 }
 0x800   :  { %vm7376_vm4 = vcmp.eq.f32.partialorder %v5943_v37, %v6070_v55  ;;  %3666 = vmatprep.subr.msk.bf16.mxu0 %vm4224_vm2, %v7524_v8  ;;  %vm7379_vm7 = vcmp.eq.f32.partialorder %v5939_v39, %v6088_v59 }
 0x801   :  { %vm3020_vm1 = vmpackc.low %vm7376_vm4, %vm7378_vm3 }
 0x802   :  { %3620 = vmatprep.mubr.msk.bf16.mxu0 %vm3020_vm1, %v7524_v8 }
 0x803   :  { %v6091_v61 = vpop.xlane.xlu1 %1818  ;;  %3667 = vmatpush3.bf16.msk.msra.mxu0 %vm4224_vm2, %v7524_v8 }
 0x804   :  { %vm7377_vm0 = vcmp.eq.f32.partialorder %v5951_v40, %v6091_v61  ;;  %3668 = vmatprep.subr.msk.bf16.mxu0 %vm7532_vm11, %v7524_v8 }
 0x805   :  { %vm3022_vm1 = vmpackc.low %vm7377_vm0, %vm7379_vm7 }
 0x806   :  { %3621 = vmatmul.mubr.msk.bf16.gmra.mxu0 %vm3022_vm1, %v7524_v8 }
 0x807   :  { %3669 = vmatpush3.bf16.msk.msra.mxu0 %vm7532_vm11, %v7524_v8 }
 0x808   :  { %3670 = vmatprep.subr.msk.bf16.mxu0 %vm7534_vm13, %v7524_v8 }
 0x80b   :  { %3671 = vmatpush3.bf16.msk.msra.mxu0 %vm7534_vm13, %v7524_v8 }
 0x8ae   :  { %v3610_v17 = vpop.f32.mrf.mxu0 }
 0x8af   :  { %vm1959_vm4 = vcmp.eq.f32.partialorder %v3610_v17, 1.0 }
 0x8b0   :  { %vm6122_vm0 = vmand %vm1822_vm8, %vm1959_vm4  ;;  %v1894_v15 = vpop.f32.mrf.mxu0 }
 0x8b1   :  { %v1991_v63 = vsel %vm6122_vm0, %v5765_v38, 0.0  ;;  %vm1957_vm1 = vcmp.eq.f32.partialorder %v1894_v15, 1.0  ;;  %v6162_v6 = vsel %vm6122_vm0, -3.4028235e+38, %v5765_v38 }
 0x8b2   :  { %v6130_v3 = vadd.f32 %v1991_v63, %v5733_v20  ;;  %vm1973_vm3 = vmand %vm1820_vm14, %vm1957_vm1  ;;  %v3611_v57 = vpop.f32.mrf.mxu0 }
 0x8b3   :  { %v1989_v52 = vsel %vm1973_vm3, %v5740_v10, 0.0  ;;  %v6137_v24 = vsel %vm1973_vm3, -3.4028235e+38, %v5740_v10  ;;  %vm1960_vm8 = vcmp.eq.f32.partialorder %v3611_v57, 1.0  ;;  %vm7592_vm3 = vcmp.eq.f32.partialorder %v5769_v58, %v5956_v2 }
 0x8b4   :  { %v6140_v17 = vadd.f32 %v1989_v52, %v5743_v54  ;;  %vm6145_vm4 = vmand %vm1823_vm10, %vm1960_vm8  ;;  %2037 = vmax.xlane.f32.xlu0 %v6137_v24  ;;  %v1897_v4 = vpop.f32.mrf.mxu0  ;;  %vm7593_vm8 = vcmp.eq.f32.partialorder %v5825_v51, %v5988_v22 }
 0x8b5   :  { %v1992_v15 = vsel %vm6145_vm4, %v5795_v47, 0.0  ;;  %vm1958_vm14 = vcmp.eq.f32.partialorder %v1897_v4, 1.0  ;;  %v6192_v22 = vsel %vm6145_vm4, -3.4028235e+38, %v5795_v47 }
 0x8b6   :  { %v6154_v10 = vadd.f32 %v1992_v15, %v5757_v13  ;;  %vm1974_vm1 = vmand %vm7592_vm3, %vm1958_vm14  ;;  %v3614_v54 = vpop.f32.mrf.mxu0  ;;  %vm7596_vm14 = vcmp.eq.f32.partialorder %v5799_v7, %v5973_v26 }
 0x8b7   :  { %v1990_v63 = vsel %vm1974_vm1, %v5769_v58, 0.0  ;;  %v6166_v57 = vsel %vm1974_vm1, -3.4028235e+38, %v5769_v58  ;;  %vm1963_vm10 = vcmp.eq.f32.partialorder %v3614_v54, 1.0 }
 0x8b8   :  { %v6169_v52 = vadd.f32 %v1990_v63, %v5772_v28  ;;  %vm6174_vm7 = vmand %vm7593_vm8, %vm1963_vm10  ;;  %2041 = vmax.xlane.f32.xlu0 %v6162_v6  ;;  %2039 = vmax.xlane.f32.xlu1 %v6166_v57  ;;  %v1910_v38 = vpop.f32.mrf.mxu0  ;;  %vm7597_vm10 = vcmp.eq.f32.partialorder %v5855_v42, %v6007_v16 }
 0x8b9   :  { %v1995_v58 = vsel %vm6174_vm7, %v5825_v51, 0.0  ;;  %vm1961_vm0 = vcmp.eq.f32.partialorder %v1910_v38, 1.0  ;;  %v6222_v16 = vsel %vm6174_vm7, -3.4028235e+38, %v5825_v51 }
 0x8ba   :  { %v6184_v28 = vadd.f32 %v1995_v58, %v5787_v45  ;;  %vm1977_vm3 = vmand %vm7596_vm14, %vm1961_vm0  ;;  %v3615_v2 = vpop.f32.mrf.mxu0  ;;  %vm7600_vm0 = vcmp.eq.f32.partialorder %v5829_v46, %v5986_v29 }
 0x8bb   :  { %v1993_v36 = vsel %vm1977_vm3, %v5799_v7, 0.0  ;;  %v6196_v4 = vsel %vm1977_vm3, -3.4028235e+38, %v5799_v7  ;;  %vm1964_vm1 = vcmp.eq.f32.partialorder %v3615_v2, 1.0 }
 0x8bc   :  { %v6199_v15 = vadd.f32 %v1993_v36, %v5802_v50  ;;  %vm6204_vm8 = vmand %vm7597_vm10, %vm1964_vm1  ;;  %2043 = vmax.xlane.f32.xlu1 %v6192_v22  ;;  %2045 = vmax.xlane.f32.xlu0 %v6196_v4  ;;  %v1913_v47 = vpop.f32.mrf.mxu0  ;;  %vm7601_vm1 = vcmp.eq.f32.partialorder %v5885_v53, %v6030_v35 }
 0x8bd   :  { %v1996_v7 = vsel %vm6204_vm8, %v5855_v42, 0.0  ;;  %vm1962_vm4 = vcmp.eq.f32.partialorder %v1913_v47, 1.0  ;;  %v6252_v35 = vsel %vm6204_vm8, -3.4028235e+38, %v5855_v42 }
 0x8be   :  { %v6214_v50 = vadd.f32 %v1996_v7, %v5817_v31  ;;  %vm1978_vm14 = vmand %vm7600_vm0, %vm1962_vm4  ;;  %v3618_v26 = vpop.f32.mrf.mxu0  ;;  %vm7604_vm4 = vcmp.eq.f32.partialorder %v5859_v1, %v6009_v19 }
 0x8bf   :  { %v1994_v20 = vsel %vm1978_vm14, %v5829_v46, 0.0  ;;  %v6226_v54 = vsel %vm1978_vm14, -3.4028235e+38, %v5829_v46  ;;  %vm1967_vm3 = vcmp.eq.f32.partialorder %v3618_v26, 1.0 }
 0x8c0   :  { %v6229_v63 = vadd.f32 %v1994_v20, %v5832_v49  ;;  %vm6234_vm10 = vmand %vm7601_vm1, %vm1967_vm3  ;;  %2049 = vmax.xlane.f32.xlu0 %v6222_v16  ;;  %2047 = vmax.xlane.f32.xlu1 %v6226_v54  ;;  %v1926_v51 = vpop.f32.mrf.mxu0  ;;  %vm7605_vm3 = vcmp.eq.f32.partialorder %v5915_v60, %v6049_v5 }
 0x8c1   :  { %v1999_v46 = vsel %vm6234_vm10, %v5885_v53, 0.0  ;;  %vm1965_vm7 = vcmp.eq.f32.partialorder %v1926_v51, 1.0  ;;  %v6282_v5 = vsel %vm6234_vm10, -3.4028235e+38, %v5885_v53 }
 0x8c2   :  { %v6244_v49 = vadd.f32 %v1999_v46, %v5847_v14  ;;  %vm1981_vm0 = vmand %vm7604_vm4, %vm1965_vm7  ;;  %v3619_v29 = vpop.f32.mrf.mxu0  ;;  %vm7608_vm7 = vcmp.eq.f32.partialorder %v5889_v41, %v6028_v44 }
 0x8c3   :  { %v1997_v13 = vsel %vm1981_vm0, %v5859_v1, 0.0  ;;  %v6256_v38 = vsel %vm1981_vm0, -3.4028235e+38, %v5859_v1  ;;  %vm1968_vm14 = vcmp.eq.f32.partialorder %v3619_v29, 1.0 }
 0x8c4   :  { %v6259_v58 = vadd.f32 %v1997_v13, %v5862_v33  ;;  %vm6264_vm1 = vmand %vm7605_vm3, %vm1968_vm14  ;;  %2051 = vmax.xlane.f32.xlu1 %v6252_v35  ;;  %2053 = vmax.xlane.f32.xlu0 %v6256_v38  ;;  %v1929_v42 = vpop.f32.mrf.mxu0  ;;  %vm7609_vm14 = vcmp.eq.f32.partialorder %v5939_v39, %v6088_v59 }
 0x8c5   :  { %v2000_v1 = vsel %vm6264_vm1, %v5915_v60, 0.0  ;;  %vm1966_vm8 = vcmp.eq.f32.partialorder %v1929_v42, 1.0  ;;  %v6312_v59 = vsel %vm6264_vm1, -3.4028235e+38, %v5915_v60 }
 0x8c6   :  { %v6274_v33 = vadd.f32 %v2000_v1, %v5877_v62  ;;  %vm1982_vm4 = vmand %vm7608_vm7, %vm1966_vm8  ;;  %v3622_v19 = vpop.f32.mrf.mxu0  ;;  %vm7612_vm8 = vcmp.eq.f32.partialorder %v5919_v9, %v6051_v43 }
 0x8c7   :  { %v1998_v2 = vsel %vm1982_vm4, %v5889_v41, 0.0  ;;  %v6286_v36 = vsel %vm1982_vm4, -3.4028235e+38, %v5889_v41  ;;  %vm1971_vm0 = vcmp.eq.f32.partialorder %v3622_v19, 1.0 }
 0x8c8   :  { %v6289_v45 = vadd.f32 %v1998_v2, %v5892_v18  ;;  %vm6294_vm3 = vmand %vm7609_vm14, %vm1971_vm0  ;;  %2057 = vmax.xlane.f32.xlu0 %v6282_v5  ;;  %2055 = vmax.xlane.f32.xlu1 %v6286_v36  ;;  %v1942_v53 = vpop.f32.mrf.mxu0  ;;  %vm7613_vm0 = vcmp.eq.f32.partialorder %v5951_v40, %v6091_v61 }
 0x8c9   :  { %v2003_v41 = vsel %vm6294_vm3, %v5939_v39, 0.0  ;;  %vm1969_vm10 = vcmp.eq.f32.partialorder %v1942_v53, 1.0 }
 0x8ca   :  { %v6304_v18 = vadd.f32 %v2003_v41, %v5907_v11  ;;  %vm1985_vm7 = vmand %vm7612_vm8, %vm1969_vm10  ;;  %v3623_v44 = vpop.f32.mrf.mxu0  ;;  %vm7614_vm10 = vcmp.eq.f32.partialorder %v5943_v37, %v6070_v55 }
 0x8cb   :  { %v2001_v47 = vsel %vm1985_vm7, %v5919_v9, 0.0  ;;  %v6316_v7 = vsel %vm1985_vm7, -3.4028235e+38, %v5919_v9  ;;  %vm1972_vm4 = vcmp.eq.f32.partialorder %v3623_v44, 1.0  ;;  %v6336_v9 = vsel %vm6294_vm3, -3.4028235e+38, %v5939_v39 }
 0x8cc   :  { %v6319_v26 = vadd.f32 %v2001_v47, %v5922_v48  ;;  %vm1988_vm14 = vmand %vm7613_vm0, %vm1972_vm4  ;;  %2059 = vmax.xlane.f32.xlu1 %v6312_v59  ;;  %2061 = vmax.xlane.f32.xlu0 %v6316_v7  ;;  %v1945_v11 = vpop.f32.mrf.mxu0 }
 0x8cd   :  { %v2004_v60 = vsel %vm1988_vm14, %v5951_v40, 0.0  ;;  %vm1970_vm1 = vcmp.eq.f32.partialorder %v1945_v11, 1.0 }
 0x8ce   :  { %v6328_v43 = vadd.f32 %v2004_v60, %v5931_v25  ;;  %vm1986_vm8 = vmand %vm7614_vm10, %vm1970_vm1  ;;  %v6348_v25 = vsel %vm1988_vm14, -3.4028235e+38, %v5951_v40 }
 0x8cf   :  { %v2002_v48 = vsel %vm1986_vm8, %v5943_v37, 0.0  ;;  %v6340_v61 = vsel %vm1986_vm8, -3.4028235e+38, %v5943_v37 }
 0x8d0   :  { %v6343_v20 = vadd.f32 %v2002_v48, %v5946_v34  ;;  %2065 = vmax.xlane.f32.xlu0 %v6336_v9  ;;  %2063 = vmax.xlane.f32.xlu1 %v6340_v61 }
 0x8d4   :  { %2067 = vmax.xlane.f32.xlu1 %v6348_v25 }
 0x93d   :  { %v6351_v55 = vpop.xlane.xlu0 %2037 }
 0x93e   :  { %vm2069_vm3 = vcmp.eq.f32.partialorder %v6137_v24, %v6351_v55 }
 0x941   :  { %v6353_v39 = vpop.xlane.xlu1 %2039  ;;  %v6355_v31 = vpop.xlane.xlu0 %2041 }
 0x942   :  { %vm2070_vm7 = vcmp.eq.f32.partialorder %v6166_v57, %v6353_v39  ;;  %vm2071_vm0 = vcmp.eq.f32.partialorder %v6162_v6, %v6355_v31 }
 0x943   :  { %vm3040_vm4 = vmpackc.low %vm2070_vm7, %vm2069_vm3 }
 0x944   :  { %3640 = vmatprep.mubr.msk.bf16.mxu1 %vm3040_vm4, %v7524_v8 }
 0x945   :  { %v6368_v37 = vpop.xlane.xlu1 %2043  ;;  %v6370_v34 = vpop.xlane.xlu0 %2045 }
 0x946   :  { %vm2072_vm14 = vcmp.eq.f32.partialorder %v6192_v22, %v6368_v37  ;;  %vm2073_vm10 = vcmp.eq.f32.partialorder %v6196_v4, %v6370_v34 }
 0x947   :  { %vm3042_vm1 = vmpackc.low %vm2072_vm14, %vm2071_vm0 }
 0x948   :  { %3641 = vmatmul.mubr.msk.bf16.vlgmr.msra.gmra.mxu1 %vm3042_vm1, %v7524_v8 }
 0x949   :  { %v6383_v40 = vpop.xlane.xlu1 %2047  ;;  %v6385_v51 = vpop.xlane.xlu0 %2049  ;;  %3689 = vmatpush3.bf16.msk.msra.mxu1 %vm4134_vm5, %v7524_v8 }
 0x94a   :  { %vm7380_vm8 = vcmp.eq.f32.partialorder %v6226_v54, %v6383_v40  ;;  %3690 = vmatprep.subr.msk.bf16.mxu1 %vm4141_vm6, %v7524_v8  ;;  %vm2075_vm5 = vcmp.eq.f32.partialorder %v6222_v16, %v6385_v51 }
 0x94b   :  { %vm3044_vm4 = vmpackc.low %vm7380_vm8, %vm2073_vm10 }
 0x94c   :  { %3644 = vmatprep.mubr.msk.bf16.mxu1 %vm3044_vm4, %v7524_v8 }
 0x94d   :  { %v6404_v0 = vpop.xlane.xlu1 %2051  ;;  %v6406_v46 = vpop.xlane.xlu0 %2053  ;;  %3691 = vmatpush3.bf16.msk.msra.mxu1 %vm4141_vm6, %v7524_v8 }
 0x94e   :  { %vm7381_vm1 = vcmp.eq.f32.partialorder %v6252_v35, %v6404_v0  ;;  %3692 = vmatprep.subr.msk.bf16.mxu1 %vm4161_vm9, %v7524_v8  ;;  %vm2077_vm6 = vcmp.eq.f32.partialorder %v6256_v38, %v6406_v46 }
 0x94f   :  { %vm3046_vm4 = vmpackc.low %vm7381_vm1, %vm2075_vm5 }
 0x950   :  { %3645 = vmatmul.mubr.msk.bf16.gmra.mxu1 %vm3046_vm4, %v7524_v8 }
 0x951   :  { %v6425_v30 = vpop.xlane.xlu1 %2055  ;;  %v6427_v29 = vpop.xlane.xlu0 %2057  ;;  %3693 = vmatpush3.bf16.msk.msra.mxu1 %vm4161_vm9, %v7524_v8 }
 0x952   :  { %vm7382_vm8 = vcmp.eq.f32.partialorder %v6286_v36, %v6425_v30  ;;  %3694 = vmatprep.subr.msk.bf16.mxu1 %vm4184_vm12, %v7524_v8  ;;  %vm2079_vm9 = vcmp.eq.f32.partialorder %v6282_v5, %v6427_v29 }
 0x953   :  { %vm3048_vm4 = vmpackc.low %vm7382_vm8, %vm2077_vm6 }
 0x954   :  { %3648 = vmatprep.mubr.msk.bf16.mxu1 %vm3048_vm4, %v7524_v8 }
 0x955   :  { %v6446_v27 = vpop.xlane.xlu1 %2059  ;;  %v6448_v13 = vpop.xlane.xlu0 %2061  ;;  %3695 = vmatpush3.bf16.msk.msra.mxu1 %vm4184_vm12, %v7524_v8 }
 0x956   :  { %vm7383_vm1 = vcmp.eq.f32.partialorder %v6312_v59, %v6446_v27  ;;  %3696 = vmatprep.subr.msk.bf16.mxu1 %vm4204_vm15, %v7524_v8  ;;  %vm2081_vm12 = vcmp.eq.f32.partialorder %v6316_v7, %v6448_v13 }
 0x957   :  { %vm3050_vm4 = vmpackc.low %vm7383_vm1, %vm2079_vm9 }
 0x958   :  { %3649 = vmatmul.mubr.msk.bf16.gmra.mxu1 %vm3050_vm4, %v7524_v8 }
 0x959   :  { %v6467_v12 = vpop.xlane.xlu1 %2063  ;;  %3697 = vmatpush3.bf16.msk.msra.mxu1 %vm4204_vm15, %v7524_v8  ;;  %v6485_v14 = vpop.xlane.xlu0 %2065 }
 0x95a   :  { %vm7384_vm8 = vcmp.eq.f32.partialorder %v6340_v61, %v6467_v12  ;;  %3698 = vmatprep.subr.msk.bf16.mxu1 %vm4224_vm2, %v7524_v8  ;;  %vm2083_vm15 = vcmp.eq.f32.partialorder %v6336_v9, %v6485_v14 }
 0x95b   :  { %vm3052_vm4 = vmpackc.low %vm7384_vm8, %vm2081_vm12 }
 0x95c   :  { %3652 = vmatprep.mubr.msk.bf16.mxu1 %vm3052_vm4, %v7524_v8 }
 0x95d   :  { %v6488_v21 = vpop.xlane.xlu1 %2067  ;;  %3699 = vmatpush3.bf16.msk.msra.mxu1 %vm4224_vm2, %v7524_v8 }
 0x95e   :  { %vm2084_vm1 = vcmp.eq.f32.partialorder %v6348_v25, %v6488_v21  ;;  %3700 = vmatprep.subr.msk.bf16.mxu1 %vm7532_vm11, %v7524_v8 }
 0x95f   :  { %vm3054_vm4 = vmpackc.low %vm2084_vm1, %vm2083_vm15 }
 0x960   :  { %3653 = vmatmul.mubr.msk.bf16.gmra.mxu1 %vm3054_vm4, %v7524_v8 }
 0x961   :  { %3701 = vmatpush3.bf16.msk.msra.mxu1 %vm7532_vm11, %v7524_v8 }
 0x962   :  { %3702 = vmatprep.subr.msk.bf16.mxu1 %vm7534_vm13, %v7524_v8 }
 0x965   :  { %3703 = vmatpush3.bf16.msk.msra.mxu1 %vm7534_vm13, %v7524_v8 }
 0xa08   :  { %v3642_v56 = vpop.f32.mrf.mxu1 }
 0xa09   :  { %vm2208_vm2 = vcmp.eq.f32.partialorder %v3642_v56, 1.0 }
 0xa0a   :  { %vm6519_vm8 = vmand %vm2071_vm0, %vm2208_vm2  ;;  %v2143_v1 = vpop.f32.mrf.mxu1 }
 0xa0b   :  { %v2240_v32 = vsel %vm6519_vm8, %v6162_v6, 0.0  ;;  %vm2206_vm11 = vcmp.eq.f32.partialorder %v2143_v1, 1.0  ;;  %v6559_v47 = vsel %vm6519_vm8, -3.4028235e+38, %v6162_v6 }
 0xa0c   :  { %v6527_v19 = vadd.f32 %v2240_v32, %v6130_v3  ;;  %vm2222_vm13 = vmand %vm2069_vm3, %vm2206_vm11  ;;  %v3643_v23 = vpop.f32.mrf.mxu1 }
 0xa0d   :  { %v2238_v2 = vsel %vm2222_vm13, %v6137_v24, 0.0  ;;  %v6534_v62 = vsel %vm2222_vm13, -3.4028235e+38, %v6137_v24  ;;  %vm2209_vm0 = vcmp.eq.f32.partialorder %v3643_v23, 1.0  ;;  %vm7621_vm13 = vcmp.eq.f32.partialorder %v6252_v35, %v6404_v0 }
 0xa0e   :  { %v6537_v53 = vadd.f32 %v2238_v2, %v6140_v17  ;;  %vm6542_vm4 = vmand %vm2072_vm14, %vm2209_vm0  ;;  %2286 = vmax.xlane.f32.xlu0 %v6534_v62  ;;  %v2146_v41 = vpop.f32.mrf.mxu1 }
 0xa0f   :  { %v2241_v44 = vsel %vm6542_vm4, %v6192_v22, 0.0  ;;  %vm2207_vm3 = vcmp.eq.f32.partialorder %v2146_v41, 1.0  ;;  %v6589_v39 = vsel %vm6542_vm4, -3.4028235e+38, %v6192_v22  ;;  %vm7624_vm4 = vcmp.eq.f32.partialorder %v6226_v54, %v6383_v40 }
 0xa10   :  { %v6551_v24 = vadd.f32 %v2241_v44, %v6154_v10  ;;  %vm2223_vm2 = vmand %vm2070_vm7, %vm2207_vm3  ;;  %v3646_v17 = vpop.f32.mrf.mxu1 }
 0xa11   :  { %v2239_v11 = vsel %vm2223_vm2, %v6166_v57, 0.0  ;;  %v6563_v60 = vsel %vm2223_vm2, -3.4028235e+38, %v6166_v57  ;;  %vm2212_vm14 = vcmp.eq.f32.partialorder %v3646_v17, 1.0 }
 0xa12   :  { %v6566_v48 = vadd.f32 %v2239_v11, %v6169_v52  ;;  %vm6571_vm11 = vmand %vm2075_vm5, %vm2212_vm14  ;;  %2290 = vmax.xlane.f32.xlu0 %v6559_v47  ;;  %2288 = vmax.xlane.f32.xlu1 %v6563_v60  ;;  %v2159_v6 = vpop.f32.mrf.mxu1 }
 0xa13   :  { %v2244_v57 = vsel %vm6571_vm11, %v6222_v16, 0.0  ;;  %vm2210_vm7 = vcmp.eq.f32.partialorder %v2159_v6, 1.0  ;;  %v6619_v0 = vsel %vm6571_vm11, -3.4028235e+38, %v6222_v16 }
 0xa14   :  { %v6581_v52 = vadd.f32 %v2244_v57, %v6184_v28  ;;  %vm2226_vm8 = vmand %vm2073_vm10, %vm2210_vm7  ;;  %v3647_v55 = vpop.f32.mrf.mxu1 }
 0xa15   :  { %v2242_v31 = vsel %vm2226_vm8, %v6196_v4, 0.0  ;;  %v6593_v37 = vsel %vm2226_vm8, -3.4028235e+38, %v6196_v4  ;;  %vm2213_vm5 = vcmp.eq.f32.partialorder %v3647_v55, 1.0  ;;  %vm7627_vm8 = vcmp.eq.f32.partialorder %v6312_v59, %v6446_v27 }
 0xa16   :  { %v6596_v51 = vadd.f32 %v2242_v31, %v6199_v15  ;;  %vm6601_vm0 = vmand %vm7621_vm13, %vm2213_vm5  ;;  %2292 = vmax.xlane.f32.xlu1 %v6589_v39  ;;  %2294 = vmax.xlane.f32.xlu0 %v6593_v37  ;;  %v2162_v22 = vpop.f32.mrf.mxu1  ;;  %vm7630_vm13 = vcmp.eq.f32.partialorder %v6286_v36, %v6425_v30 }
 0xa17   :  { %v2245_v4 = vsel %vm6601_vm0, %v6252_v35, 0.0  ;;  %vm2211_vm10 = vcmp.eq.f32.partialorder %v2162_v22, 1.0  ;;  %v6649_v29 = vsel %vm6601_vm0, -3.4028235e+38, %v6252_v35 }
 0xa18   :  { %v6611_v15 = vadd.f32 %v2245_v4, %v6214_v50  ;;  %vm2227_vm3 = vmand %vm7624_vm4, %vm2211_vm10  ;;  %v3650_v34 = vpop.f32.mrf.mxu1 }
 0xa19   :  { %v2243_v56 = vsel %vm2227_vm3, %v6226_v54, 0.0  ;;  %v6623_v42 = vsel %vm2227_vm3, -3.4028235e+38, %v6226_v54  ;;  %vm2216_vm2 = vcmp.eq.f32.partialorder %v3650_v34, 1.0 }
 0xa1a   :  { %v6626_v1 = vadd.f32 %v2243_v56, %v6229_v63  ;;  %vm6631_vm14 = vmand %vm2079_vm9, %vm2216_vm2  ;;  %2298 = vmax.xlane.f32.xlu0 %v6619_v0  ;;  %2296 = vmax.xlane.f32.xlu1 %v6623_v42  ;;  %v2175_v16 = vpop.f32.mrf.mxu1 }
 0xa1b   :  { %v2248_v54 = vsel %vm6631_vm14, %v6282_v5, 0.0  ;;  %vm2214_vm11 = vcmp.eq.f32.partialorder %v2175_v16, 1.0  ;;  %v6679_v27 = vsel %vm6631_vm14, -3.4028235e+38, %v6282_v5 }
 0xa1c   :  { %v6641_v63 = vadd.f32 %v2248_v54, %v6244_v49  ;;  %vm2230_vm9 = vmand %vm2077_vm6, %vm2214_vm11  ;;  %v3651_v40 = vpop.f32.mrf.mxu1  ;;  %vm7633_vm11 = vcmp.eq.f32.partialorder %v6340_v61, %v6467_v12 }
 0xa1d   :  { %v2246_v32 = vsel %vm2230_vm9, %v6256_v38, 0.0  ;;  %v6653_v23 = vsel %vm2230_vm9, -3.4028235e+38, %v6256_v38  ;;  %vm2217_vm7 = vcmp.eq.f32.partialorder %v3651_v40, 1.0 }
 0xa1e   :  { %v6656_v2 = vadd.f32 %v2246_v32, %v6259_v58  ;;  %vm6661_vm5 = vmand %vm7627_vm8, %vm2217_vm7  ;;  %2300 = vmax.xlane.f32.xlu1 %v6649_v29  ;;  %2302 = vmax.xlane.f32.xlu0 %v6653_v23  ;;  %v2178_v35 = vpop.f32.mrf.mxu1 }
 0xa1f   :  { %v2249_v38 = vsel %vm6661_vm5, %v6312_v59, 0.0  ;;  %vm2215_vm6 = vcmp.eq.f32.partialorder %v2178_v35, 1.0  ;;  %v6709_v14 = vsel %vm6661_vm5, -3.4028235e+38, %v6312_v59 }
 0xa20   :  { %v6671_v58 = vadd.f32 %v2249_v38, %v6274_v33  ;;  %vm2231_vm0 = vmand %vm7630_vm13, %vm2215_vm6  ;;  %v3654_v46 = vpop.f32.mrf.mxu1 }
 0xa21   :  { %v2247_v3 = vsel %vm2231_vm0, %v6286_v36, 0.0  ;;  %v6683_v41 = vsel %vm2231_vm0, -3.4028235e+38, %v6286_v36  ;;  %vm2220_vm10 = vcmp.eq.f32.partialorder %v3654_v46, 1.0 }
 0xa22   :  { %v6686_v44 = vadd.f32 %v2247_v3, %v6289_v45  ;;  %vm6691_vm4 = vmand %vm2083_vm15, %vm2220_vm10  ;;  %2306 = vmax.xlane.f32.xlu0 %v6679_v27  ;;  %2304 = vmax.xlane.f32.xlu1 %v6683_v41  ;;  %v2191_v5 = vpop.f32.mrf.mxu1 }
 0xa23   :  { %v2252_v36 = vsel %vm6691_vm4, %v6336_v9, 0.0  ;;  %vm2218_vm3 = vcmp.eq.f32.partialorder %v2191_v5, 1.0 }
 0xa24   :  { %v6701_v45 = vadd.f32 %v2252_v36, %v6304_v18  ;;  %vm2234_vm15 = vmand %vm2081_vm12, %vm2218_vm3  ;;  %v3655_v30 = vpop.f32.mrf.mxu1 }
 0xa25   :  { %v2250_v17 = vsel %vm2234_vm15, %v6316_v7, 0.0  ;;  %v6713_v11 = vsel %vm2234_vm15, -3.4028235e+38, %v6316_v7  ;;  %vm2221_vm2 = vcmp.eq.f32.partialorder %v3655_v30, 1.0  ;;  %v6733_v7 = vsel %vm6691_vm4, -3.4028235e+38, %v6336_v9 }
 0xa26   :  { %v6716_v10 = vadd.f32 %v2250_v17, %v6319_v26  ;;  %vm2237_vm14 = vmand %vm2084_vm1, %vm2221_vm2  ;;  %2308 = vmax.xlane.f32.xlu1 %v6709_v14  ;;  %2310 = vmax.xlane.f32.xlu0 %v6713_v11  ;;  %v2194_v18 = vpop.f32.mrf.mxu1 }
 0xa27   :  { %v2253_v59 = vsel %vm2237_vm14, %v6348_v25, 0.0  ;;  %vm2219_vm12 = vcmp.eq.f32.partialorder %v2194_v18, 1.0 }
 0xa28   :  { %v6725_v13 = vadd.f32 %v2253_v59, %v6328_v43  ;;  %vm2235_vm9 = vmand %vm7633_vm11, %vm2219_vm12  ;;  %v6745_v43 = vsel %vm2237_vm14, -3.4028235e+38, %v6348_v25 }
 0xa29   :  { %v2251_v26 = vsel %vm2235_vm9, %v6340_v61, 0.0  ;;  %v6737_v21 = vsel %vm2235_vm9, -3.4028235e+38, %v6340_v61 }
 0xa2a   :  { %v6740_v6 = vadd.f32 %v2251_v26, %v6343_v20  ;;  %2314 = vmax.xlane.f32.xlu0 %v6733_v7  ;;  %2312 = vmax.xlane.f32.xlu1 %v6737_v21 }
 0xa2e   :  { %2316 = vmax.xlane.f32.xlu1 %v6745_v43 }
 0xa97   :  { %v2287_v12 = vpop.xlane.xlu0 %2286 }
 0xa98   :  { %vm2318_vm1 = vcmp.eq.f32.partialorder %v6534_v62, %v2287_v12 }
 0xa9b   :  { %v6748_v9 = vpop.xlane.xlu1 %2288  ;;  %v2291_v57 = vpop.xlane.xlu0 %2290 }
 0xa9c   :  { %vm2319_vm7 = vcmp.eq.f32.partialorder %v6563_v60, %v6748_v9  ;;  %vm2320_vm5 = vcmp.eq.f32.partialorder %v6559_v47, %v2291_v57 }
 0xa9d   :  { %vm3072_vm8 = vmpackc.low %vm2319_vm7, %vm2318_vm1 }
 0xa9e   :  { %3672 = vmatprep.mubr.msk.bf16.mxu0 %vm3072_vm8, %v7524_v8 }
 0xa9f   :  { %v2293_v61 = vpop.xlane.xlu1 %2292  ;;  %v6759_v20 = vpop.xlane.xlu0 %2294 }
 0xaa0   :  { %vm2321_vm6 = vcmp.eq.f32.partialorder %v6589_v39, %v2293_v61  ;;  %vm2322_vm0 = vcmp.eq.f32.partialorder %v6593_v37, %v6759_v20 }
 0xaa1   :  { %vm3074_vm13 = vmpackc.low %vm2321_vm6, %vm2320_vm5 }
 0xaa2   :  { %3673 = vmatmul.mubr.msk.bf16.vlgmr.msra.gmra.mxu0 %vm3074_vm13, %v7524_v8 }
 0xaa3   :  { %v6768_v25 = vpop.xlane.xlu1 %2296  ;;  %v2299_v55 = vpop.xlane.xlu0 %2298 }
 0xaa4   :  { %vm2323_vm10 = vcmp.eq.f32.partialorder %v6623_v42, %v6768_v25  ;;  %vm2324_vm3 = vcmp.eq.f32.partialorder %v6619_v0, %v2299_v55 }
 0xaa5   :  { %vm3076_vm4 = vmpackc.low %vm2323_vm10, %vm2322_vm0 }
 0xaa6   :  { %3676 = vmatprep.mubr.msk.bf16.mxu0 %vm3076_vm4, %v7524_v8 }
 0xaa7   :  { %v6781_v31 = vpop.xlane.xlu1 %2300  ;;  %v6783_v28 = vpop.xlane.xlu0 %2302 }
 0xaa8   :  { %vm2325_vm15 = vcmp.eq.f32.partialorder %v6649_v29, %v6781_v31  ;;  %vm2326_vm14 = vcmp.eq.f32.partialorder %v6653_v23, %v6783_v28 }
 0xaa9   :  { %vm3078_vm2 = vmpackc.low %vm2325_vm15, %vm2324_vm3 }
 0xaaa   :  { %3677 = vmatmul.mubr.msk.bf16.gmra.mxu0 %vm3078_vm2, %v7524_v8 }
 0xaab   :  { %v6794_v22 = vpop.xlane.xlu1 %2304  ;;  %v6796_v4 = vpop.xlane.xlu0 %2306 }
 0xaac   :  { %vm7385_vm12 = vcmp.eq.f32.partialorder %v6683_v41, %v6794_v22  ;;  %vm2328_vm9 = vcmp.eq.f32.partialorder %v6679_v27, %v6796_v4 }
 0xaad   :  { %vm3080_vm11 = vmpackc.low %vm7385_vm12, %vm2326_vm14 }
 0xaae   :  { %3680 = vmatprep.mubr.msk.bf16.mxu0 %vm3080_vm11, %v7524_v8 }
 0xaaf   :  { %v6809_v34 = vpop.xlane.xlu1 %2308  ;;  %v6811_v56 = vpop.xlane.xlu0 %2310 }
 0xab0   :  { %vm7386_vm8 = vcmp.eq.f32.partialorder %v6709_v14, %v6809_v34  ;;  %vm7388_vm4 = vcmp.eq.f32.partialorder %v6713_v11, %v6811_v56 }
 0xab1   :  { %vm3082_vm13 = vmpackc.low %vm7386_vm8, %vm2328_vm9 }
 0xab2   :  { %3681 = vmatmul.mubr.msk.bf16.gmra.mxu0 %vm3082_vm13, %v7524_v8 }
 0xab3   :  { %v6824_v50 = vpop.xlane.xlu1 %2312  ;;  %v6836_v16 = vpop.xlane.xlu0 %2314 }
 0xab4   :  { %vm7387_vm2 = vcmp.eq.f32.partialorder %v6737_v21, %v6824_v50  ;;  %vm2332_vm13 = vcmp.eq.f32.partialorder %v6733_v7, %v6836_v16 }
 0xab5   :  { %vm3084_vm11 = vmpackc.low %vm7387_vm2, %vm7388_vm4 }
 0xab6   :  { %3684 = vmatprep.mubr.msk.bf16.mxu0 %vm3084_vm11, %v7524_v8 }
 0xab7   :  { %v6839_v54 = vpop.xlane.xlu1 %2316 }
 0xab8   :  { %vm7389_vm12 = vcmp.eq.f32.partialorder %v6745_v43, %v6839_v54 }
 0xab9   :  { %vm3086_vm8 = vmpackc.low %vm7389_vm12, %vm2332_vm13 }
 0xaba   :  { %3685 = vmatmul.mubr.msk.bf16.gmra.mxu0 %vm3086_vm8, %v7524_v8 }
 0xb62   :  { %v3674_v40 = vpop.f32.mrf.mxu0 }
 0xb63   :  { %vm2457_vm2 = vcmp.eq.f32.partialorder %v3674_v40, 1.0 }
 0xb64   :  { %vm6854_vm11 = vmand %vm2320_vm5, %vm2457_vm2  ;;  %v2392_v49 = vpop.f32.mrf.mxu0 }
 0xb65   :  { %v2489_v35 = vsel %vm6854_vm11, %v6559_v47, 0.0  ;;  %vm2455_vm4 = vcmp.eq.f32.partialorder %v2392_v49, 1.0  ;;  %v6893_v18 = vsel %vm6854_vm11, -3.4028235e+38, %v6559_v47 }
 0xb66   :  { %v6862_v38 = vadd.f32 %v2489_v35, %v6527_v19  ;;  %vm2471_vm8 = vmand %vm2318_vm1, %vm2455_vm4  ;;  %v3675_v46 = vpop.f32.mrf.mxu0 }
 0xb67   :  { %v2487_v3 = vsel %vm2471_vm8, %v6534_v62, 0.0  ;;  %vm2458_vm12 = vcmp.eq.f32.partialorder %v3675_v46, 1.0  ;;  %v6868_v33 = vsel %vm2471_vm8, -3.4028235e+38, %v6534_v62 }
 0xb68   :  { %v6871_v5 = vadd.f32 %v2487_v3, %v6537_v53  ;;  %vm6875_vm5 = vmand %vm2321_vm6, %vm2458_vm12  ;;  %2535 = vmax.xlane.f32.xlu0 %v6868_v33  ;;  %v2395_v19 = vpop.f32.mrf.mxu0 }
 0xb69   :  { %v2490_v30 = vsel %vm6875_vm5, %v6589_v39, 0.0  ;;  %vm2456_vm1 = vcmp.eq.f32.partialorder %v2395_v19, 1.0  ;;  %v6922_v57 = vsel %vm6875_vm5, -3.4028235e+38, %v6589_v39 }
 0xb6a   :  { %v6884_v62 = vadd.f32 %v2490_v30, %v6551_v24  ;;  %vm2472_vm4 = vmand %vm2319_vm7, %vm2456_vm1  ;;  %v3678_v53 = vpop.f32.mrf.mxu0 }
 0xb6b   :  { %v2488_v17 = vsel %vm2472_vm4, %v6563_v60, 0.0  ;;  %vm2461_vm6 = vcmp.eq.f32.partialorder %v3678_v53, 1.0  ;;  %v6896_v59 = vsel %vm2472_vm4, -3.4028235e+38, %v6563_v60  ;;  %vm7644_vm4 = vcmp.eq.f32.partialorder %v6709_v14, %v6809_v34 }
 0xb6c   :  { %v6899_v26 = vadd.f32 %v2488_v17, %v6566_v48  ;;  %vm6903_vm12 = vmand %vm2324_vm3, %vm2461_vm6  ;;  %2539 = vmax.xlane.f32.xlu0 %v6893_v18  ;;  %2537 = vmax.xlane.f32.xlu1 %v6896_v59  ;;  %v2408_v12 = vpop.f32.mrf.mxu0 }
 0xb6d   :  { %v2493_v47 = vsel %vm6903_vm12, %v6619_v0, 0.0  ;;  %vm2459_vm7 = vcmp.eq.f32.partialorder %v2408_v12, 1.0  ;;  %v6952_v40 = vsel %vm6903_vm12, -3.4028235e+38, %v6619_v0  ;;  %vm7647_vm12 = vcmp.eq.f32.partialorder %v6683_v41, %v6794_v22 }
 0xb6e   :  { %v6913_v60 = vadd.f32 %v2493_v47, %v6581_v52  ;;  %vm2475_vm3 = vmand %vm2322_vm0, %vm2459_vm7  ;;  %v3679_v48 = vpop.f32.mrf.mxu0 }
 0xb6f   :  { %v2491_v9 = vsel %vm2475_vm3, %v6593_v37, 0.0  ;;  %vm2462_vm2 = vcmp.eq.f32.partialorder %v3679_v48, 1.0  ;;  %v6925_v61 = vsel %vm2475_vm3, -3.4028235e+38, %v6593_v37 }
 0xb70   :  { %v6928_v55 = vadd.f32 %v2491_v9, %v6596_v51  ;;  %vm6933_vm11 = vmand %vm2325_vm15, %vm2462_vm2  ;;  %2541 = vmax.xlane.f32.xlu1 %v6922_v57  ;;  %2543 = vmax.xlane.f32.xlu0 %v6925_v61  ;;  %v2411_v20 = vpop.f32.mrf.mxu0 }
 0xb71   :  { %v2494_v39 = vsel %vm6933_vm11, %v6649_v29, 0.0  ;;  %vm2460_vm0 = vcmp.eq.f32.partialorder %v2411_v20, 1.0  ;;  %v6982_v35 = vsel %vm6933_vm11, -3.4028235e+38, %v6649_v29 }
 0xb72   :  { %v6943_v37 = vadd.f32 %v2494_v39, %v6611_v15  ;;  %vm2476_vm15 = vmand %vm2323_vm10, %vm2460_vm0  ;;  %v3682_v51 = vpop.f32.mrf.mxu0  ;;  %vm7650_vm0 = vcmp.eq.f32.partialorder %v6713_v11, %v6811_v56 }
 0xb73   :  { %v2492_v31 = vsel %vm2476_vm15, %v6623_v42, 0.0  ;;  %vm2465_vm8 = vcmp.eq.f32.partialorder %v3682_v51, 1.0  ;;  %v6955_v32 = vsel %vm2476_vm15, -3.4028235e+38, %v6623_v42 }
 0xb74   :  { %v6958_v49 = vadd.f32 %v2492_v31, %v6626_v1  ;;  %vm6963_vm5 = vmand %vm2328_vm9, %vm2465_vm8  ;;  %2547 = vmax.xlane.f32.xlu0 %v6952_v40  ;;  %2545 = vmax.xlane.f32.xlu1 %v6955_v32  ;;  %v2424_v25 = vpop.f32.mrf.mxu0  ;;  %vm7651_vm8 = vcmp.eq.f32.partialorder %v6745_v43, %v6839_v54 }
 0xb75   :  { %v2497_v0 = vsel %vm6963_vm5, %v6679_v27, 0.0  ;;  %vm2463_vm10 = vcmp.eq.f32.partialorder %v2424_v25, 1.0  ;;  %v7012_v36 = vsel %vm6963_vm5, -3.4028235e+38, %v6679_v27 }
 0xb76   :  { %v6973_v42 = vadd.f32 %v2497_v0, %v6641_v63  ;;  %vm2479_vm9 = vmand %vm2326_vm14, %vm2463_vm10  ;;  %v3683_v1 = vpop.f32.mrf.mxu0 }
 0xb77   :  { %v2495_v4 = vsel %vm2479_vm9, %v6653_v23, 0.0  ;;  %vm2466_vm1 = vcmp.eq.f32.partialorder %v3683_v1, 1.0  ;;  %v6985_v46 = vsel %vm2479_vm9, -3.4028235e+38, %v6653_v23  ;;  %vm7652_vm9 = vcmp.eq.f32.partialorder %v6737_v21, %v6824_v50 }
 0xb78   :  { %v6988_v3 = vadd.f32 %v2495_v4, %v6656_v2  ;;  %vm6993_vm6 = vmand %vm7644_vm4, %vm2466_vm1  ;;  %2549 = vmax.xlane.f32.xlu1 %v6982_v35  ;;  %2551 = vmax.xlane.f32.xlu0 %v6985_v46  ;;  %v2427_v28 = vpop.f32.mrf.mxu0 }
 0xb79   :  { %v2498_v29 = vsel %vm6993_vm6, %v6709_v14, 0.0  ;;  %vm2464_vm14 = vcmp.eq.f32.partialorder %v2427_v28, 1.0  ;;  %v7042_v53 = vsel %vm6993_vm6, -3.4028235e+38, %v6709_v14 }
 0xb7a   :  { %v7003_v23 = vadd.f32 %v2498_v29, %v6671_v58  ;;  %vm2480_vm7 = vmand %vm7647_vm12, %vm2464_vm14  ;;  %v3686_v2 = vpop.f32.mrf.mxu0 }
 0xb7b   :  { %v2496_v34 = vsel %vm2480_vm7, %v6683_v41, 0.0  ;;  %vm2469_vm3 = vcmp.eq.f32.partialorder %v3686_v2, 1.0  ;;  %v7015_v19 = vsel %vm2480_vm7, -3.4028235e+38, %v6683_v41 }
 0xb7c   :  { %v7018_v30 = vadd.f32 %v2496_v34, %v6686_v44  ;;  %vm7023_vm2 = vmand %vm2332_vm13, %vm2469_vm3  ;;  %2555 = vmax.xlane.f32.xlu0 %v7012_v36  ;;  %2553 = vmax.xlane.f32.xlu1 %v7015_v19  ;;  %v2440_v22 = vpop.f32.mrf.mxu0 }
 0xb7d   :  { %v2501_v27 = vsel %vm7023_vm2, %v6733_v7, 0.0  ;;  %vm2467_vm11 = vcmp.eq.f32.partialorder %v2440_v22, 1.0 }
 0xb7e   :  { %v7033_v41 = vadd.f32 %v2501_v27, %v6701_v45  ;;  %vm2483_vm13 = vmand %vm7650_vm0, %vm2467_vm11  ;;  %v3687_v44 = vpop.f32.mrf.mxu0 }
 0xb7f   :  { %v2499_v16 = vsel %vm2483_vm13, %v6713_v11, 0.0  ;;  %vm2470_vm15 = vcmp.eq.f32.partialorder %v3687_v44, 1.0  ;;  %v7045_v17 = vsel %vm2483_vm13, -3.4028235e+38, %v6713_v11 }
 0xb80   :  { %v7048_v24 = vadd.f32 %v2499_v16, %v6716_v10  ;;  %vm2486_vm5 = vmand %vm7651_vm8, %vm2470_vm15  ;;  %2557 = vmax.xlane.f32.xlu1 %v7042_v53  ;;  %2559 = vmax.xlane.f32.xlu0 %v7045_v17  ;;  %v2443_v45 = vpop.f32.mrf.mxu0  ;;  %v7066_v10 = vsel %vm7023_vm2, -3.4028235e+38, %v6733_v7 }
 0xb81   :  { %v2502_v56 = vsel %vm2486_vm5, %v6745_v43, 0.0  ;;  %vm2468_vm10 = vcmp.eq.f32.partialorder %v2443_v45, 1.0 }
 0xb82   :  { %v7057_v14 = vadd.f32 %v2502_v56, %v6725_v13  ;;  %vm2484_vm1 = vmand %vm7652_vm9, %vm2468_vm10  ;;  %v7077_v13 = vsel %vm2486_vm5, -3.4028235e+38, %v6745_v43 }
 0xb83   :  { %v2500_v11 = vsel %vm2484_vm1, %v6737_v21, 0.0  ;;  %v7069_v54 = vsel %vm2484_vm1, -3.4028235e+38, %v6737_v21 }
 0xb84   :  { %v7072_v12 = vadd.f32 %v2500_v11, %v6740_v6  ;;  %2563 = vmax.xlane.f32.xlu0 %v7066_v10  ;;  %2561 = vmax.xlane.f32.xlu1 %v7069_v54 }
 0xb88   :  { %2565 = vmax.xlane.f32.xlu1 %v7077_v13 }
 0xbf1   :  { %v2536_v50 = vpop.xlane.xlu0 %2535 }
 0xbf2   :  { %vm2567_vm4 = vcmp.eq.f32.partialorder %v6868_v33, %v2536_v50 }
 0xbf5   :  { %v7080_v47 = vpop.xlane.xlu1 %2537  ;;  %v2540_v7 = vpop.xlane.xlu0 %2539 }
 0xbf6   :  { %vm2568_vm6 = vcmp.eq.f32.partialorder %v6896_v59, %v7080_v47  ;;  %vm2569_vm12 = vcmp.eq.f32.partialorder %v6893_v18, %v2540_v7 }
 0xbf7   :  { %vm3104_vm14 = vmpackc.low %vm2568_vm6, %vm2567_vm4 }
 0xbf8   :  { %3704 = vmatprep.mubr.msk.bf16.mxu1 %vm3104_vm14, %v7524_v8 }
 0xbf9   :  { %v2542_v21 = vpop.xlane.xlu1 %2541  ;;  %v7091_v6 = vpop.xlane.xlu0 %2543 }
 0xbfa   :  { %vm2570_vm7 = vcmp.eq.f32.partialorder %v6922_v57, %v2542_v21  ;;  %vm2571_vm2 = vcmp.eq.f32.partialorder %v6925_v61, %v7091_v6 }
 0xbfb   :  { %vm3106_vm3 = vmpackc.low %vm2570_vm7, %vm2569_vm12 }
 0xbfc   :  { %3705 = vmatmul.mubr.msk.bf16.vlgmr.msra.gmra.mxu1 %vm3106_vm3, %v7524_v8 }
 0xbfd   :  { %v7100_v43 = vpop.xlane.xlu1 %2545  ;;  %v2548_v48 = vpop.xlane.xlu0 %2547 }
 0xbfe   :  { %vm2572_vm11 = vcmp.eq.f32.partialorder %v6955_v32, %v7100_v43  ;;  %vm2573_vm13 = vcmp.eq.f32.partialorder %v6952_v40, %v2548_v48 }
 0xbff   :  { %vm3108_vm0 = vmpackc.low %vm2572_vm11, %vm2571_vm2 }
 0xc00   :  { %3708 = vmatprep.mubr.msk.bf16.mxu1 %vm3108_vm0, %v7524_v8 }
 0xc01   :  { %v7113_v9 = vpop.xlane.xlu1 %2549  ;;  %v7115_v52 = vpop.xlane.xlu0 %2551 }
 0xc02   :  { %vm2574_vm15 = vcmp.eq.f32.partialorder %v6982_v35, %v7113_v9  ;;  %vm7394_vm5 = vcmp.eq.f32.partialorder %v6985_v46, %v7115_v52 }
 0xc03   :  { %vm3110_vm8 = vmpackc.low %vm2574_vm15, %vm2573_vm13 }
 0xc04   :  { %3709 = vmatmul.mubr.msk.bf16.gmra.mxu1 %vm3110_vm8, %v7524_v8 }
 0xc05   :  { %v7126_v20 = vpop.xlane.xlu1 %2553  ;;  %v7128_v39 = vpop.xlane.xlu0 %2555 }
 0xc06   :  { %vm7390_vm10 = vcmp.eq.f32.partialorder %v7015_v19, %v7126_v20  ;;  %vm2577_vm1 = vcmp.eq.f32.partialorder %v7012_v36, %v7128_v39 }
 0xc07   :  { %vm3112_vm9 = vmpackc.low %vm7390_vm10, %vm7394_vm5 }
 0xc08   :  { %3712 = vmatprep.mubr.msk.bf16.mxu1 %vm3112_vm9, %v7524_v8 }
 0xc09   :  { %v7141_v51 = vpop.xlane.xlu1 %2557  ;;  %v7143_v31 = vpop.xlane.xlu0 %2559 }
 0xc0a   :  { %vm7391_vm14 = vcmp.eq.f32.partialorder %v7042_v53, %v7141_v51  ;;  %vm7393_vm0 = vcmp.eq.f32.partialorder %v7045_v17, %v7143_v31 }
 0xc0b   :  { %vm3114_vm3 = vmpackc.low %vm7391_vm14, %vm2577_vm1 }
 0xc0c   :  { %3713 = vmatmul.mubr.msk.bf16.gmra.mxu1 %vm3114_vm3, %v7524_v8 }
 0xc0d   :  { %v7156_v15 = vpop.xlane.xlu1 %2561  ;;  %v7168_v25 = vpop.xlane.xlu0 %2563 }
 0xc0e   :  { %vm7392_vm8 = vcmp.eq.f32.partialorder %v7069_v54, %v7156_v15  ;;  %vm2581_vm3 = vcmp.eq.f32.partialorder %v7066_v10, %v7168_v25 }
 0xc0f   :  { %vm3116_vm9 = vmpackc.low %vm7392_vm8, %vm7393_vm0 }
 0xc10   :  { %3716 = vmatprep.mubr.msk.bf16.mxu1 %vm3116_vm9, %v7524_v8 }
 0xc11   :  { %v7171_v0 = vpop.xlane.xlu1 %2565 }
 0xc12   :  { %vm7395_vm10 = vcmp.eq.f32.partialorder %v7077_v13, %v7171_v0 }
 0xc13   :  { %vm3118_vm14 = vmpackc.low %vm7395_vm10, %vm2581_vm3 }
 0xc14   :  { %3717 = vmatmul.mubr.msk.bf16.gmra.mxu1 %vm3118_vm14, %v7524_v8 }
 0xcbc   :  { %v3706_v1 = vpop.f32.mrf.mxu1 }
 0xcbd   :  { %vm2706_vm8 = vcmp.eq.f32.partialorder %v3706_v1, 1.0 }
 0xcbe   :  { %vm2722_vm9 = vmand %vm2569_vm12, %vm2706_vm8  ;;  %v2641_v4 = vpop.f32.mrf.mxu1 }
 0xcbf   :  { %v2738_v63 = vsel %vm2722_vm9, %v6893_v18, 0.0  ;;  %vm2704_vm0 = vcmp.eq.f32.partialorder %v2641_v4, 1.0 }
 0xcc0   :  { %v2754_v28 = vadd.f32 %v2738_v63, %v6862_v38  ;;  %vm2720_vm5 = vmand %vm2567_vm4, %vm2704_vm0  ;;  %v3707_v29 = vpop.f32.mrf.mxu1 }
 0xcc1   :  { %v2736_v2 = vsel %vm2720_vm5, %v6868_v33, 0.0  ;;  %vm2707_vm10 = vcmp.eq.f32.partialorder %v3707_v29, 1.0 }
 0xcc2   :  { %2770 = vst [vmem:[#allocation2 + $0x10] sm:$0xff] %v2754_v28  ;;  %v2752_v8 = vadd.f32 %v2736_v2, %v6871_v5  ;;  %vm2723_vm14 = vmand %vm2570_vm7, %vm2707_vm10  ;;  %v2644_v34 = vpop.f32.mrf.mxu1 }
 0xcc3   :  { %v2739_v58 = vsel %vm2723_vm14, %v6922_v57, 0.0  ;;  %vm2705_vm12 = vcmp.eq.f32.partialorder %v2644_v34, 1.0 }
 0xcc4   :  { %2768 = vst [vmem:[#allocation2] sm:$0xff] %v2752_v8  ;;  %v2755_v38 = vadd.f32 %v2739_v58, %v6884_v62  ;;  %vm2721_vm4 = vmand %vm2568_vm6, %vm2705_vm12  ;;  %v3710_v18 = vpop.f32.mrf.mxu1 }
 0xcc5   :  { %v2737_v33 = vsel %vm2721_vm4, %v6896_v59, 0.0  ;;  %vm2710_vm5 = vcmp.eq.f32.partialorder %v3710_v18, 1.0 }
 0xcc6   :  { %2771 = vst [vmem:[#allocation2 + $0x18] sm:$0xff] %v2755_v38  ;;  %v2753_v5 = vadd.f32 %v2737_v33, %v6899_v26  ;;  %vm2726_vm7 = vmand %vm2573_vm13, %vm2710_vm5  ;;  %v2657_v22 = vpop.f32.mrf.mxu1 }
 0xcc7   :  { %v2742_v57 = vsel %vm2726_vm7, %v6952_v40, 0.0  ;;  %vm2708_vm10 = vcmp.eq.f32.partialorder %v2657_v22, 1.0 }
 0xcc8   :  { %2769 = vst [vmem:[#allocation2 + $0x8] sm:$0xff] %v2753_v5  ;;  %v2758_v62 = vadd.f32 %v2742_v57, %v6913_v60  ;;  %vm2724_vm6 = vmand %vm2571_vm2, %vm2708_vm10  ;;  %v3711_v27 = vpop.f32.mrf.mxu1  ;;  %vm7655_vm10 = vcmp.eq.f32.partialorder %v7015_v19, %v7126_v20 }
 0xcc9   :  { %v2740_v59 = vsel %vm2724_vm6, %v6925_v61, 0.0  ;;  %vm2711_vm0 = vcmp.eq.f32.partialorder %v3711_v27, 1.0 }
 0xcca   :  { %2774 = vst [vmem:[#allocation2 + $0x30] sm:$0xff] %v2758_v62  ;;  %v2756_v26 = vadd.f32 %v2740_v59, %v6928_v55  ;;  %vm2727_vm13 = vmand %vm2574_vm15, %vm2711_vm0  ;;  %v2660_v40 = vpop.f32.mrf.mxu1 }
 0xccb   :  { %v2743_v44 = vsel %vm2727_vm13, %v6982_v35, 0.0  ;;  %vm2709_vm8 = vcmp.eq.f32.partialorder %v2660_v40, 1.0 }
 0xccc   :  { %2772 = vst [vmem:[#allocation2 + $0x20] sm:$0xff] %v2756_v26  ;;  %v2759_v60 = vadd.f32 %v2743_v44, %v6943_v37  ;;  %vm2725_vm2 = vmand %vm2572_vm11, %vm2709_vm8  ;;  %v3714_v61 = vpop.f32.mrf.mxu1  ;;  %vm7653_vm11 = vcmp.eq.f32.partialorder %v6985_v46, %v7115_v52 }
 0xccd   :  { %v2741_v16 = vsel %vm2725_vm2, %v6955_v32, 0.0  ;;  %vm2714_vm9 = vcmp.eq.f32.partialorder %v3714_v61, 1.0  ;;  %vm7656_vm2 = vcmp.eq.f32.partialorder %v7045_v17, %v7143_v31 }
 0xcce   :  { %2775 = vst [vmem:[#allocation2 + $0x38] sm:$0xff] %v2759_v60  ;;  %v2757_v55 = vadd.f32 %v2741_v16, %v6958_v49  ;;  %vm2730_vm15 = vmand %vm2577_vm1, %vm2714_vm9  ;;  %v2673_v35 = vpop.f32.mrf.mxu1  ;;  %vm7654_vm1 = vcmp.eq.f32.partialorder %v7042_v53, %v7141_v51 }
 0xccf   :  { %v2746_v45 = vsel %vm2730_vm15, %v7012_v36, 0.0  ;;  %vm2712_vm14 = vcmp.eq.f32.partialorder %v2673_v35, 1.0 }
 0xcd0   :  { %2773 = vst [vmem:[#allocation2 + $0x28] sm:$0xff] %v2757_v55  ;;  %v2762_v37 = vadd.f32 %v2746_v45, %v6973_v42  ;;  %vm2728_vm12 = vmand %vm7653_vm11, %vm2712_vm14  ;;  %v3715_v32 = vpop.f32.mrf.mxu1 }
 0xcd1   :  { %v2744_v56 = vsel %vm2728_vm12, %v6985_v46, 0.0  ;;  %vm2715_vm4 = vcmp.eq.f32.partialorder %v3715_v32, 1.0  ;;  %vm7658_vm12 = vcmp.eq.f32.partialorder %v7069_v54, %v7156_v15 }
 0xcd2   :  { %2778 = vst [vmem:[#allocation2 + $0x50] sm:$0xff] %v2762_v37  ;;  %v2760_v49 = vadd.f32 %v2744_v56, %v6988_v3  ;;  %vm2731_vm5 = vmand %vm7654_vm1, %vm2715_vm4  ;;  %v2676_v36 = vpop.f32.mrf.mxu1 }
 0xcd3   :  { %v2747_v11 = vsel %vm2731_vm5, %v7042_v53, 0.0  ;;  %vm2713_vm7 = vcmp.eq.f32.partialorder %v2676_v36, 1.0 }
 0xcd4   :  { %2776 = vst [vmem:[#allocation2 + $0x40] sm:$0xff] %v2760_v49  ;;  %v2763_v42 = vadd.f32 %v2747_v11, %v7003_v23  ;;  %vm2729_vm6 = vmand %vm7655_vm10, %vm2713_vm7  ;;  %v3718_v46 = vpop.f32.mrf.mxu1 }
 0xcd5   :  { %v2745_v50 = vsel %vm2729_vm6, %v7015_v19, 0.0  ;;  %vm2718_vm0 = vcmp.eq.f32.partialorder %v3718_v46, 1.0 }
 0xcd6   :  { %2779 = vst [vmem:[#allocation2 + $0x58] sm:$0xff] %v2763_v42  ;;  %v2761_v3 = vadd.f32 %v2745_v50, %v7018_v30  ;;  %vm2734_vm13 = vmand %vm2581_vm3, %vm2718_vm0  ;;  %v2689_v53 = vpop.f32.mrf.mxu1  ;;  %vm7657_vm3 = vcmp.eq.f32.partialorder %v7077_v13, %v7171_v0 }
 0xcd7   :  { %v2750_v47 = vsel %vm2734_vm13, %v7066_v10, 0.0  ;;  %vm2716_vm8 = vcmp.eq.f32.partialorder %v2689_v53, 1.0 }
 0xcd8   :  { %2777 = vst [vmem:[#allocation2 + $0x48] sm:$0xff] %v2761_v3  ;;  %v2766_v23 = vadd.f32 %v2750_v47, %v7033_v41  ;;  %vm2732_vm9 = vmand %vm7656_vm2, %vm2716_vm8  ;;  %v3719_v19 = vpop.f32.mrf.mxu1 }
 0xcd9   :  { %v2748_v7 = vsel %vm2732_vm9, %v7045_v17, 0.0  ;;  %vm2719_vm15 = vcmp.eq.f32.partialorder %v3719_v19, 1.0 }
 0xcda   :  { %2782 = vst [vmem:[#allocation2 + $0x70] sm:$0xff] %v2766_v23  ;;  %v2764_v30 = vadd.f32 %v2748_v7, %v7048_v24  ;;  %vm2735_vm14 = vmand %vm7657_vm3, %vm2719_vm15  ;;  %v2692_v10 = vpop.f32.mrf.mxu1 }
 0xcdb   :  { %v2751_v41 = vsel %vm2735_vm14, %v7077_v13, 0.0  ;;  %vm2717_vm11 = vcmp.eq.f32.partialorder %v2692_v10, 1.0 }
 0xcdc   :  { %2780 = vst [vmem:[#allocation2 + $0x60] sm:$0xff] %v2764_v30  ;;  %v2767_v21 = vadd.f32 %v2751_v41, %v7057_v14  ;;  %vm2733_vm4 = vmand %vm7658_vm12, %vm2717_vm11 }
 0xcdd   :  { %v2749_v17 = vsel %vm2733_vm4, %v7069_v54, 0.0 }
 0xcde   :  { %2783 = vst [vmem:[#allocation2 + $0x78] sm:$0xff] %v2767_v21  ;;  %v2765_v24 = vadd.f32 %v2749_v17, %v7072_v12 }
 0xce0   :  { %2781 = vst [vmem:[#allocation2 + $0x68] sm:$0xff] %v2765_v24 }
 0xce1   :  { %3735 = shalt.err (!%p3732_p4)
}
 0xce2   :  { %s3748_s22 = smov 128   ;;  %s3749_s5 = smov 8  }
 0xce3   :  { %2795 = dma.vmem_to_hbm [thread:$0]  %s2790_s21, 2048, %s7269_s6, [#allocation3], %s3748_s22, %s3748_s22, %s3749_s5  }
 0xce4   :  { %3744 = dma.done.wait [#allocation3], 2048  }
 0xce5   :  { %3745 = vsyncadd [#allocation3], 4294965248 }
 0xce6   :  { %2799 = vsyncpa [#allocation3], 1 }

</bundles_post_ra>
